<compile_context>
chip_gen: v7x
topology: tpu7x:2x2x1
jax: 0.10.0
libtpu: 0.0.40
codegen_flags: <defaults>
</compile_context>

<pallas_src>
import jax
import jax.numpy as jnp
import numpy as np
from jax.experimental import pallas as pl
from jax.experimental.pallas import tpu as pltpu


def _round_up(v, m):
    return (v + m - 1) // m * m


def _basic_block_kernel(x_ref, w1_ref, s1_ref, b1_ref, w2_ref, s2_ref, b2_ref,
                        out_ref, xp_ref, y1p_ref):
    """Fused BasicBlock for one image (one grid step = one batch element).

    x_ref   : (1, H, W, Cin)      input image (also the residual)
    w1_ref  : (9, Cin, Cmid)      conv1 weights, tap-major (dy*3+dx)
    s1/b1   : (1, Cmid)           folded BN1 scale / bias
    w2_ref  : (9, Cmid, Cout)     conv2 weights
    s2/b2   : (1, Cout)           folded BN2 scale / bias
    out_ref : (1, H, W, Cout)
    xp_ref  : (H+4, Wp, Cin)      VMEM scratch: zero-padded x          (Wp % 8 == 0)
    y1p_ref : (H+4, Wp, Cmid)     VMEM scratch: zero-padded conv1 out
    """
    _, H, W, _ = x_ref.shape
    Cmid = w1_ref.shape[-1]
    Cout = w2_ref.shape[-1]
    Wp = xp_ref.shape[1]
    HWp = H * Wp

    x = x_ref[0]                                    # (H, W, Cin)

    def conv3x3(src_ref, w_ref, c_out):
        # src_ref holds the zero-padded input with the image at rows [2, H+2), cols [0, W).
        # Flattening (rows, Wp) into one sublane axis is layout-free because Wp % 8 == 0.
        # Each tap is then a contiguous row-shifted slice -> one 2-D MXU matmul; the
        # row-wrap at the image border lands in zero pad columns, so valid output columns
        # are [0, W) and columns [W, Wp) are scratch that we drop.
        rows = src_ref.shape[0] * src_ref.shape[1]
        src2d = src_ref[...].reshape(rows, src_ref.shape[-1])
        acc = jnp.zeros((HWp, c_out), jnp.float32)
        for tap in range(9):
            dy, dx = tap // 3, tap % 3
            off = (dy + 1) * Wp + (dx - 1)          # >= Wp - 1 >= 0
            acc += jnp.dot(src2d[off:off + HWp, :], w_ref[tap],
                           preferred_element_type=jnp.float32)
        return acc.reshape(H, Wp, c_out)[:, :W, :]  # keep valid columns only

    # --- conv1 + BN1 + ReLU --------------------------------------------------------------
    xp_ref[...] = jnp.zeros_like(xp_ref)
    xp_ref[2:H + 2, 0:W, :] = x
    y1 = conv3x3(xp_ref, w1_ref, Cmid)
    y1 = jnp.maximum(y1 * s1_ref[0, :] + b1_ref[0, :], 0.0)

    # --- conv2 + BN2 (conv2 pads the *true* conv1 output with zeros) ----------------------
    y1p_ref[...] = jnp.zeros_like(y1p_ref)
    y1p_ref[2:H + 2, 0:W, :] = y1
    y2 = conv3x3(y1p_ref, w2_ref, Cout)
    y2 = y2 * s2_ref[0, :] + b2_ref[0, :]

    # --- identity residual + ReLU ----------------------------------------------------------
    out_ref[0] = jnp.maximum(y2 + x, 0.0).astype(out_ref.dtype)


def basic_block_forward(x_nchw, params):
    """Forward pass of BasicBlock (stride=1, downsample=None, use_cbam=False).

    Input/output are NCHW to match the PyTorch module.  (If embedded in a larger NHWC
    network, drop the two transposes and feed NHWC directly.)
    """
    x = jnp.transpose(x_nchw, (0, 2, 3, 1)).astype(jnp.float32)   # -> NHWC
    N, H, W, Cin = x.shape

    w1 = params["w1"].reshape(9, Cin, -1).astype(jnp.float32)     # HWIO -> (tap, Cin, Cmid)
    Cmid = w1.shape[-1]
    w2 = params["w2"].reshape(9, Cmid, -1).astype(jnp.float32)
    Cout = w2.shape[-1]
    assert Cin == Cout, "identity residual requires in_channels == out_channels"

    s1 = params["scale1"].reshape(1, Cmid).astype(jnp.float32)
    b1 = params["bias1"].reshape(1, Cmid).astype(jnp.float32)
    s2 = params["scale2"].reshape(1, Cout).astype(jnp.float32)
    b2 = params["bias2"].reshape(1, Cout).astype(jnp.float32)

    # Scratch width: >= W+1 zero column for the conv halo, rounded to a multiple of 8 so the
    # in-kernel flatten/split reshapes are layout-free.
    Wp = _round_up(W + 1, 8)

    out = pl.pallas_call(
        _basic_block_kernel,
        out_shape=jax.ShapeDtypeStruct((N, H, W, Cout), jnp.float32),
        grid_spec=pltpu.PrefetchScalarGridSpec(
            num_scalar_prefetch=0,
            grid=(N,),                                            # one image per step
            in_specs=[
                pl.BlockSpec((1, H, W, Cin), lambda n: (n, 0, 0, 0)),
                pl.BlockSpec((9, Cin, Cmid), lambda n: (0, 0, 0)),   # weights stay resident
                pl.BlockSpec((1, Cmid), lambda n: (0, 0)),
                pl.BlockSpec((1, Cmid), lambda n: (0, 0)),
                pl.BlockSpec((9, Cmid, Cout), lambda n: (0, 0, 0)),
                pl.BlockSpec((1, Cout), lambda n: (0, 0)),
                pl.BlockSpec((1, Cout), lambda n: (0, 0)),
            ],
            out_specs=pl.BlockSpec((1, H, W, Cout), lambda n: (n, 0, 0, 0)),
            scratch_shapes=[
                pltpu.VMEM((H + 4, Wp, Cin), jnp.float32),    # zero-padded x
                pltpu.VMEM((H + 4, Wp, Cmid), jnp.float32),   # zero-padded conv1 output
            ],
        ),
        compiler_params=pltpu.CompilerParams(
            dimension_semantics=("parallel",)),                   # v7x: shard batch on 2 TCs
    )(x, w1, s1, b1, w2, s2, b2)

    return jnp.transpose(out, (0, 3, 1, 2))                       # -> NCHW


# ----------------------------------------------------------------------------------------------
# Parameter construction + pure-JAX reference (eval-mode BN) for the correctness check.
# ----------------------------------------------------------------------------------------------
def _fold_bn(gamma, beta, mean, var, eps=1e-5):
    scale = gamma / jnp.sqrt(var + eps)
    bias = beta - mean * scale
    return scale, bias


def make_params(key, in_channels, out_channels):
    ks = jax.random.split(key, 10)
    # PyTorch conv weight layout is OIHW; transpose to HWIO for the NHWC kernel.
    w1_oihw = 0.1 * jax.random.normal(ks[0], (out_channels, in_channels, 3, 3), jnp.float32)
    w2_oihw = 0.1 * jax.random.normal(ks[1], (out_channels, out_channels, 3, 3), jnp.float32)
    g1 = 1.0 + 0.1 * jax.random.normal(ks[2], (out_channels,), jnp.float32)
    b1 = 0.1 * jax.random.normal(ks[3], (out_channels,), jnp.float32)
    m1 = 0.1 * jax.random.normal(ks[4], (out_channels,), jnp.float32)
    v1 = 1.0 + 0.1 * jnp.abs(jax.random.normal(ks[5], (out_channels,), jnp.float32))
    g2 = 1.0 + 0.1 * jax.random.normal(ks[6], (out_channels,), jnp.float32)
    b2 = 0.1 * jax.random.normal(ks[7], (out_channels,), jnp.float32)
    m2 = 0.1 * jax.random.normal(ks[8], (out_channels,), jnp.float32)
    v2 = 1.0 + 0.1 * jnp.abs(jax.random.normal(ks[9], (out_channels,), jnp.float32))
    s1, bb1 = _fold_bn(g1, b1, m1, v1)
    s2, bb2 = _fold_bn(g2, b2, m2, v2)
    return {
        "w1": jnp.transpose(w1_oihw, (2, 3, 1, 0)),  # HWIO
        "w2": jnp.transpose(w2_oihw, (2, 3, 1, 0)),
        "scale1": s1, "bias1": bb1,
        "scale2": s2, "bias2": bb2,
        "w1_oihw": w1_oihw, "w2_oihw": w2_oihw,      # kept for the pure-JAX reference
    }


def _reference_forward(x_nchw, params):
    """Pure-JAX reference (NCHW) mirroring the PyTorch forward at eval time."""
    def conv_bn(x, w_oihw, scale, bias, relu):
        y = jax.lax.conv_general_dilated(
            x, w_oihw, window_strides=(1, 1), padding=((1, 1), (1, 1)),
            dimension_numbers=("NCHW", "OIHW", "NCHW"))
        y = y * scale[None, :, None, None] + bias[None, :, None, None]
        return jnp.maximum(y, 0.0) if relu else y

    out = conv_bn(x_nchw, params["w1_oihw"], params["scale1"], params["bias1"], True)
    out = conv_bn(out, params["w2_oihw"], params["scale2"], params["bias2"], False)
    out = out + x_nchw
    return jnp.maximum(out, 0.0)


if __name__ == "__main__":
    key = jax.random.PRNGKey(0)
    k_x, k_p = jax.random.split(key)

    N, C, H, W = 2, 4, 16, 16  # in_channels == out_channels (identity residual)
    x = jax.random.normal(k_x, (N, C, H, W), jnp.float32)
    params = make_params(k_p, C, C)

    fwd = jax.jit(basic_block_forward)
    out = jax.block_until_ready(fwd(x, params))

    ref = jax.block_until_ready(_reference_forward(x, params))
    np.testing.assert_allclose(np.asarray(out), np.asarray(ref), rtol=2e-2, atol=2e-2)
    assert out.shape == (N, C, H, W) and out.dtype == jnp.float32

    print("KERNEL_OK")
</pallas_src>

<mosaic_0001>
module attributes {stable_mosaic.version = 11 : i64} {
  func.func @_basic_block_kernel(%arg0: i32, %arg1: memref<1x16x16x4xf32, #tpu.memory_space<vmem>>, %arg2: memref<9x4x4xf32, #tpu.memory_space<vmem>>, %arg3: memref<1x4xf32, #tpu.memory_space<vmem>>, %arg4: memref<1x4xf32, #tpu.memory_space<vmem>>, %arg5: memref<9x4x4xf32, #tpu.memory_space<vmem>>, %arg6: memref<1x4xf32, #tpu.memory_space<vmem>>, %arg7: memref<1x4xf32, #tpu.memory_space<vmem>>, %arg8: memref<1x16x16x4xf32, #tpu.memory_space<vmem>>, %arg9: memref<20x24x4xf32, #tpu.memory_space<vmem>>, %arg10: memref<20x24x4xf32, #tpu.memory_space<vmem>>) attributes {dimension_semantics = [#tpu.dimension_semantics<parallel>], iteration_bounds = array<i64: 2>, scalar_prefetch = 0 : i64, scratch_operands = 2 : i64, tpu.core_type = #tpu.core_type<tc>, window_params = [{transform_indices = @transform_0, window_bounds = array<i64: 1, 16, 16, 4>}, {pipeline_mode = #tpu.pipeline_mode<synchronous>, transform_indices = @transform_1, window_bounds = array<i64: 9, 4, 4>}, {pipeline_mode = #tpu.pipeline_mode<synchronous>, transform_indices = @transform_2, window_bounds = array<i64: 1, 4>}, {pipeline_mode = #tpu.pipeline_mode<synchronous>, transform_indices = @transform_3, window_bounds = array<i64: 1, 4>}, {pipeline_mode = #tpu.pipeline_mode<synchronous>, transform_indices = @transform_4, window_bounds = array<i64: 9, 4, 4>}, {pipeline_mode = #tpu.pipeline_mode<synchronous>, transform_indices = @transform_5, window_bounds = array<i64: 1, 4>}, {pipeline_mode = #tpu.pipeline_mode<synchronous>, transform_indices = @transform_6, window_bounds = array<i64: 1, 4>}, {transform_indices = @transform_7, window_bounds = array<i64: 1, 16, 16, 4>}]} {
    %c0 = arith.constant 0 : index
    %c0_0 = arith.constant 0 : index
    %c0_1 = arith.constant 0 : index
    %c0_2 = arith.constant 0 : index
    %0 = vector.load %arg1[%c0, %c0_0, %c0_1, %c0_2] : memref<1x16x16x4xf32, #tpu.memory_space<vmem>>, vector<1x16x16x4xf32>
    %1 = vector.shape_cast %0 : vector<1x16x16x4xf32> to vector<16x16x4xf32>
    %cst = arith.constant 0.000000e+00 : f32
    %2 = vector.broadcast %cst : f32 to vector<20x24x4xf32>
    %c0_3 = arith.constant 0 : index
    %c0_4 = arith.constant 0 : index
    %c0_5 = arith.constant 0 : index
    %3 = vector.load %arg9[%c0_3, %c0_4, %c0_5] : memref<20x24x4xf32, #tpu.memory_space<vmem>>, vector<20x24x4xf32>
    tpu.vector_store %arg9[%c0_3, %c0_4, %c0_5], %2 {strides = array<i32>} : memref<20x24x4xf32, #tpu.memory_space<vmem>>, vector<20x24x4xf32>,
    %c2 = arith.constant 2 : index
    %c0_6 = arith.constant 0 : index
    %c0_7 = arith.constant 0 : index
    %4 = vector.load %arg9[%c2, %c0_6, %c0_7] : memref<20x24x4xf32, #tpu.memory_space<vmem>>, vector<16x16x4xf32>
    tpu.vector_store %arg9[%c2, %c0_6, %c0_7], %1 {strides = array<i32>} : memref<20x24x4xf32, #tpu.memory_space<vmem>>, vector<16x16x4xf32>,
    %c0_8 = arith.constant 0 : index
    %c0_9 = arith.constant 0 : index
    %c0_10 = arith.constant 0 : index
    %5 = vector.load %arg9[%c0_8, %c0_9, %c0_10] : memref<20x24x4xf32, #tpu.memory_space<vmem>>, vector<20x24x4xf32>
    %6 = vector.shape_cast %5 : vector<20x24x4xf32> to vector<480x4xf32>
    %cst_11 = arith.constant 0.000000e+00 : f32
    %7 = vector.broadcast %cst_11 : f32 to vector<384x4xf32>
    %8 = vector.extract_strided_slice %6 {offsets = [23, 0], sizes = [384, 4], strides = [1, 1]} : vector<480x4xf32> to vector<384x4xf32>
    %c0_12 = arith.constant 0 : index
    %c0_13 = arith.constant 0 : index
    %c0_14 = arith.constant 0 : index
    %9 = vector.load %arg2[%c0_12, %c0_13, %c0_14] : memref<9x4x4xf32, #tpu.memory_space<vmem>>, vector<1x4x4xf32>
    %10 = vector.shape_cast %9 : vector<1x4x4xf32> to vector<4x4xf32>
    %cst_15 = arith.constant dense<0.000000e+00> : vector<384x4xf32>
    %11 = tpu.matmul %8, %10, %cst_15 {dimension_numbers = #tpu.dot_dimension_numbers<[1], [0], [0], [1], [0, 0, 1, 1], [], []>} : vector<384x4xf32>, vector<4x4xf32>, vector<384x4xf32> -> vector<384x4xf32>
    %12 = arith.addf %7, %11 : vector<384x4xf32>
    %13 = vector.extract_strided_slice %6 {offsets = [24, 0], sizes = [384, 4], strides = [1, 1]} : vector<480x4xf32> to vector<384x4xf32>
    %c1 = arith.constant 1 : index
    %c0_16 = arith.constant 0 : index
    %c0_17 = arith.constant 0 : index
    %14 = vector.load %arg2[%c1, %c0_16, %c0_17] : memref<9x4x4xf32, #tpu.memory_space<vmem>>, vector<1x4x4xf32>
    %15 = vector.shape_cast %14 : vector<1x4x4xf32> to vector<4x4xf32>
    %cst_18 = arith.constant dense<0.000000e+00> : vector<384x4xf32>
    %16 = tpu.matmul %13, %15, %cst_18 {dimension_numbers = #tpu.dot_dimension_numbers<[1], [0], [0], [1], [0, 0, 1, 1], [], []>} : vector<384x4xf32>, vector<4x4xf32>, vector<384x4xf32> -> vector<384x4xf32>
    %17 = arith.addf %12, %16 : vector<384x4xf32>
    %18 = vector.extract_strided_slice %6 {offsets = [25, 0], sizes = [384, 4], strides = [1, 1]} : vector<480x4xf32> to vector<384x4xf32>
    %c2_19 = arith.constant 2 : index
    %c0_20 = arith.constant 0 : index
    %c0_21 = arith.constant 0 : index
    %19 = vector.load %arg2[%c2_19, %c0_20, %c0_21] : memref<9x4x4xf32, #tpu.memory_space<vmem>>, vector<1x4x4xf32>
    %20 = vector.shape_cast %19 : vector<1x4x4xf32> to vector<4x4xf32>
    %cst_22 = arith.constant dense<0.000000e+00> : vector<384x4xf32>
    %21 = tpu.matmul %18, %20, %cst_22 {dimension_numbers = #tpu.dot_dimension_numbers<[1], [0], [0], [1], [0, 0, 1, 1], [], []>} : vector<384x4xf32>, vector<4x4xf32>, vector<384x4xf32> -> vector<384x4xf32>
    %22 = arith.addf %17, %21 : vector<384x4xf32>
    %23 = vector.extract_strided_slice %6 {offsets = [47, 0], sizes = [384, 4], strides = [1, 1]} : vector<480x4xf32> to vector<384x4xf32>
    %c3 = arith.constant 3 : index
    %c0_23 = arith.constant 0 : index
    %c0_24 = arith.constant 0 : index
    %24 = vector.load %arg2[%c3, %c0_23, %c0_24] : memref<9x4x4xf32, #tpu.memory_space<vmem>>, vector<1x4x4xf32>
    %25 = vector.shape_cast %24 : vector<1x4x4xf32> to vector<4x4xf32>
    %cst_25 = arith.constant dense<0.000000e+00> : vector<384x4xf32>
    %26 = tpu.matmul %23, %25, %cst_25 {dimension_numbers = #tpu.dot_dimension_numbers<[1], [0], [0], [1], [0, 0, 1, 1], [], []>} : vector<384x4xf32>, vector<4x4xf32>, vector<384x4xf32> -> vector<384x4xf32>
    %27 = arith.addf %22, %26 : vector<384x4xf32>
    %28 = vector.extract_strided_slice %6 {offsets = [48, 0], sizes = [384, 4], strides = [1, 1]} : vector<480x4xf32> to vector<384x4xf32>
    %c4 = arith.constant 4 : index
    %c0_26 = arith.constant 0 : index
    %c0_27 = arith.constant 0 : index
    %29 = vector.load %arg2[%c4, %c0_26, %c0_27] : memref<9x4x4xf32, #tpu.memory_space<vmem>>, vector<1x4x4xf32>
    %30 = vector.shape_cast %29 : vector<1x4x4xf32> to vector<4x4xf32>
    %cst_28 = arith.constant dense<0.000000e+00> : vector<384x4xf32>
    %31 = tpu.matmul %28, %30, %cst_28 {dimension_numbers = #tpu.dot_dimension_numbers<[1], [0], [0], [1], [0, 0, 1, 1], [], []>} : vector<384x4xf32>, vector<4x4xf32>, vector<384x4xf32> -> vector<384x4xf32>
    %32 = arith.addf %27, %31 : vector<384x4xf32>
    %33 = vector.extract_strided_slice %6 {offsets = [49, 0], sizes = [384, 4], strides = [1, 1]} : vector<480x4xf32> to vector<384x4xf32>
    %c5 = arith.constant 5 : index
    %c0_29 = arith.constant 0 : index
    %c0_30 = arith.constant 0 : index
    %34 = vector.load %arg2[%c5, %c0_29, %c0_30] : memref<9x4x4xf32, #tpu.memory_space<vmem>>, vector<1x4x4xf32>
    %35 = vector.shape_cast %34 : vector<1x4x4xf32> to vector<4x4xf32>
    %cst_31 = arith.constant dense<0.000000e+00> : vector<384x4xf32>
    %36 = tpu.matmul %33, %35, %cst_31 {dimension_numbers = #tpu.dot_dimension_numbers<[1], [0], [0], [1], [0, 0, 1, 1], [], []>} : vector<384x4xf32>, vector<4x4xf32>, vector<384x4xf32> -> vector<384x4xf32>
    %37 = arith.addf %32, %36 : vector<384x4xf32>
    %38 = vector.extract_strided_slice %6 {offsets = [71, 0], sizes = [384, 4], strides = [1, 1]} : vector<480x4xf32> to vector<384x4xf32>
    %c6 = arith.constant 6 : index
    %c0_32 = arith.constant 0 : index
    %c0_33 = arith.constant 0 : index
    %39 = vector.load %arg2[%c6, %c0_32, %c0_33] : memref<9x4x4xf32, #tpu.memory_space<vmem>>, vector<1x4x4xf32>
    %40 = vector.shape_cast %39 : vector<1x4x4xf32> to vector<4x4xf32>
    %cst_34 = arith.constant dense<0.000000e+00> : vector<384x4xf32>
    %41 = tpu.matmul %38, %40, %cst_34 {dimension_numbers = #tpu.dot_dimension_numbers<[1], [0], [0], [1], [0, 0, 1, 1], [], []>} : vector<384x4xf32>, vector<4x4xf32>, vector<384x4xf32> -> vector<384x4xf32>
    %42 = arith.addf %37, %41 : vector<384x4xf32>
    %43 = vector.extract_strided_slice %6 {offsets = [72, 0], sizes = [384, 4], strides = [1, 1]} : vector<480x4xf32> to vector<384x4xf32>
    %c7 = arith.constant 7 : index
    %c0_35 = arith.constant 0 : index
    %c0_36 = arith.constant 0 : index
    %44 = vector.load %arg2[%c7, %c0_35, %c0_36] : memref<9x4x4xf32, #tpu.memory_space<vmem>>, vector<1x4x4xf32>
    %45 = vector.shape_cast %44 : vector<1x4x4xf32> to vector<4x4xf32>
    %cst_37 = arith.constant dense<0.000000e+00> : vector<384x4xf32>
    %46 = tpu.matmul %43, %45, %cst_37 {dimension_numbers = #tpu.dot_dimension_numbers<[1], [0], [0], [1], [0, 0, 1, 1], [], []>} : vector<384x4xf32>, vector<4x4xf32>, vector<384x4xf32> -> vector<384x4xf32>
    %47 = arith.addf %42, %46 : vector<384x4xf32>
    %48 = vector.extract_strided_slice %6 {offsets = [73, 0], sizes = [384, 4], strides = [1, 1]} : vector<480x4xf32> to vector<384x4xf32>
    %c8 = arith.constant 8 : index
    %c0_38 = arith.constant 0 : index
    %c0_39 = arith.constant 0 : index
    %49 = vector.load %arg2[%c8, %c0_38, %c0_39] : memref<9x4x4xf32, #tpu.memory_space<vmem>>, vector<1x4x4xf32>
    %50 = vector.shape_cast %49 : vector<1x4x4xf32> to vector<4x4xf32>
    %cst_40 = arith.constant dense<0.000000e+00> : vector<384x4xf32>
    %51 = tpu.matmul %48, %50, %cst_40 {dimension_numbers = #tpu.dot_dimension_numbers<[1], [0], [0], [1], [0, 0, 1, 1], [], []>} : vector<384x4xf32>, vector<4x4xf32>, vector<384x4xf32> -> vector<384x4xf32>
    %52 = arith.addf %47, %51 : vector<384x4xf32>
    %53 = vector.shape_cast %52 : vector<384x4xf32> to vector<16x24x4xf32>
    %54 = vector.extract_strided_slice %53 {offsets = [0, 0, 0], sizes = [16, 16, 4], strides = [1, 1, 1]} : vector<16x24x4xf32> to vector<16x16x4xf32>
    %c0_41 = arith.constant 0 : index
    %c0_42 = arith.constant 0 : index
    %55 = vector.load %arg3[%c0_41, %c0_42] : memref<1x4xf32, #tpu.memory_space<vmem>>, vector<1x4xf32>
    %56 = vector.shape_cast %55 : vector<1x4xf32> to vector<4xf32>
    %57 = vector.shape_cast %56 : vector<4xf32> to vector<1x1x4xf32>
    %58 = vector.broadcast %57 : vector<1x1x4xf32> to vector<16x16x4xf32>
    %59 = arith.mulf %54, %58 : vector<16x16x4xf32>
    %c0_43 = arith.constant 0 : index
    %c0_44 = arith.constant 0 : index
    %60 = vector.load %arg4[%c0_43, %c0_44] : memref<1x4xf32, #tpu.memory_space<vmem>>, vector<1x4xf32>
    %61 = vector.shape_cast %60 : vector<1x4xf32> to vector<4xf32>
    %62 = vector.shape_cast %61 : vector<4xf32> to vector<1x1x4xf32>
    %63 = vector.broadcast %62 : vector<1x1x4xf32> to vector<16x16x4xf32>
    %64 = arith.addf %59, %63 : vector<16x16x4xf32>
    %cst_45 = arith.constant 0.000000e+00 : f32
    %65 = vector.broadcast %cst_45 : f32 to vector<16x16x4xf32>
    %66 = arith.maximumf %64, %65 : vector<16x16x4xf32>
    %cst_46 = arith.constant 0.000000e+00 : f32
    %67 = vector.broadcast %cst_46 : f32 to vector<20x24x4xf32>
    %c0_47 = arith.constant 0 : index
    %c0_48 = arith.constant 0 : index
    %c0_49 = arith.constant 0 : index
    %68 = vector.load %arg10[%c0_47, %c0_48, %c0_49] : memref<20x24x4xf32, #tpu.memory_space<vmem>>, vector<20x24x4xf32>
    tpu.vector_store %arg10[%c0_47, %c0_48, %c0_49], %67 {strides = array<i32>} : memref<20x24x4xf32, #tpu.memory_space<vmem>>, vector<20x24x4xf32>,
    %c2_50 = arith.constant 2 : index
    %c0_51 = arith.constant 0 : index
    %c0_52 = arith.constant 0 : index
    %69 = vector.load %arg10[%c2_50, %c0_51, %c0_52] : memref<20x24x4xf32, #tpu.memory_space<vmem>>, vector<16x16x4xf32>
    tpu.vector_store %arg10[%c2_50, %c0_51, %c0_52], %66 {strides = array<i32>} : memref<20x24x4xf32, #tpu.memory_space<vmem>>, vector<16x16x4xf32>,
    %c0_53 = arith.constant 0 : index
    %c0_54 = arith.constant 0 : index
    %c0_55 = arith.constant 0 : index
    %70 = vector.load %arg10[%c0_53, %c0_54, %c0_55] : memref<20x24x4xf32, #tpu.memory_space<vmem>>, vector<20x24x4xf32>
    %71 = vector.shape_cast %70 : vector<20x24x4xf32> to vector<480x4xf32>
    %cst_56 = arith.constant 0.000000e+00 : f32
    %72 = vector.broadcast %cst_56 : f32 to vector<384x4xf32>
    %73 = vector.extract_strided_slice %71 {offsets = [23, 0], sizes = [384, 4], strides = [1, 1]} : vector<480x4xf32> to vector<384x4xf32>
    %c0_57 = arith.constant 0 : index
    %c0_58 = arith.constant 0 : index
    %c0_59 = arith.constant 0 : index
    %74 = vector.load %arg5[%c0_57, %c0_58, %c0_59] : memref<9x4x4xf32, #tpu.memory_space<vmem>>, vector<1x4x4xf32>
    %75 = vector.shape_cast %74 : vector<1x4x4xf32> to vector<4x4xf32>
    %cst_60 = arith.constant dense<0.000000e+00> : vector<384x4xf32>
    %76 = tpu.matmul %73, %75, %cst_60 {dimension_numbers = #tpu.dot_dimension_numbers<[1], [0], [0], [1], [0, 0, 1, 1], [], []>} : vector<384x4xf32>, vector<4x4xf32>, vector<384x4xf32> -> vector<384x4xf32>
    %77 = arith.addf %72, %76 : vector<384x4xf32>
    %78 = vector.extract_strided_slice %71 {offsets = [24, 0], sizes = [384, 4], strides = [1, 1]} : vector<480x4xf32> to vector<384x4xf32>
    %c1_61 = arith.constant 1 : index
    %c0_62 = arith.constant 0 : index
    %c0_63 = arith.constant 0 : index
    %79 = vector.load %arg5[%c1_61, %c0_62, %c0_63] : memref<9x4x4xf32, #tpu.memory_space<vmem>>, vector<1x4x4xf32>
    %80 = vector.shape_cast %79 : vector<1x4x4xf32> to vector<4x4xf32>
    %cst_64 = arith.constant dense<0.000000e+00> : vector<384x4xf32>
    %81 = tpu.matmul %78, %80, %cst_64 {dimension_numbers = #tpu.dot_dimension_numbers<[1], [0], [0], [1], [0, 0, 1, 1], [], []>} : vector<384x4xf32>, vector<4x4xf32>, vector<384x4xf32> -> vector<384x4xf32>
    %82 = arith.addf %77, %81 : vector<384x4xf32>
    %83 = vector.extract_strided_slice %71 {offsets = [25, 0], sizes = [384, 4], strides = [1, 1]} : vector<480x4xf32> to vector<384x4xf32>
    %c2_65 = arith.constant 2 : index
    %c0_66 = arith.constant 0 : index
    %c0_67 = arith.constant 0 : index
    %84 = vector.load %arg5[%c2_65, %c0_66, %c0_67] : memref<9x4x4xf32, #tpu.memory_space<vmem>>, vector<1x4x4xf32>
    %85 = vector.shape_cast %84 : vector<1x4x4xf32> to vector<4x4xf32>
    %cst_68 = arith.constant dense<0.000000e+00> : vector<384x4xf32>
    %86 = tpu.matmul %83, %85, %cst_68 {dimension_numbers = #tpu.dot_dimension_numbers<[1], [0], [0], [1], [0, 0, 1, 1], [], []>} : vector<384x4xf32>, vector<4x4xf32>, vector<384x4xf32> -> vector<384x4xf32>
    %87 = arith.addf %82, %86 : vector<384x4xf32>
    %88 = vector.extract_strided_slice %71 {offsets = [47, 0], sizes = [384, 4], strides = [1, 1]} : vector<480x4xf32> to vector<384x4xf32>
    %c3_69 = arith.constant 3 : index
    %c0_70 = arith.constant 0 : index
    %c0_71 = arith.constant 0 : index
    %89 = vector.load %arg5[%c3_69, %c0_70, %c0_71] : memref<9x4x4xf32, #tpu.memory_space<vmem>>, vector<1x4x4xf32>
    %90 = vector.shape_cast %89 : vector<1x4x4xf32> to vector<4x4xf32>
    %cst_72 = arith.constant dense<0.000000e+00> : vector<384x4xf32>
    %91 = tpu.matmul %88, %90, %cst_72 {dimension_numbers = #tpu.dot_dimension_numbers<[1], [0], [0], [1], [0, 0, 1, 1], [], []>} : vector<384x4xf32>, vector<4x4xf32>, vector<384x4xf32> -> vector<384x4xf32>
    %92 = arith.addf %87, %91 : vector<384x4xf32>
    %93 = vector.extract_strided_slice %71 {offsets = [48, 0], sizes = [384, 4], strides = [1, 1]} : vector<480x4xf32> to vector<384x4xf32>
    %c4_73 = arith.constant 4 : index
    %c0_74 = arith.constant 0 : index
    %c0_75 = arith.constant 0 : index
    %94 = vector.load %arg5[%c4_73, %c0_74, %c0_75] : memref<9x4x4xf32, #tpu.memory_space<vmem>>, vector<1x4x4xf32>
    %95 = vector.shape_cast %94 : vector<1x4x4xf32> to vector<4x4xf32>
    %cst_76 = arith.constant dense<0.000000e+00> : vector<384x4xf32>
    %96 = tpu.matmul %93, %95, %cst_76 {dimension_numbers = #tpu.dot_dimension_numbers<[1], [0], [0], [1], [0, 0, 1, 1], [], []>} : vector<384x4xf32>, vector<4x4xf32>, vector<384x4xf32> -> vector<384x4xf32>
    %97 = arith.addf %92, %96 : vector<384x4xf32>
    %98 = vector.extract_strided_slice %71 {offsets = [49, 0], sizes = [384, 4], strides = [1, 1]} : vector<480x4xf32> to vector<384x4xf32>
    %c5_77 = arith.constant 5 : index
    %c0_78 = arith.constant 0 : index
    %c0_79 = arith.constant 0 : index
    %99 = vector.load %arg5[%c5_77, %c0_78, %c0_79] : memref<9x4x4xf32, #tpu.memory_space<vmem>>, vector<1x4x4xf32>
    %100 = vector.shape_cast %99 : vector<1x4x4xf32> to vector<4x4xf32>
    %cst_80 = arith.constant dense<0.000000e+00> : vector<384x4xf32>
    %101 = tpu.matmul %98, %100, %cst_80 {dimension_numbers = #tpu.dot_dimension_numbers<[1], [0], [0], [1], [0, 0, 1, 1], [], []>} : vector<384x4xf32>, vector<4x4xf32>, vector<384x4xf32> -> vector<384x4xf32>
    %102 = arith.addf %97, %101 : vector<384x4xf32>
    %103 = vector.extract_strided_slice %71 {offsets = [71, 0], sizes = [384, 4], strides = [1, 1]} : vector<480x4xf32> to vector<384x4xf32>
    %c6_81 = arith.constant 6 : index
    %c0_82 = arith.constant 0 : index
    %c0_83 = arith.constant 0 : index
    %104 = vector.load %arg5[%c6_81, %c0_82, %c0_83] : memref<9x4x4xf32, #tpu.memory_space<vmem>>, vector<1x4x4xf32>
    %105 = vector.shape_cast %104 : vector<1x4x4xf32> to vector<4x4xf32>
    %cst_84 = arith.constant dense<0.000000e+00> : vector<384x4xf32>
    %106 = tpu.matmul %103, %105, %cst_84 {dimension_numbers = #tpu.dot_dimension_numbers<[1], [0], [0], [1], [0, 0, 1, 1], [], []>} : vector<384x4xf32>, vector<4x4xf32>, vector<384x4xf32> -> vector<384x4xf32>
    %107 = arith.addf %102, %106 : vector<384x4xf32>
    %108 = vector.extract_strided_slice %71 {offsets = [72, 0], sizes = [384, 4], strides = [1, 1]} : vector<480x4xf32> to vector<384x4xf32>
    %c7_85 = arith.constant 7 : index
    %c0_86 = arith.constant 0 : index
    %c0_87 = arith.constant 0 : index
    %109 = vector.load %arg5[%c7_85, %c0_86, %c0_87] : memref<9x4x4xf32, #tpu.memory_space<vmem>>, vector<1x4x4xf32>
    %110 = vector.shape_cast %109 : vector<1x4x4xf32> to vector<4x4xf32>
    %cst_88 = arith.constant dense<0.000000e+00> : vector<384x4xf32>
    %111 = tpu.matmul %108, %110, %cst_88 {dimension_numbers = #tpu.dot_dimension_numbers<[1], [0], [0], [1], [0, 0, 1, 1], [], []>} : vector<384x4xf32>, vector<4x4xf32>, vector<384x4xf32> -> vector<384x4xf32>
    %112 = arith.addf %107, %111 : vector<384x4xf32>
    %113 = vector.extract_strided_slice %71 {offsets = [73, 0], sizes = [384, 4], strides = [1, 1]} : vector<480x4xf32> to vector<384x4xf32>
    %c8_89 = arith.constant 8 : index
    %c0_90 = arith.constant 0 : index
    %c0_91 = arith.constant 0 : index
    %114 = vector.load %arg5[%c8_89, %c0_90, %c0_91] : memref<9x4x4xf32, #tpu.memory_space<vmem>>, vector<1x4x4xf32>
    %115 = vector.shape_cast %114 : vector<1x4x4xf32> to vector<4x4xf32>
    %cst_92 = arith.constant dense<0.000000e+00> : vector<384x4xf32>
    %116 = tpu.matmul %113, %115, %cst_92 {dimension_numbers = #tpu.dot_dimension_numbers<[1], [0], [0], [1], [0, 0, 1, 1], [], []>} : vector<384x4xf32>, vector<4x4xf32>, vector<384x4xf32> -> vector<384x4xf32>
    %117 = arith.addf %112, %116 : vector<384x4xf32>
    %118 = vector.shape_cast %117 : vector<384x4xf32> to vector<16x24x4xf32>
    %119 = vector.extract_strided_slice %118 {offsets = [0, 0, 0], sizes = [16, 16, 4], strides = [1, 1, 1]} : vector<16x24x4xf32> to vector<16x16x4xf32>
    %c0_93 = arith.constant 0 : index
    %c0_94 = arith.constant 0 : index
    %120 = vector.load %arg6[%c0_93, %c0_94] : memref<1x4xf32, #tpu.memory_space<vmem>>, vector<1x4xf32>
    %121 = vector.shape_cast %120 : vector<1x4xf32> to vector<4xf32>
    %122 = vector.shape_cast %121 : vector<4xf32> to vector<1x1x4xf32>
    %123 = vector.broadcast %122 : vector<1x1x4xf32> to vector<16x16x4xf32>
    %124 = arith.mulf %119, %123 : vector<16x16x4xf32>
    %c0_95 = arith.constant 0 : index
    %c0_96 = arith.constant 0 : index
    %125 = vector.load %arg7[%c0_95, %c0_96] : memref<1x4xf32, #tpu.memory_space<vmem>>, vector<1x4xf32>
    %126 = vector.shape_cast %125 : vector<1x4xf32> to vector<4xf32>
    %127 = vector.shape_cast %126 : vector<4xf32> to vector<1x1x4xf32>
    %128 = vector.broadcast %127 : vector<1x1x4xf32> to vector<16x16x4xf32>
    %129 = arith.addf %124, %128 : vector<16x16x4xf32>
    %130 = arith.addf %129, %1 : vector<16x16x4xf32>
    %cst_97 = arith.constant 0.000000e+00 : f32
    %131 = vector.broadcast %cst_97 : f32 to vector<16x16x4xf32>
    %132 = arith.maximumf %130, %131 : vector<16x16x4xf32>
    %c0_98 = arith.constant 0 : index
    %c0_99 = arith.constant 0 : index
    %c0_100 = arith.constant 0 : index
    %c0_101 = arith.constant 0 : index
    %133 = vector.load %arg8[%c0_98, %c0_99, %c0_100, %c0_101] : memref<1x16x16x4xf32, #tpu.memory_space<vmem>>, vector<1x16x16x4xf32>
    %134 = vector.shape_cast %133 : vector<1x16x16x4xf32> to vector<16x16x4xf32>
    %135 = vector.shape_cast %132 : vector<16x16x4xf32> to vector<1x16x16x4xf32>
    tpu.vector_store %arg8[%c0_98, %c0_99, %c0_100, %c0_101], %135 {strides = array<i32>} : memref<1x16x16x4xf32, #tpu.memory_space<vmem>>, vector<1x16x16x4xf32>,
    return
  }
  func.func @transform_0(%arg0: i32) -> (i32, i32, i32, i32) {
    %c0_i32 = arith.constant 0 : i32
    %c0_i32_0 = arith.constant 0 : i32
    %c0_i32_1 = arith.constant 0 : i32
    %c0_i32_2 = arith.constant 0 : i32
    return %arg0, %c0_i32, %c0_i32_0, %c0_i32_1 : i32, i32, i32, i32
  }
  func.func @transform_1(%arg0: i32) -> (i32, i32, i32) {
    %c0_i32 = arith.constant 0 : i32
    %c0_i32_0 = arith.constant 0 : i32
    %c0_i32_1 = arith.constant 0 : i32
    %c0_i32_2 = arith.constant 0 : i32
    return %c0_i32, %c0_i32_0, %c0_i32_1 : i32, i32, i32
  }
  func.func @transform_2(%arg0: i32) -> (i32, i32) {
    %c0_i32 = arith.constant 0 : i32
    %c0_i32_0 = arith.constant 0 : i32
    %c0_i32_1 = arith.constant 0 : i32
    return %c0_i32, %c0_i32_0 : i32, i32
  }
  func.func @transform_3(%arg0: i32) -> (i32, i32) {
    %c0_i32 = arith.constant 0 : i32
    %c0_i32_0 = arith.constant 0 : i32
    %c0_i32_1 = arith.constant 0 : i32
    return %c0_i32, %c0_i32_0 : i32, i32
  }
  func.func @transform_4(%arg0: i32) -> (i32, i32, i32) {
    %c0_i32 = arith.constant 0 : i32
    %c0_i32_0 = arith.constant 0 : i32
    %c0_i32_1 = arith.constant 0 : i32
    %c0_i32_2 = arith.constant 0 : i32
    return %c0_i32, %c0_i32_0, %c0_i32_1 : i32, i32, i32
  }
  func.func @transform_5(%arg0: i32) -> (i32, i32) {
    %c0_i32 = arith.constant 0 : i32
    %c0_i32_0 = arith.constant 0 : i32
    %c0_i32_1 = arith.constant 0 : i32
    return %c0_i32, %c0_i32_0 : i32, i32
  }
  func.func @transform_6(%arg0: i32) -> (i32, i32) {
    %c0_i32 = arith.constant 0 : i32
    %c0_i32_0 = arith.constant 0 : i32
    %c0_i32_1 = arith.constant 0 : i32
    return %c0_i32, %c0_i32_0 : i32, i32
  }
  func.func @transform_7(%arg0: i32) -> (i32, i32, i32, i32) {
    %c0_i32 = arith.constant 0 : i32
    %c0_i32_0 = arith.constant 0 : i32
    %c0_i32_1 = arith.constant 0 : i32
    %c0_i32_2 = arith.constant 0 : i32
    return %arg0, %c0_i32, %c0_i32_0, %c0_i32_1 : i32, i32, i32, i32
  }
}

</mosaic_0001>

<bundles_post_ra>
// kernel: basic_block_forward.1
= control target key start
LH: loop header
LB: loop body
LE: loop exit
PB: predicated region body
PF: predicated region fallthrough
CT: control target
= control target key end

     0   :  { %s11928_s24 = smov 0   ;;  %s15526_s0 = inlined_call_operand.vmem [shape: f32[2,16,16,4], index: 0, kind: input, shape index: {}]   ;;  %s15527_s1 = inlined_call_operand.vmem [shape: f32[9,4,4], index: 1, kind: input, shape index: {}]   ;;  %s15528_s2 = inlined_call_operand.vmem [shape: f32[1,4], index: 2, kind: input, shape index: {}]   ;;  %s15529_s3 = inlined_call_operand.vmem [shape: f32[1,4], index: 3, kind: input, shape index: {}]   ;;  %s15530_s4 = inlined_call_operand.vmem [shape: f32[9,4,4], index: 4, kind: input, shape index: {}]   ;;  %s15531_s5 = inlined_call_operand.vmem [shape: f32[1,4], index: 5, kind: input, shape index: {}]   ;;  %s15532_s6 = inlined_call_operand.vmem [shape: f32[1,4], index: 6, kind: input, shape index: {}]   ;;  %s15533_s7 = inlined_call_operand.vmem [shape: f32[2,16,16,4], index: 7, kind: output, shape index: {}]  }
   0x1 LB: > { %s7886_s25 = sadd.s32 4294967295, %s11885_s24   ;;  %p7890_p0 = scmp.ge.s32.totalorder %s11885_s24, 1  ;;  %s11885_s24 = sphi %s11928_s24, %s17_s24  }
   0x2   : > { %p237_p1 = scmp.lt.s32.totalorder %s11885_s24, 3 }
   0x4   : > { %p238_p2 = pnand %p7890_p0, %p237_p1 }
   0x6   : > { %241 = sbr.rel (%p238_p2) target bundleno = 2148 (0x864), region = 48 }
   0xd   : > { %v11939_v0 = vld [vmem:[%s15527_s1 + $0x4] sm:$0xf]  ;;  %vm608_vm0 = vcmask 1043456   ;;  %vm311_vm1 = vcmask 31744   ;;  %p11943_p3 = scmp.lt.s32.totalorder %s7886_s25, 1  ;;  %v11887_v1 = vmov 0.0  }
   0xe   : > { %9683 = vmatprep.subr.msk.mxu0 %vm608_vm0, %v11939_v0  ;;  %315 = vst.msk [vmem:[#allocation2 + $0x18] sm:$0xff] %vm311_vm1, %v11887_v1  ;;  %314 = vst.msk [vmem:[#allocation2 + $0x10] sm:$0xff] %vm311_vm1, %v11887_v1  ;;  %v461_v2 = vld [vmem:[%s15527_s1] sm:$0xf]  ;;  %vm902_vm2 = vcmask 1040384   ;;  %vm1391_vm3 = vcmask 1046528  }
   0xf   : > { %316 = vst.msk [vmem:[#allocation2 + $0x20] sm:$0xff] %vm311_vm1, %v11887_v1  ;;  %317 = vst.msk [vmem:[#allocation2 + $0x28] sm:$0xff] %vm311_vm1, %v11887_v1  ;;  %9684 = vmatpush3.msk.msra.mxu0 %vm608_vm0, %v11939_v0  ;;  %s16330_s25 = smov (!%p11943_p3, %s7886_s25), 1  ;;  %v12236_v14 = vld [vmem:[%s15527_s1 + $0x8] sm:$0xf] }
  0x10   : > { %318 = vst.msk [vmem:[#allocation2 + $0x30] sm:$0xff] %vm311_vm1, %v11887_v1  ;;  %319 = vst.msk [vmem:[#allocation2 + $0x38] sm:$0xff] %vm311_vm1, %v11887_v1  ;;  %9757 = vmatprep.subr.msk.mxu0 %vm608_vm0, %v461_v2  ;;  %s8799_s8 = sshll.u32 %s16330_s25, 8 }
  0x11   : > { %320 = vst.msk [vmem:[#allocation2 + $0x40] sm:$0xff] %vm311_vm1, %v11887_v1  ;;  %321 = vst.msk [vmem:[#allocation2 + $0x48] sm:$0xff] %vm311_vm1, %v11887_v1  ;;  %s12191_s11 = scalar_lea.vmem %s15526_s0, %s8799_s8  ;;  %s15367_s14 = scalar_lea.vmem %s15533_s7, %s8799_s8 }
  0x12   : > { %322 = vst.msk [vmem:[#allocation2 + $0x50] sm:$0xff] %vm311_vm1, %v11887_v1  ;;  %323 = vst.msk [vmem:[#allocation2 + $0x58] sm:$0xff] %vm311_vm1, %v11887_v1  ;;  %v12194_v3 = vld [vmem:[%s12191_s11] sm:$0xff]  ;;  %v12197_v4 = vld [vmem:[%s12191_s11 + $0x8] sm:$0xff] }
  0x13   : > { %324 = vst.msk [vmem:[#allocation2 + $0x60] sm:$0xff] %vm311_vm1, %v11887_v1  ;;  %325 = vst.msk [vmem:[#allocation2 + $0x68] sm:$0xff] %vm311_vm1, %v11887_v1  ;;  %v12200_v5 = vld [vmem:[%s12191_s11 + $0x10] sm:$0xff]  ;;  %v12209_v6 = vld [vmem:[%s12191_s11 + $0x18] sm:$0xff] }
  0x14   : > { %326 = vst.msk [vmem:[#allocation2 + $0x70] sm:$0xff] %vm311_vm1, %v11887_v1  ;;  %327 = vst.msk [vmem:[#allocation2 + $0x78] sm:$0xff] %vm311_vm1, %v11887_v1  ;;  %v12212_v7 = vld [vmem:[%s12191_s11 + $0x20] sm:$0xff]  ;;  %v12215_v8 = vld [vmem:[%s12191_s11 + $0x28] sm:$0xff] }
  0x15   : > { %328 = vst.msk [vmem:[#allocation2 + $0x80] sm:$0xff] %vm311_vm1, %v11887_v1  ;;  %329 = vst.msk [vmem:[#allocation2 + $0x88] sm:$0xff] %vm311_vm1, %v11887_v1  ;;  %v12217_v9 = vld [vmem:[#allocation2 + $0x18] sm:$0xff]  ;;  %v12242_v16 = vld [vmem:[%s12191_s11 + $0x30] sm:$0xff] }
  0x16   : > { %330 = vst.msk [vmem:[#allocation2 + $0x90] sm:$0xff] %vm311_vm1, %v11887_v1  ;;  %331 = vst.msk [vmem:[#allocation2 + $0x98] sm:$0xff] %vm311_vm1, %v11887_v1  ;;  %v12219_v10 = vld [vmem:[#allocation2 + $0x20] sm:$0xff]  ;;  %v12221_v11 = vld [vmem:[#allocation2 + $0x28] sm:$0xff]  ;;  %9685 = vmatprep.mubr.msk.f32.mxu0 %vm311_vm1, %v12217_v9  ;;  %v15535_v12 = vrot.slane %v12217_v9, 7 }
  0x17   : > { %332 = vst.msk [vmem:[#allocation2 + $0xa0] sm:$0xff] %vm311_vm1, %v11887_v1  ;;  %333 = vst.msk [vmem:[#allocation2 + $0xa8] sm:$0xff] %vm311_vm1, %v11887_v1  ;;  %v906_v13 = vrot.slane %v12219_v10, 7  ;;  %9686 = vmatmul.mubr.msk.f32.vlgmr.msra.gmra.mrb[0].mxu0 %vm311_vm1, %v12219_v10  ;;  %v15534_v15 = vrot.slane %v12221_v11, 7  ;;  %v12250_v17 = vld [vmem:[%s12191_s11 + $0x38] sm:$0xff]  ;;  %v12253_v18 = vld [vmem:[%s12191_s11 + $0x40] sm:$0xff] }
  0x18   : > { %334 = vst.msk [vmem:[#allocation2 + $0xb0] sm:$0xff] %vm311_vm1, %v11887_v1  ;;  %335 = vst.msk [vmem:[#allocation2 + $0xb8] sm:$0xff] %vm311_vm1, %v11887_v1  ;;  %9758 = vmatpush3.msk.msra.mxu0 %vm608_vm0, %v461_v2  ;;  %9688 = vmatprep.mubr.msk.f32.mxu0 %vm311_vm1, %v12221_v11  ;;  %v12265_v20 = vld [vmem:[%s12191_s11 + $0x48] sm:$0xff]  ;;  %v12268_v21 = vld [vmem:[%s12191_s11 + $0x50] sm:$0xff] }
  0x19   : > { %336 = vst.msk [vmem:[#allocation2 + $0xc0] sm:$0xff] %vm311_vm1, %v11887_v1  ;;  %337 = vst.msk [vmem:[#allocation2 + $0xc8] sm:$0xff] %vm311_vm1, %v11887_v1  ;;  %v12258_v19 = vsel %vm902_vm2, %v15535_v12, %v906_v13  ;;  %9831 = vmatprep.subr.msk.mxu0 %vm608_vm0, %v12236_v14  ;;  %v12275_v22 = vsel %vm902_vm2, %v906_v13, %v15534_v15  ;;  %v12282_v23 = vld [vmem:[%s12191_s11 + $0x58] sm:$0xff]  ;;  %v12285_v24 = vld [vmem:[%s12191_s11 + $0x60] sm:$0xff] }
  0x1a   : > { %338 = vst.msk [vmem:[#allocation2 + $0xd0] sm:$0xff] %vm311_vm1, %v11887_v1  ;;  %339 = vst.msk [vmem:[#allocation2 + $0xd8] sm:$0xff] %vm311_vm1, %v11887_v1  ;;  %v12299_v27 = vld [vmem:[#allocation2 + $0x40] sm:$0xff]  ;;  %v12302_v28 = vld [vmem:[%s12191_s11 + $0x68] sm:$0xff] }
  0x1b   : > { %340 = vst.msk [vmem:[#allocation2 + $0xe0] sm:$0xff] %vm311_vm1, %v11887_v1  ;;  %341 = vst.msk [vmem:[#allocation2 + $0xe8] sm:$0xff] %vm311_vm1, %v11887_v1  ;;  %v12309_v30 = vld [vmem:[%s12191_s11 + $0x70] sm:$0xff]  ;;  %v12312_v31 = vld [vmem:[%s12191_s11 + $0x78] sm:$0xff] }
  0x1c   : > { %342 = vst.msk [vmem:[#allocation2 + $0xf0] sm:$0xff] %vm311_vm1, %v11887_v1  ;;  %343 = vst.msk [vmem:[#allocation2 + $0xf8] sm:$0xff] %vm311_vm1, %v11887_v1  ;;  %v12319_v32 = vld [vmem:[%s12191_s11 + $0x80] sm:$0xff]  ;;  %v12322_v33 = vld [vmem:[%s12191_s11 + $0x88] sm:$0xff] }
  0x1d   : > { %344 = vst.msk [vmem:[#allocation2 + $0x100] sm:$0xff] %vm311_vm1, %v11887_v1  ;;  %345 = vst.msk [vmem:[#allocation2 + $0x108] sm:$0xff] %vm311_vm1, %v11887_v1  ;;  %v12335_v35 = vld [vmem:[%s12191_s11 + $0x90] sm:$0xff]  ;;  %v12337_v36 = vld [vmem:[#allocation2 + $0x58] sm:$0xff] }
  0x1e   : > { %346 = vst.msk [vmem:[#allocation2 + $0x110] sm:$0xff] %vm311_vm1, %v11887_v1  ;;  %347 = vst.msk [vmem:[#allocation2 + $0x118] sm:$0xff] %vm311_vm1, %v11887_v1  ;;  %v12342_v37 = vld [vmem:[%s12191_s11 + $0x98] sm:$0xff]  ;;  %v12347_v38 = vld [vmem:[%s12191_s11 + $0xa0] sm:$0xff] }
  0x1f   : > { %348 = vst.msk [vmem:[#allocation2 + $0x120] sm:$0xff] %vm311_vm1, %v11887_v1  ;;  %349 = vst.msk [vmem:[#allocation2 + $0x128] sm:$0xff] %vm311_vm1, %v11887_v1  ;;  %v12350_v39 = vld [vmem:[%s12191_s11 + $0xa8] sm:$0xff]  ;;  %v12359_v40 = vld [vmem:[%s12191_s11 + $0xb0] sm:$0xff] }
  0x20   : > { %350 = vst.msk [vmem:[#allocation2 + $0x130] sm:$0xff] %vm311_vm1, %v11887_v1  ;;  %351 = vst.msk [vmem:[#allocation2 + $0x138] sm:$0xff] %vm311_vm1, %v11887_v1  ;;  %v12362_v41 = vld [vmem:[%s12191_s11 + $0xb8] sm:$0xff]  ;;  %v12373_v43 = vld [vmem:[%s12191_s11 + $0xc0] sm:$0xff] }
  0x21   : > { %352 = vst.msk [vmem:[#allocation2 + $0x140] sm:$0xff] %vm311_vm1, %v11887_v1  ;;  %353 = vst.msk [vmem:[#allocation2 + $0x148] sm:$0xff] %vm311_vm1, %v11887_v1  ;;  %v12380_v45 = vld [vmem:[%s12191_s11 + $0xc8] sm:$0xff]  ;;  %v12387_v46 = vld [vmem:[%s12191_s11 + $0xd0] sm:$0xff] }
  0x22   : > { %354 = vst.msk [vmem:[#allocation2 + $0x150] sm:$0xff] %vm311_vm1, %v11887_v1  ;;  %355 = vst.msk [vmem:[#allocation2 + $0x158] sm:$0xff] %vm311_vm1, %v11887_v1  ;;  %v12390_v47 = vld [vmem:[%s12191_s11 + $0xd8] sm:$0xff]  ;;  %v12394_v48 = vld [vmem:[#allocation2 + $0x70] sm:$0xff] }
  0x23   : > { %356 = vst.msk [vmem:[#allocation2 + $0x160] sm:$0xff] %vm311_vm1, %v11887_v1  ;;  %357 = vst.msk [vmem:[#allocation2 + $0x168] sm:$0xff] %vm311_vm1, %v11887_v1  ;;  %v12401_v49 = vld [vmem:[%s12191_s11 + $0xe0] sm:$0xff]  ;;  %v12404_v50 = vld [vmem:[%s12191_s11 + $0xe8] sm:$0xff] }
  0x24   : > { %358 = vst.msk [vmem:[#allocation2 + $0x170] sm:$0xff] %vm311_vm1, %v11887_v1  ;;  %359 = vst.msk [vmem:[#allocation2 + $0x178] sm:$0xff] %vm311_vm1, %v11887_v1  ;;  %v12418_v53 = vld [vmem:[#allocation2 + $0x88] sm:$0xff]  ;;  %v12432_v56 = vld [vmem:[#allocation2 + $0xa0] sm:$0xff] }
  0x25   : > { %360 = vst.msk [vmem:[#allocation2 + $0x180] sm:$0xff] %vm311_vm1, %v11887_v1  ;;  %361 = vst.msk [vmem:[#allocation2 + $0x188] sm:$0xff] %vm311_vm1, %v11887_v1  ;;  %v12442_v59 = vld [vmem:[#allocation2 + $0xb8] sm:$0xff]  ;;  %v12456_v62 = vld [vmem:[#allocation2 + $0xd0] sm:$0xff] }
  0x26   : > { %362 = vst.msk [vmem:[#allocation2 + $0x190] sm:$0xff] %vm311_vm1, %v11887_v1  ;;  %363 = vst.msk [vmem:[#allocation2 + $0x198] sm:$0xff] %vm311_vm1, %v11887_v1  ;;  %v12480_v15 = vld [vmem:[#allocation2 + $0x100] sm:$0xff] }
  0x27   : > { %364 = vst.msk [vmem:[#allocation2 + $0x1a0] sm:$0xff] %vm311_vm1, %v11887_v1  ;;  %365 = vst.msk [vmem:[#allocation2 + $0x1a8] sm:$0xff] %vm311_vm1, %v11887_v1 }
  0x28   : > { %366 = vst.msk [vmem:[#allocation2 + $0x1b0] sm:$0xff] %vm311_vm1, %v11887_v1  ;;  %367 = vst.msk [vmem:[#allocation2 + $0x1b8] sm:$0xff] %vm311_vm1, %v11887_v1 }
  0x29   : > { %368 = vst.msk [vmem:[#allocation2 + $0x1c0] sm:$0xff] %vm311_vm1, %v11887_v1  ;;  %369 = vst.msk [vmem:[#allocation2 + $0x1c8] sm:$0xff] %vm311_vm1, %v11887_v1 }
  0x2a   : > { %4043 = vst.msk [vmem:[#allocation3 + $0x10] sm:$0xff] %vm311_vm1, %v11887_v1  ;;  %4044 = vst.msk [vmem:[#allocation3 + $0x18] sm:$0xff] %vm311_vm1, %v11887_v1 }
  0x2b   : > { %4045 = vst.msk [vmem:[#allocation3 + $0x20] sm:$0xff] %vm311_vm1, %v11887_v1  ;;  %4046 = vst.msk [vmem:[#allocation3 + $0x28] sm:$0xff] %vm311_vm1, %v11887_v1 }
  0x2c   : > { %4047 = vst.msk [vmem:[#allocation3 + $0x30] sm:$0xff] %vm311_vm1, %v11887_v1  ;;  %4048 = vst.msk [vmem:[#allocation3 + $0x38] sm:$0xff] %vm311_vm1, %v11887_v1 }
  0x2d   : > { %4049 = vst.msk [vmem:[#allocation3 + $0x40] sm:$0xff] %vm311_vm1, %v11887_v1  ;;  %4050 = vst.msk [vmem:[#allocation3 + $0x48] sm:$0xff] %vm311_vm1, %v11887_v1 }
  0x2e   : > { %4051 = vst.msk [vmem:[#allocation3 + $0x50] sm:$0xff] %vm311_vm1, %v11887_v1  ;;  %4052 = vst.msk [vmem:[#allocation3 + $0x58] sm:$0xff] %vm311_vm1, %v11887_v1 }
  0x2f   : > { %4053 = vst.msk [vmem:[#allocation3 + $0x60] sm:$0xff] %vm311_vm1, %v11887_v1  ;;  %4054 = vst.msk [vmem:[#allocation3 + $0x68] sm:$0xff] %vm311_vm1, %v11887_v1 }
  0x30   : > { %4055 = vst.msk [vmem:[#allocation3 + $0x70] sm:$0xff] %vm311_vm1, %v11887_v1  ;;  %4056 = vst.msk [vmem:[#allocation3 + $0x78] sm:$0xff] %vm311_vm1, %v11887_v1 }
  0x31   : > { %4057 = vst.msk [vmem:[#allocation3 + $0x80] sm:$0xff] %vm311_vm1, %v11887_v1  ;;  %4058 = vst.msk [vmem:[#allocation3 + $0x88] sm:$0xff] %vm311_vm1, %v11887_v1 }
  0x32   : > { %4059 = vst.msk [vmem:[#allocation3 + $0x90] sm:$0xff] %vm311_vm1, %v11887_v1  ;;  %4060 = vst.msk [vmem:[#allocation3 + $0x98] sm:$0xff] %vm311_vm1, %v11887_v1 }
  0x33   : > { %4061 = vst.msk [vmem:[#allocation3 + $0xa0] sm:$0xff] %vm311_vm1, %v11887_v1  ;;  %4062 = vst.msk [vmem:[#allocation3 + $0xa8] sm:$0xff] %vm311_vm1, %v11887_v1 }
  0x34   : > { %4063 = vst.msk [vmem:[#allocation3 + $0xb0] sm:$0xff] %vm311_vm1, %v11887_v1  ;;  %4064 = vst.msk [vmem:[#allocation3 + $0xb8] sm:$0xff] %vm311_vm1, %v11887_v1 }
  0x35   : > { %4065 = vst.msk [vmem:[#allocation3 + $0xc0] sm:$0xff] %vm311_vm1, %v11887_v1  ;;  %4066 = vst.msk [vmem:[#allocation3 + $0xc8] sm:$0xff] %vm311_vm1, %v11887_v1 }
  0x36   : > { %4067 = vst.msk [vmem:[#allocation3 + $0xd0] sm:$0xff] %vm311_vm1, %v11887_v1  ;;  %4068 = vst.msk [vmem:[#allocation3 + $0xd8] sm:$0xff] %vm311_vm1, %v11887_v1 }
  0x37   : > { %4069 = vst.msk [vmem:[#allocation3 + $0xe0] sm:$0xff] %vm311_vm1, %v11887_v1  ;;  %4070 = vst.msk [vmem:[#allocation3 + $0xe8] sm:$0xff] %vm311_vm1, %v11887_v1 }
  0x38   : > { %4071 = vst.msk [vmem:[#allocation3 + $0xf0] sm:$0xff] %vm311_vm1, %v11887_v1  ;;  %4072 = vst.msk [vmem:[#allocation3 + $0xf8] sm:$0xff] %vm311_vm1, %v11887_v1 }
  0x39   : > { %4073 = vst.msk [vmem:[#allocation3 + $0x100] sm:$0xff] %vm311_vm1, %v11887_v1  ;;  %4074 = vst.msk [vmem:[#allocation3 + $0x108] sm:$0xff] %vm311_vm1, %v11887_v1 }
  0x3a   : > { %4075 = vst.msk [vmem:[#allocation3 + $0x110] sm:$0xff] %vm311_vm1, %v11887_v1  ;;  %4076 = vst.msk [vmem:[#allocation3 + $0x118] sm:$0xff] %vm311_vm1, %v11887_v1 }
  0x3b   : > { %4077 = vst.msk [vmem:[#allocation3 + $0x120] sm:$0xff] %vm311_vm1, %v11887_v1  ;;  %4078 = vst.msk [vmem:[#allocation3 + $0x128] sm:$0xff] %vm311_vm1, %v11887_v1 }
  0x3c   : > { %4079 = vst.msk [vmem:[#allocation3 + $0x130] sm:$0xff] %vm311_vm1, %v11887_v1  ;;  %4080 = vst.msk [vmem:[#allocation3 + $0x138] sm:$0xff] %vm311_vm1, %v11887_v1 }
  0x3d   : > { %4081 = vst.msk [vmem:[#allocation3 + $0x140] sm:$0xff] %vm311_vm1, %v11887_v1  ;;  %4082 = vst.msk [vmem:[#allocation3 + $0x148] sm:$0xff] %vm311_vm1, %v11887_v1 }
  0x3e   : > { %4083 = vst.msk [vmem:[#allocation3 + $0x150] sm:$0xff] %vm311_vm1, %v11887_v1  ;;  %4084 = vst.msk [vmem:[#allocation3 + $0x158] sm:$0xff] %vm311_vm1, %v11887_v1 }
  0x3f   : > { %4085 = vst.msk [vmem:[#allocation3 + $0x160] sm:$0xff] %vm311_vm1, %v11887_v1  ;;  %4086 = vst.msk [vmem:[#allocation3 + $0x168] sm:$0xff] %vm311_vm1, %v11887_v1 }
  0x40   : > { %4087 = vst.msk [vmem:[#allocation3 + $0x170] sm:$0xff] %vm311_vm1, %v11887_v1  ;;  %4088 = vst.msk [vmem:[#allocation3 + $0x178] sm:$0xff] %vm311_vm1, %v11887_v1 }
  0x41   : > { %4089 = vst.msk [vmem:[#allocation3 + $0x180] sm:$0xff] %vm311_vm1, %v11887_v1  ;;  %4090 = vst.msk [vmem:[#allocation3 + $0x188] sm:$0xff] %vm311_vm1, %v11887_v1 }
  0x42   : > { %4091 = vst.msk [vmem:[#allocation3 + $0x190] sm:$0xff] %vm311_vm1, %v11887_v1  ;;  %4092 = vst.msk [vmem:[#allocation3 + $0x198] sm:$0xff] %vm311_vm1, %v11887_v1 }
  0x43   : > { %4093 = vst.msk [vmem:[#allocation3 + $0x1a0] sm:$0xff] %vm311_vm1, %v11887_v1  ;;  %4094 = vst.msk [vmem:[#allocation3 + $0x1a8] sm:$0xff] %vm311_vm1, %v11887_v1 }
  0x44   : > { %4095 = vst.msk [vmem:[#allocation3 + $0x1b0] sm:$0xff] %vm311_vm1, %v11887_v1  ;;  %4096 = vst.msk [vmem:[#allocation3 + $0x1b8] sm:$0xff] %vm311_vm1, %v11887_v1 }
  0x45   : > { %4097 = vst.msk [vmem:[#allocation3 + $0x1c0] sm:$0xff] %vm311_vm1, %v11887_v1  ;;  %4098 = vst.msk [vmem:[#allocation3 + $0x1c8] sm:$0xff] %vm311_vm1, %v11887_v1  ;;  %v12466_v1 = vld [vmem:[#allocation2 + $0xe8] sm:$0xff] }
  0x46   : > { %15869 = vst [vmem:[#allocation4_spill] sm:$0xff] %v12194_v3  ;;  %15870 = vst [vmem:[#allocation5_spill] sm:$0xff] %v12197_v4 }
  0x47   : > { %15871 = vst [vmem:[#allocation6_spill] sm:$0xff] %v12200_v5  ;;  %373 = vst.msk [vmem:[#allocation2 + $0x30] sm:$0xff] %vm311_vm1, %v12194_v3 }
  0x48   : > { %374 = vst.msk [vmem:[#allocation2 + $0x38] sm:$0xff] %vm311_vm1, %v12197_v4  ;;  %375 = vst.msk [vmem:[#allocation2 + $0x48] sm:$0xff] %vm311_vm1, %v12200_v5  ;;  %v926_v5 = vrot.slane %v12394_v48, 7 }
  0x49   : > { %15872 = vst [vmem:[#allocation7_spill] sm:$0xff] %v12209_v6  ;;  %15873 = vst [vmem:[#allocation8_spill] sm:$0xff] %v12212_v7 }
  0x4a   : > { %15874 = vst [vmem:[#allocation9_spill] sm:$0xff] %v12215_v8  ;;  %376 = vst.msk [vmem:[#allocation2 + $0x50] sm:$0xff] %vm311_vm1, %v12209_v6 }
  0x4b   : > { %377 = vst.msk [vmem:[#allocation2 + $0x60] sm:$0xff] %vm311_vm1, %v12212_v7  ;;  %378 = vst.msk [vmem:[#allocation2 + $0x68] sm:$0xff] %vm311_vm1, %v12215_v8 }
  0x4c   : > { %15875 = vst [vmem:[#allocation10_spill] sm:$0xff] %v12242_v16  ;;  %379 = vst.msk [vmem:[#allocation2 + $0x78] sm:$0xff] %vm311_vm1, %v12242_v16  ;;  %v12576_v16 = vld [vmem:[%s15527_s1 + $0xc] sm:$0xf] }
  0x4d   : > { %15876 = vst [vmem:[#allocation11_spill] sm:$0xff] %v12250_v17  ;;  %15877 = vst [vmem:[#allocation12_spill] sm:$0xff] %v12253_v18 }
  0x4e   : > { %380 = vst.msk [vmem:[#allocation2 + $0x80] sm:$0xff] %vm311_vm1, %v12250_v17  ;;  %381 = vst.msk [vmem:[#allocation2 + $0x90] sm:$0xff] %vm311_vm1, %v12253_v18  ;;  %v12287_v25 = vld [vmem:[#allocation2 + $0x30] sm:$0xff]  ;;  %v15899_v18 = vrot.slane %v12217_v9, 7 }
  0x4f   : > { %15878 = vst [vmem:[#allocation13_spill] sm:$0xff] %v12265_v20  ;;  %15879 = vst [vmem:[#allocation14_spill] sm:$0xff] %v12268_v21  ;;  %v12289_v26 = vld [vmem:[#allocation2 + $0x38] sm:$0xff]  ;;  %9689 = vmatmul.mubr.msk.f32.gmra.mrb[2].mxu0 %vm311_vm1, %v12287_v25  ;;  %v12304_v29 = vld [vmem:[#allocation2 + $0x48] sm:$0xff]  ;;  %v910_v17 = vrot.slane %v12287_v25, 7 }
  0x50   : > { %382 = vst.msk [vmem:[#allocation2 + $0x98] sm:$0xff] %vm311_vm1, %v12265_v20  ;;  %383 = vst.msk [vmem:[#allocation2 + $0xa8] sm:$0xff] %vm311_vm1, %v12268_v21  ;;  %9691 = vmatprep.mubr.msk.f32.mxu0 %vm311_vm1, %v12289_v26  ;;  %v12563_v21 = vld [vmem:[#allocation2 + $0x190] sm:$0xff]  ;;  %v916_v7 = vrot.slane %v12304_v29, 7 }
  0x51   : > { %15880 = vst [vmem:[#allocation15_spill] sm:$0xff] %v12282_v23  ;;  %15881 = vst [vmem:[#allocation16_spill] sm:$0xff] %v12285_v24  ;;  %v12332_v34 = vld [vmem:[#allocation2 + $0x50] sm:$0xff] }
  0x52   : > { %384 = vst.msk [vmem:[#allocation2 + $0xb0] sm:$0xff] %vm311_vm1, %v12282_v23  ;;  %385 = vst.msk [vmem:[#allocation2 + $0xc0] sm:$0xff] %vm311_vm1, %v12285_v24  ;;  %v12366_v42 = vld [vmem:[#allocation2 + $0x60] sm:$0xff]  ;;  %v12375_v44 = vld [vmem:[#allocation2 + $0x68] sm:$0xff] }
  0x53   : > { %15882 = vst [vmem:[#allocation17_spill] sm:$0xff] %v12302_v28  ;;  %386 = vst.msk [vmem:[#allocation2 + $0xc8] sm:$0xff] %vm311_vm1, %v12302_v28  ;;  %9692 = vmatmul.mubr.msk.f32.gmra.mrb[4].mxu0 %vm311_vm1, %v12299_v27  ;;  %v12406_v51 = vld [vmem:[#allocation2 + $0x78] sm:$0xff]  ;;  %v922_v8 = vrot.slane %v12366_v42, 7  ;;  %v924_v6 = vrot.slane %v12375_v44, 7 }
  0x54   : > { %15883 = vst [vmem:[#allocation18_spill] sm:$0xff] %v12309_v30  ;;  %15884 = vst [vmem:[#allocation19_spill] sm:$0xff] %v12312_v31  ;;  %9694 = vmatprep.mubr.msk.f32.mxu0 %vm311_vm1, %v12304_v29  ;;  %v928_v3 = vrot.slane %v12406_v51, 7 }
  0x55   : > { %387 = vst.msk [vmem:[#allocation2 + $0xd8] sm:$0xff] %vm311_vm1, %v12309_v30  ;;  %388 = vst.msk [vmem:[#allocation2 + $0xe0] sm:$0xff] %vm311_vm1, %v12312_v31  ;;  %v12416_v52 = vld [vmem:[#allocation2 + $0x80] sm:$0xff]  ;;  %v12424_v54 = vld [vmem:[#allocation2 + $0x90] sm:$0xff] }
  0x56   : > { %15885 = vst [vmem:[#allocation20_spill] sm:$0xff] %v12319_v32  ;;  %15886 = vst [vmem:[#allocation21_spill] sm:$0xff] %v12322_v33  ;;  %v12549_v31 = vld [vmem:[#allocation2 + $0x178] sm:$0xff]  ;;  %v405_v30 = vld [vmem:[#allocation2 + $0x10] sm:$0xff]  ;;  %v930_v4 = vrot.slane %v12416_v52, 7 }
  0x57   : > { %389 = vst.msk [vmem:[#allocation2 + $0xf0] sm:$0xff] %vm311_vm1, %v12319_v32  ;;  %390 = vst.msk [vmem:[#allocation2 + $0xf8] sm:$0xff] %vm311_vm1, %v12322_v33  ;;  %9695 = vmatmul.mubr.msk.f32.gmra.mrb[6].mxu0 %vm311_vm1, %v12332_v34  ;;  %v12426_v55 = vld [vmem:[#allocation2 + $0x98] sm:$0xff]  ;;  %v12434_v57 = vld [vmem:[#allocation2 + $0xa8] sm:$0xff]  ;;  %v903_v23 = vrot.slane %v405_v30, 7  ;;  %v912_v30 = vrot.slane %v12289_v26, 7 }
  0x58   : > { %15887 = vst [vmem:[#allocation22_spill] sm:$0xff] %v12335_v35  ;;  %391 = vst.msk [vmem:[#allocation2 + $0x108] sm:$0xff] %vm311_vm1, %v12335_v35  ;;  %9697 = vmatprep.mubr.msk.f32.mxu0 %vm311_vm1, %v12337_v36  ;;  %v12539_v35 = vld [vmem:[#allocation2 + $0x160] sm:$0xff] }
  0x59   : > { %15888 = vst [vmem:[#allocation23_spill] sm:$0xff] %v12342_v37  ;;  %392 = vst.msk [vmem:[#allocation2 + $0x110] sm:$0xff] %vm311_vm1, %v12342_v37  ;;  %v12440_v58 = vld [vmem:[#allocation2 + $0xb0] sm:$0xff]  ;;  %v12448_v60 = vld [vmem:[#allocation2 + $0xc0] sm:$0xff]  ;;  %v905_v20 = vsel %vm902_vm2, %v903_v23, %v15899_v18  ;;  %v15900_v18 = vrot.slane %v12221_v11, 7  ;;  %v12591_v23 = vsel %vm902_vm2, %v910_v17, %v912_v30 }
  0x5a   : > { %15889 = vst [vmem:[#allocation24_spill] sm:$0xff] %v12347_v38  ;;  %15890 = vst [vmem:[#allocation25_spill] sm:$0xff] %v12350_v39  ;;  %v12450_v61 = vld [vmem:[#allocation2 + $0xc8] sm:$0xff] }
  0x5b   : > { %393 = vst.msk [vmem:[#allocation2 + $0x120] sm:$0xff] %vm311_vm1, %v12347_v38  ;;  %394 = vst.msk [vmem:[#allocation2 + $0x128] sm:$0xff] %vm311_vm1, %v12350_v39  ;;  %9698 = vmatmul.mubr.msk.f32.gmra.mrb[8].mxu0 %vm311_vm1, %v12366_v42  ;;  %v12515_v38 = vld [vmem:[#allocation2 + $0x130] sm:$0xff] }
  0x5c   : > { %15891 = vst [vmem:[#allocation26_spill] sm:$0xff] %v12359_v40  ;;  %15892 = vst [vmem:[#allocation27_spill] sm:$0xff] %v12362_v41  ;;  %9700 = vmatprep.mubr.msk.f32.mxu0 %vm311_vm1, %v12375_v44  ;;  %v12458_v63 = vld [vmem:[#allocation2 + $0xd8] sm:$0xff]  ;;  %v12464_v0 = vld [vmem:[#allocation2 + $0xe0] sm:$0xff] }
  0x5d   : > { %395 = vst.msk [vmem:[#allocation2 + $0x138] sm:$0xff] %vm311_vm1, %v12359_v40  ;;  %396 = vst.msk [vmem:[#allocation2 + $0x140] sm:$0xff] %vm311_vm1, %v12362_v41 }
  0x5e   : > { %15893 = vst [vmem:[#allocation28_spill] sm:$0xff] %v12373_v43  ;;  %397 = vst.msk [vmem:[#allocation2 + $0x150] sm:$0xff] %vm311_vm1, %v12373_v43  ;;  %v12472_v2 = vld [vmem:[#allocation2 + $0xf0] sm:$0xff]  ;;  %v12474_v13 = vld [vmem:[#allocation2 + $0xf8] sm:$0xff] }
  0x5f   : > { %15894 = vst [vmem:[#allocation29_spill] sm:$0xff] %v12380_v45  ;;  %398 = vst.msk [vmem:[#allocation2 + $0x158] sm:$0xff] %vm311_vm1, %v12380_v45  ;;  %9701 = vmatmul.mubr.msk.f32.gmra.mrb[10].mxu0 %vm311_vm1, %v12394_v48  ;;  %v12482_v12 = vld [vmem:[#allocation2 + $0x108] sm:$0xff]  ;;  %v12493_v43 = vld [vmem:[#allocation2 + $0x118] sm:$0xff] }
  0x60   : > { %15895 = vst [vmem:[#allocation30_spill] sm:$0xff] %v12387_v46  ;;  %15896 = vst [vmem:[#allocation31_spill] sm:$0xff] %v12390_v47  ;;  %9703 = vmatprep.mubr.msk.f32.mxu0 %vm311_vm1, %v12406_v51 }
  0x61   : > { %399 = vst.msk [vmem:[#allocation2 + $0x168] sm:$0xff] %vm311_vm1, %v12387_v46  ;;  %400 = vst.msk [vmem:[#allocation2 + $0x170] sm:$0xff] %vm311_vm1, %v12390_v47  ;;  %v15546_v47 = vrot.slane %v12221_v11, 1  ;;  %v12491_v46 = vld [vmem:[#allocation2 + $0x110] sm:$0xff] }
  0x62   : > { %15897 = vst [vmem:[#allocation32_spill] sm:$0xff] %v12401_v49  ;;  %15898 = vst [vmem:[#allocation33_spill] sm:$0xff] %v12404_v50  ;;  %v12499_v45 = vld [vmem:[#allocation2 + $0x120] sm:$0xff]  ;;  %v12509_v40 = vld [vmem:[#allocation2 + $0x128] sm:$0xff] }
  0x63   : > { %401 = vst.msk [vmem:[#allocation2 + $0x180] sm:$0xff] %vm311_vm1, %v12401_v49  ;;  %402 = vst.msk [vmem:[#allocation2 + $0x188] sm:$0xff] %vm311_vm1, %v12404_v50  ;;  %9704 = vmatmul.mubr.msk.f32.gmra.mrb[12].mxu0 %vm311_vm1, %v12416_v52  ;;  %v1392_v49 = vrot.slane %v12217_v9, 1  ;;  %v1393_v50 = vrot.slane %v12219_v10, 1  ;;  %v914_v9 = vrot.slane %v12299_v27, 7 }
  0x64   : > { %9706 = vmatprep.mubr.msk.f32.mxu0 %vm311_vm1, %v12418_v53  ;;  %v12517_v39 = vld [vmem:[#allocation2 + $0x138] sm:$0xff] }
  0x65   : > { %v12502_v10 = vsel %vm1391_vm3, %v1392_v49, %v1393_v50  ;;  %v12507_v41 = vsel %vm1391_vm3, %v1393_v50, %v15546_v47  ;;  %v12523_v49 = vld [vmem:[#allocation2 + $0x140] sm:$0xff]  ;;  %v12525_v50 = vld [vmem:[#allocation2 + $0x148] sm:$0xff]  ;;  %v12531_v47 = vld [vmem:[#allocation2 + $0x150] sm:$0xff] }
  0x66   : > { %v12533_v37 = vld [vmem:[#allocation2 + $0x158] sm:$0xff] }
  0x67   : > { %9707 = vmatmul.mubr.msk.f32.gmra.mrb[14].mxu0 %vm311_vm1, %v12424_v54 }
  0x68   : > { %9709 = vmatprep.mubr.msk.f32.mxu0 %vm311_vm1, %v12426_v55  ;;  %v12541_v32 = vld [vmem:[#allocation2 + $0x168] sm:$0xff]  ;;  %v12547_v33 = vld [vmem:[#allocation2 + $0x170] sm:$0xff] }
  0x6a   : > { %v12555_v24 = vld [vmem:[#allocation2 + $0x180] sm:$0xff]  ;;  %v12557_v28 = vld [vmem:[#allocation2 + $0x188] sm:$0xff] }
  0x6b   : > { %9710 = vmatmul.mubr.msk.f32.gmra.mrb[16].mxu0 %vm311_vm1, %v12432_v56 }
  0x6c   : > { %9712 = vmatprep.mubr.msk.f32.mxu0 %vm311_vm1, %v12434_v57 }
  0x6f   : > { %9713 = vmatmul.mubr.msk.f32.gmra.mrb[18].mxu0 %vm311_vm1, %v12440_v58 }
  0x70   : > { %9715 = vmatprep.mubr.msk.f32.mxu0 %vm311_vm1, %v12442_v59 }
  0x73   : > { %9716 = vmatmul.mubr.msk.f32.gmra.mrb[20].mxu0 %vm311_vm1, %v12448_v60 }
  0x74   : > { %9718 = vmatprep.mubr.msk.f32.mxu0 %vm311_vm1, %v12450_v61 }
  0x77   : > { %9719 = vmatmul.mubr.msk.f32.gmra.mrb[22].mxu0 %vm311_vm1, %v12456_v62 }
  0x78   : > { %9721 = vmatprep.mubr.msk.f32.mxu0 %vm311_vm1, %v12458_v63 }
  0x7b   : > { %9722 = vmatmul.mubr.msk.f32.gmra.mrb[24].mxu0 %vm311_vm1, %v12464_v0 }
  0x7c   : > { %9724 = vmatprep.mubr.msk.f32.mxu0 %vm311_vm1, %v12466_v1 }
  0x7f   : > { %9725 = vmatmul.mubr.msk.f32.gmra.mrb[26].mxu0 %vm311_vm1, %v12472_v2 }
  0x80   : > { %9727 = vmatprep.mubr.msk.f32.mxu0 %vm311_vm1, %v12474_v13 }
  0x83   : > { %9728 = vmatmul.mubr.msk.f32.gmra.mrb[28].mxu0 %vm311_vm1, %v12480_v15 }
  0x84   : > { %9730 = vmatprep.mubr.msk.f32.mxu0 %vm311_vm1, %v12482_v12 }
  0x87   : > { %9731 = vmatmul.mubr.msk.f32.gmra.mrb[30].mxu0 %vm311_vm1, %v12491_v46 }
  0x88   : > { %9733 = vmatprep.mubr.msk.f32.mxu0 %vm311_vm1, %v12493_v43 }
  0x8b   : > { %9734 = vmatmul.mubr.msk.f32.gmra.mrb[32].mxu0 %vm311_vm1, %v12499_v45 }
  0x8c   : > { %9736 = vmatprep.mubr.msk.f32.mxu0 %vm311_vm1, %v12509_v40 }
  0x8f   : > { %9737 = vmatmul.mubr.msk.f32.gmra.mrb[34].mxu0 %vm311_vm1, %v12515_v38 }
  0x90   : > { %9739 = vmatprep.mubr.msk.f32.mxu0 %vm311_vm1, %v12517_v39 }
  0x93   : > { %9740 = vmatmul.mubr.msk.f32.gmra.mrb[36].mxu0 %vm311_vm1, %v12523_v49 }
  0x94   : > { %9742 = vmatprep.mubr.msk.f32.mxu0 %vm311_vm1, %v12525_v50 }
  0x97   : > { %9743 = vmatmul.mubr.msk.f32.gmra.mrb[38].mxu0 %vm311_vm1, %v12531_v47 }
  0x98   : > { %9745 = vmatprep.mubr.msk.f32.mxu0 %vm311_vm1, %v12533_v37 }
  0x9b   : > { %9746 = vmatmul.mubr.msk.f32.gmra.mrb[40].mxu0 %vm311_vm1, %v12539_v35 }
  0x9c   : > { %9748 = vmatprep.mubr.msk.f32.mxu0 %vm311_vm1, %v12541_v32 }
  0x9f   : > { %9749 = vmatmul.mubr.msk.f32.gmra.mrb[42].mxu0 %vm311_vm1, %v12547_v33 }
  0xa0   : > { %9751 = vmatprep.mubr.msk.f32.mxu0 %vm311_vm1, %v12549_v31 }
  0xa3   : > { %9752 = vmatmul.mubr.msk.f32.gmra.mrb[44].mxu0 %vm311_vm1, %v12555_v24 }
  0xa4   : > { %9754 = vmatprep.mubr.msk.f32.mxu0 %vm311_vm1, %v12557_v28 }
  0xa7   : > { %9755 = vmatmul.mubr.msk.f32.gmra.mrb[46].mxu0 %vm311_vm1, %v12563_v21 }
  0xa8   : > { %9759 = vmatprep.mubr.msk.f32.mxu0 %vm311_vm1, %v905_v20  ;;  %v12588_v20 = vsel %vm902_vm2, %v15900_v18, %v910_v17  ;;  %v920_v17 = vrot.slane %v12337_v36, 7 }
  0xab   : > { %9760 = vmatmul.mubr.msk.f32.vlgmr.msra.gmra.mrb[0].mxu0 %vm311_vm1, %v12258_v19  ;;  %v918_v19 = vrot.slane %v12332_v34, 7 }
  0xac   : > { %9832 = vmatpush3.msk.msra.mxu0 %vm608_vm0, %v12236_v14  ;;  %9762 = vmatprep.mubr.msk.f32.mxu0 %vm311_vm1, %v12275_v22  ;;  %v12601_v14 = vsel %vm902_vm2, %v912_v30, %v914_v9  ;;  %v12605_v22 = vsel %vm902_vm2, %v914_v9, %v916_v7  ;;  %v12625_v9 = vsel %vm902_vm2, %v920_v17, %v922_v8 }
  0xad   : > { %9905 = vmatprep.subr.msk.mxu0 %vm608_vm0, %v12576_v16  ;;  %v12613_v18 = vsel %vm902_vm2, %v916_v7, %v918_v19  ;;  %v12617_v30 = vsel %vm902_vm2, %v918_v19, %v920_v17  ;;  %15903 = vst [vmem:[#allocation36_spill] sm:$0xff] %v12625_v9  ;;  %v12629_v7 = vsel %vm902_vm2, %v922_v8, %v924_v6 }
  0xae   : > { %15901 = vst [vmem:[#allocation34_spill] sm:$0xff] %v12613_v18  ;;  %15902 = vst [vmem:[#allocation35_spill] sm:$0xff] %v12617_v30  ;;  %v12637_v19 = vsel %vm902_vm2, %v924_v6, %v926_v5  ;;  %v12641_v17 = vsel %vm902_vm2, %v926_v5, %v928_v3  ;;  %v12649_v8 = vsel %vm902_vm2, %v928_v3, %v930_v4 }
  0xaf   : > { %9763 = vmatmul.mubr.msk.f32.gmra.mrb[2].mxu0 %vm311_vm1, %v12588_v20  ;;  %15904 = vst [vmem:[#allocation37_spill] sm:$0xff] %v12629_v7  ;;  %15905 = vst [vmem:[#allocation38_spill] sm:$0xff] %v12637_v19 }
  0xb0   : > { %9765 = vmatprep.mubr.msk.f32.mxu0 %vm311_vm1, %v12591_v23  ;;  %15906 = vst [vmem:[#allocation39_spill] sm:$0xff] %v12641_v17  ;;  %15907 = vst [vmem:[#allocation40_spill] sm:$0xff] %v12649_v8 }
  0xb3   : > { %9766 = vmatmul.mubr.msk.f32.gmra.mrb[4].mxu0 %vm311_vm1, %v12601_v14 }
  0xb4   : > { %9768 = vmatprep.mubr.msk.f32.mxu0 %vm311_vm1, %v12605_v22 }
  0xb7   : > { %9769 = vmatmul.mubr.msk.f32.gmra.mrb[6].mxu0 %vm311_vm1, %v12613_v18 }
  0xb8   : > { %9771 = vmatprep.mubr.msk.f32.mxu0 %vm311_vm1, %v12617_v30  ;;  %v932_v30 = vrot.slane %v12418_v53, 7 }
  0xba   : > { %v12653_v6 = vsel %vm902_vm2, %v930_v4, %v932_v30 }
  0xbb   : > { %9772 = vmatmul.mubr.msk.f32.gmra.mrb[8].mxu0 %vm311_vm1, %v12625_v9  ;;  %15908 = vst [vmem:[#allocation41_spill] sm:$0xff] %v12653_v6  ;;  %v936_v9 = vrot.slane %v12426_v55, 7 }
  0xbc   : > { %9774 = vmatprep.mubr.msk.f32.mxu0 %vm311_vm1, %v12629_v7  ;;  %v934_v7 = vrot.slane %v12424_v54, 7 }
  0xbe   : > { %v12661_v5 = vsel %vm902_vm2, %v932_v30, %v934_v7  ;;  %v12665_v3 = vsel %vm902_vm2, %v934_v7, %v936_v9 }
  0xbf   : > { %9775 = vmatmul.mubr.msk.f32.gmra.mrb[10].mxu0 %vm311_vm1, %v12637_v19  ;;  %15909 = vst [vmem:[#allocation42_spill] sm:$0xff] %v12661_v5  ;;  %15910 = vst [vmem:[#allocation43_spill] sm:$0xff] %v12665_v3  ;;  %v940_v19 = vrot.slane %v12434_v57, 7 }
  0xc0   : > { %9777 = vmatprep.mubr.msk.f32.mxu0 %vm311_vm1, %v12641_v17  ;;  %v938_v17 = vrot.slane %v12432_v56, 7 }
  0xc2   : > { %v12673_v4 = vsel %vm902_vm2, %v936_v9, %v938_v17  ;;  %v12677_v30 = vsel %vm902_vm2, %v938_v17, %v940_v19 }
  0xc3   : > { %9778 = vmatmul.mubr.msk.f32.gmra.mrb[12].mxu0 %vm311_vm1, %v12649_v8  ;;  %15911 = vst [vmem:[#allocation44_spill] sm:$0xff] %v12673_v4  ;;  %15912 = vst [vmem:[#allocation45_spill] sm:$0xff] %v12677_v30  ;;  %v944_v8 = vrot.slane %v12442_v59, 7 }
  0xc4   : > { %9780 = vmatprep.mubr.msk.f32.mxu0 %vm311_vm1, %v12653_v6  ;;  %v942_v6 = vrot.slane %v12440_v58, 7 }
  0xc6   : > { %v12685_v7 = vsel %vm902_vm2, %v940_v19, %v942_v6  ;;  %v12689_v9 = vsel %vm902_vm2, %v942_v6, %v944_v8  ;;  %v952_v6 = vrot.slane %v12458_v63, 7 }
  0xc7   : > { %9781 = vmatmul.mubr.msk.f32.gmra.mrb[14].mxu0 %vm311_vm1, %v12661_v5  ;;  %15913 = vst [vmem:[#allocation46_spill] sm:$0xff] %v12685_v7  ;;  %15914 = vst [vmem:[#allocation47_spill] sm:$0xff] %v12689_v9  ;;  %v948_v5 = vrot.slane %v12450_v61, 7 }
  0xc8   : > { %9783 = vmatprep.mubr.msk.f32.mxu0 %vm311_vm1, %v12665_v3  ;;  %v946_v3 = vrot.slane %v12448_v60, 7 }
  0xca   : > { %v12697_v17 = vsel %vm902_vm2, %v944_v8, %v946_v3  ;;  %v12701_v19 = vsel %vm902_vm2, %v946_v3, %v948_v5  ;;  %v954_v8 = vrot.slane %v12464_v0, 7 }
  0xcb   : > { %9784 = vmatmul.mubr.msk.f32.gmra.mrb[16].mxu0 %vm311_vm1, %v12673_v4  ;;  %15915 = vst [vmem:[#allocation48_spill] sm:$0xff] %v12697_v17  ;;  %15916 = vst [vmem:[#allocation49_spill] sm:$0xff] %v12701_v19  ;;  %v956_v4 = vrot.slane %v12466_v1, 7 }
  0xcc   : > { %9786 = vmatprep.mubr.msk.f32.mxu0 %vm311_vm1, %v12677_v30  ;;  %v950_v30 = vrot.slane %v12456_v62, 7  ;;  %v12721_v3 = vsel %vm902_vm2, %v952_v6, %v954_v8 }
  0xcd   : > { %15919 = vst [vmem:[#allocation52_spill] sm:$0xff] %v12721_v3 }
  0xcf   : > { %9787 = vmatmul.mubr.msk.f32.gmra.mrb[18].mxu0 %vm311_vm1, %v12685_v7  ;;  %v12709_v7 = vsel %vm902_vm2, %v948_v5, %v950_v30  ;;  %v12725_v5 = vsel %vm902_vm2, %v954_v8, %v956_v4 }
  0xd0   : > { %9789 = vmatprep.mubr.msk.f32.mxu0 %vm311_vm1, %v12689_v9  ;;  %15917 = vst [vmem:[#allocation50_spill] sm:$0xff] %v12709_v7  ;;  %v12713_v9 = vsel %vm902_vm2, %v950_v30, %v952_v6  ;;  %15920 = vst [vmem:[#allocation53_spill] sm:$0xff] %v12725_v5  ;;  %v12731_v30 = vld [vmem:[%s12191_s11 + $0xf0] sm:$0xff]  ;;  %v962_v6 = vrot.slane %v12480_v15, 7 }
  0xd1   : > { %15918 = vst [vmem:[#allocation51_spill] sm:$0xff] %v12713_v9  ;;  %15921 = vst [vmem:[#allocation54_spill] sm:$0xff] %v12731_v30 }
  0xd2   : > { %403 = vst.msk [vmem:[#allocation2 + $0x198] sm:$0xff] %vm311_vm1, %v12731_v30  ;;  %v968_v30 = vrot.slane %v12493_v43, 7 }
  0xd3   : > { %9790 = vmatmul.mubr.msk.f32.gmra.mrb[20].mxu0 %vm311_vm1, %v12697_v17  ;;  %v960_v17 = vrot.slane %v12474_v13, 7 }
  0xd4   : > { %9792 = vmatprep.mubr.msk.f32.mxu0 %vm311_vm1, %v12701_v19  ;;  %v958_v19 = vrot.slane %v12472_v2, 7 }
  0xd6   : > { %v12742_v8 = vsel %vm902_vm2, %v958_v19, %v960_v17 }
  0xd7   : > { %9793 = vmatmul.mubr.msk.f32.gmra.mrb[22].mxu0 %vm311_vm1, %v12709_v7  ;;  %15923 = vst [vmem:[#allocation56_spill] sm:$0xff] %v12742_v8  ;;  %v964_v7 = vrot.slane %v12482_v12, 7 }
  0xd8   : > { %9795 = vmatprep.mubr.msk.f32.mxu0 %vm311_vm1, %v12713_v9  ;;  %v12736_v9 = vsel %vm902_vm2, %v956_v4, %v958_v19  ;;  %v966_v4 = vrot.slane %v12491_v46, 7 }
  0xd9   : > { %15922 = vst [vmem:[#allocation55_spill] sm:$0xff] %v12736_v9 }
  0xda   : > { %v12762_v19 = vsel %vm902_vm2, %v964_v7, %v966_v4 }
  0xdb   : > { %9796 = vmatmul.mubr.msk.f32.gmra.mrb[24].mxu0 %vm311_vm1, %v12721_v3  ;;  %v12754_v3 = vsel %vm902_vm2, %v962_v6, %v964_v7  ;;  %15926 = vst [vmem:[#allocation59_spill] sm:$0xff] %v12762_v19 }
  0xdc   : > { %9798 = vmatprep.mubr.msk.f32.mxu0 %vm311_vm1, %v12725_v5  ;;  %v12750_v5 = vsel %vm902_vm2, %v960_v17, %v962_v6  ;;  %15925 = vst [vmem:[#allocation58_spill] sm:$0xff] %v12754_v3  ;;  %v12766_v17 = vsel %vm902_vm2, %v966_v4, %v968_v30 }
  0xdd   : > { %15924 = vst [vmem:[#allocation57_spill] sm:$0xff] %v12750_v5  ;;  %15927 = vst [vmem:[#allocation60_spill] sm:$0xff] %v12766_v17 }
  0xdf   : > { %9799 = vmatmul.mubr.msk.f32.gmra.mrb[26].mxu0 %vm311_vm1, %v12736_v9  ;;  %v972_v9 = vrot.slane %v12509_v40, 7 }
  0xe0   : > { %9801 = vmatprep.mubr.msk.f32.mxu0 %vm311_vm1, %v12742_v8  ;;  %v970_v8 = vrot.slane %v12499_v45, 7 }
  0xe2   : > { %v12774_v6 = vsel %vm902_vm2, %v968_v30, %v970_v8  ;;  %v12778_v7 = vsel %vm902_vm2, %v970_v8, %v972_v9 }
  0xe3   : > { %9802 = vmatmul.mubr.msk.f32.gmra.mrb[28].mxu0 %vm311_vm1, %v12750_v5  ;;  %15928 = vst [vmem:[#allocation61_spill] sm:$0xff] %v12774_v6  ;;  %15929 = vst [vmem:[#allocation62_spill] sm:$0xff] %v12778_v7  ;;  %v976_v5 = vrot.slane %v12517_v39, 7 }
  0xe4   : > { %9804 = vmatprep.mubr.msk.f32.mxu0 %vm311_vm1, %v12754_v3  ;;  %v974_v3 = vrot.slane %v12515_v38, 7 }
  0xe6   : > { %v12786_v4 = vsel %vm902_vm2, %v972_v9, %v974_v3  ;;  %v12790_v30 = vsel %vm902_vm2, %v974_v3, %v976_v5 }
  0xe7   : > { %9805 = vmatmul.mubr.msk.f32.gmra.mrb[30].mxu0 %vm311_vm1, %v12762_v19  ;;  %15930 = vst [vmem:[#allocation63_spill] sm:$0xff] %v12786_v4  ;;  %15931 = vst [vmem:[#allocation64_spill] sm:$0xff] %v12790_v30  ;;  %v980_v19 = vrot.slane %v12525_v50, 7 }
  0xe8   : > { %9807 = vmatprep.mubr.msk.f32.mxu0 %vm311_vm1, %v12766_v17  ;;  %v978_v17 = vrot.slane %v12523_v49, 7 }
  0xea   : > { %v12798_v8 = vsel %vm902_vm2, %v976_v5, %v978_v17  ;;  %v12802_v9 = vsel %vm902_vm2, %v978_v17, %v980_v19 }
  0xeb   : > { %9808 = vmatmul.mubr.msk.f32.gmra.mrb[32].mxu0 %vm311_vm1, %v12774_v6  ;;  %15932 = vst [vmem:[#allocation65_spill] sm:$0xff] %v12798_v8  ;;  %15933 = vst [vmem:[#allocation66_spill] sm:$0xff] %v12802_v9  ;;  %v984_v6 = vrot.slane %v12533_v37, 7 }
  0xec   : > { %9810 = vmatprep.mubr.msk.f32.mxu0 %vm311_vm1, %v12778_v7  ;;  %v982_v7 = vrot.slane %v12531_v47, 7 }
  0xee   : > { %v12810_v3 = vsel %vm902_vm2, %v980_v19, %v982_v7  ;;  %v12814_v5 = vsel %vm902_vm2, %v982_v7, %v984_v6 }
  0xef   : > { %9811 = vmatmul.mubr.msk.f32.gmra.mrb[34].mxu0 %vm311_vm1, %v12786_v4  ;;  %15934 = vst [vmem:[#allocation67_spill] sm:$0xff] %v12810_v3  ;;  %15935 = vst [vmem:[#allocation68_spill] sm:$0xff] %v12814_v5  ;;  %v988_v4 = vrot.slane %v12541_v32, 7 }
  0xf0   : > { %9813 = vmatprep.mubr.msk.f32.mxu0 %vm311_vm1, %v12790_v30  ;;  %v986_v30 = vrot.slane %v12539_v35, 7 }
  0xf2   : > { %v12822_v17 = vsel %vm902_vm2, %v984_v6, %v986_v30  ;;  %v12826_v19 = vsel %vm902_vm2, %v986_v30, %v988_v4 }
  0xf3   : > { %9814 = vmatmul.mubr.msk.f32.gmra.mrb[36].mxu0 %vm311_vm1, %v12798_v8  ;;  %15936 = vst [vmem:[#allocation69_spill] sm:$0xff] %v12822_v17  ;;  %15937 = vst [vmem:[#allocation70_spill] sm:$0xff] %v12826_v19  ;;  %v992_v8 = vrot.slane %v12549_v31, 7 }
  0xf4   : > { %9816 = vmatprep.mubr.msk.f32.mxu0 %vm311_vm1, %v12802_v9  ;;  %v990_v9 = vrot.slane %v12547_v33, 7 }
  0xf6   : > { %v12834_v7 = vsel %vm902_vm2, %v988_v4, %v990_v9  ;;  %v12838_v6 = vsel %vm902_vm2, %v990_v9, %v992_v8 }
  0xf7   : > { %9817 = vmatmul.mubr.msk.f32.gmra.mrb[38].mxu0 %vm311_vm1, %v12810_v3  ;;  %15938 = vst [vmem:[#allocation71_spill] sm:$0xff] %v12834_v7  ;;  %15939 = vst [vmem:[#allocation72_spill] sm:$0xff] %v12838_v6  ;;  %v996_v3 = vrot.slane %v12557_v28, 7 }
  0xf8   : > { %9819 = vmatprep.mubr.msk.f32.mxu0 %vm311_vm1, %v12814_v5  ;;  %v994_v5 = vrot.slane %v12555_v24, 7 }
  0xfa   : > { %v12846_v30 = vsel %vm902_vm2, %v992_v8, %v994_v5  ;;  %v12850_v4 = vsel %vm902_vm2, %v994_v5, %v996_v3  ;;  %v1399_v8 = vrot.slane %v12289_v26, 1  ;;  %v1401_v5 = vrot.slane %v12299_v27, 1 }
  0xfb   : > { %9820 = vmatmul.mubr.msk.f32.gmra.mrb[40].mxu0 %vm311_vm1, %v12822_v17  ;;  %15940 = vst [vmem:[#allocation73_spill] sm:$0xff] %v12846_v30  ;;  %15941 = vst [vmem:[#allocation74_spill] sm:$0xff] %v12850_v4 }
  0xfc   : > { %9822 = vmatprep.mubr.msk.f32.mxu0 %vm311_vm1, %v12826_v19  ;;  %v15642_v19 = vrot.slane %v12563_v21, 7 }
  0xfe   : > { %v12859_v9 = vsel %vm902_vm2, %v996_v3, %v15642_v19  ;;  %v12874_v3 = vld [vmem:[%s15527_s1 + $0x10] sm:$0xf]  ;;  %v1405_v19 = vrot.slane %v12332_v34, 1 }
  0xff   : > { %9823 = vmatmul.mubr.msk.f32.gmra.mrb[42].mxu0 %vm311_vm1, %v12834_v7  ;;  %15942 = vst [vmem:[#allocation75_spill] sm:$0xff] %v12859_v9 }
 0x100   : > { %9825 = vmatprep.mubr.msk.f32.mxu0 %vm311_vm1, %v12838_v6  ;;  %v1397_v6 = vrot.slane %v12287_v25, 1 }
 0x103   : > { %9826 = vmatmul.mubr.msk.f32.gmra.mrb[44].mxu0 %vm311_vm1, %v12846_v30  ;;  %v15943_v30 = vrot.slane %v12221_v11, 1  ;;  %v1403_v11 = vrot.slane %v12304_v29, 1 }
 0x104   : > { %9828 = vmatprep.mubr.msk.f32.mxu0 %vm311_vm1, %v12850_v4 }
 0x105   : > { %v1398_v4 = vsel %vm1391_vm3, %v15943_v30, %v1397_v6  ;;  %v12886_v30 = vsel %vm1391_vm3, %v1399_v8, %v1401_v5 }
 0x106   : > { %15945 = vst [vmem:[#allocation77_spill] sm:$0xff] %v12886_v30 }
 0x107   : > { %9829 = vmatmul.mubr.msk.f32.gmra.mrb[46].mxu0 %vm311_vm1, %v12859_v9 }
 0x108   : > { %9833 = vmatprep.mubr.msk.f32.mxu0 %vm311_vm1, %v12502_v10  ;;  %v12882_v10 = vsel %vm1391_vm3, %v1397_v6, %v1399_v8  ;;  %v12900_v6 = vsel %vm1391_vm3, %v1403_v11, %v1405_v19 }
 0x109   : > { %15944 = vst [vmem:[#allocation76_spill] sm:$0xff] %v12882_v10  ;;  %15947 = vst [vmem:[#allocation79_spill] sm:$0xff] %v12900_v6 }
 0x10b   : > { %9834 = vmatmul.mubr.msk.f32.vlgmr.msra.gmra.mrb[0].mxu0 %vm311_vm1, %v12507_v41  ;;  %v1407_v41 = vrot.slane %v12337_v36, 1 }
 0x10c   : > { %9906 = vmatpush3.msk.msra.mxu0 %vm608_vm0, %v12576_v16  ;;  %9836 = vmatprep.mubr.msk.f32.mxu0 %vm311_vm1, %v1398_v4  ;;  %v12896_v16 = vsel %vm1391_vm3, %v1401_v5, %v1403_v11  ;;  %v1409_v4 = vrot.slane %v12366_v42, 1 }
 0x10d   : > { %9979 = vmatprep.subr.msk.mxu0 %vm608_vm0, %v12874_v3  ;;  %15946 = vst [vmem:[#allocation78_spill] sm:$0xff] %v12896_v16  ;;  %v12908_v8 = vsel %vm1391_vm3, %v1405_v19, %v1407_v41 }
 0x10e   : > { %15948 = vst [vmem:[#allocation80_spill] sm:$0xff] %v12908_v8  ;;  %v12912_v5 = vsel %vm1391_vm3, %v1407_v41, %v1409_v4 }
 0x10f   : > { %9837 = vmatmul.mubr.msk.f32.gmra.mrb[2].mxu0 %vm311_vm1, %v12882_v10  ;;  %15949 = vst [vmem:[#allocation81_spill] sm:$0xff] %v12912_v5  ;;  %v1413_v10 = vrot.slane %v12394_v48, 1 }
 0x110   : > { %9839 = vmatprep.mubr.msk.f32.mxu0 %vm311_vm1, %v12886_v30  ;;  %v1411_v30 = vrot.slane %v12375_v44, 1 }
 0x112   : > { %v12920_v11 = vsel %vm1391_vm3, %v1409_v4, %v1411_v30  ;;  %v12924_v19 = vsel %vm1391_vm3, %v1411_v30, %v1413_v10 }
 0x113   : > { %9840 = vmatmul.mubr.msk.f32.gmra.mrb[4].mxu0 %vm311_vm1, %v12896_v16  ;;  %15950 = vst [vmem:[#allocation82_spill] sm:$0xff] %v12920_v11  ;;  %15951 = vst [vmem:[#allocation83_spill] sm:$0xff] %v12924_v19  ;;  %v1417_v16 = vrot.slane %v12416_v52, 1 }
 0x114   : > { %9842 = vmatprep.mubr.msk.f32.mxu0 %vm311_vm1, %v12900_v6  ;;  %v1415_v6 = vrot.slane %v12406_v51, 1 }
 0x116   : > { %v12932_v41 = vsel %vm1391_vm3, %v1413_v10, %v1415_v6  ;;  %v12936_v4 = vsel %vm1391_vm3, %v1415_v6, %v1417_v16 }
 0x117   : > { %9843 = vmatmul.mubr.msk.f32.gmra.mrb[6].mxu0 %vm311_vm1, %v12908_v8  ;;  %15952 = vst [vmem:[#allocation84_spill] sm:$0xff] %v12932_v41  ;;  %15953 = vst [vmem:[#allocation85_spill] sm:$0xff] %v12936_v4  ;;  %v1421_v8 = vrot.slane %v12424_v54, 1 }
 0x118   : > { %9845 = vmatprep.mubr.msk.f32.mxu0 %vm311_vm1, %v12912_v5  ;;  %v1419_v5 = vrot.slane %v12418_v53, 1 }
 0x11a   : > { %v12944_v30 = vsel %vm1391_vm3, %v1417_v16, %v1419_v5  ;;  %v12948_v10 = vsel %vm1391_vm3, %v1419_v5, %v1421_v8 }
 0x11b   : > { %9846 = vmatmul.mubr.msk.f32.gmra.mrb[8].mxu0 %vm311_vm1, %v12920_v11  ;;  %15954 = vst [vmem:[#allocation86_spill] sm:$0xff] %v12944_v30  ;;  %15955 = vst [vmem:[#allocation87_spill] sm:$0xff] %v12948_v10  ;;  %v1425_v11 = vrot.slane %v12432_v56, 1 }
 0x11c   : > { %9848 = vmatprep.mubr.msk.f32.mxu0 %vm311_vm1, %v12924_v19  ;;  %v1423_v19 = vrot.slane %v12426_v55, 1 }
 0x11e   : > { %v12956_v6 = vsel %vm1391_vm3, %v1421_v8, %v1423_v19  ;;  %v12960_v16 = vsel %vm1391_vm3, %v1423_v19, %v1425_v11 }
 0x11f   : > { %9849 = vmatmul.mubr.msk.f32.gmra.mrb[10].mxu0 %vm311_vm1, %v12932_v41  ;;  %15956 = vst [vmem:[#allocation88_spill] sm:$0xff] %v12956_v6  ;;  %15957 = vst [vmem:[#allocation89_spill] sm:$0xff] %v12960_v16  ;;  %v1429_v41 = vrot.slane %v12440_v58, 1 }
 0x120   : > { %9851 = vmatprep.mubr.msk.f32.mxu0 %vm311_vm1, %v12936_v4  ;;  %v1427_v4 = vrot.slane %v12434_v57, 1 }
 0x122   : > { %v12968_v5 = vsel %vm1391_vm3, %v1425_v11, %v1427_v4  ;;  %v12972_v8 = vsel %vm1391_vm3, %v1427_v4, %v1429_v41 }
 0x123   : > { %9852 = vmatmul.mubr.msk.f32.gmra.mrb[12].mxu0 %vm311_vm1, %v12944_v30  ;;  %15958 = vst [vmem:[#allocation90_spill] sm:$0xff] %v12968_v5  ;;  %15959 = vst [vmem:[#allocation91_spill] sm:$0xff] %v12972_v8  ;;  %v1433_v30 = vrot.slane %v12448_v60, 1 }
 0x124   : > { %9854 = vmatprep.mubr.msk.f32.mxu0 %vm311_vm1, %v12948_v10  ;;  %v1431_v10 = vrot.slane %v12442_v59, 1 }
 0x126   : > { %v12980_v19 = vsel %vm1391_vm3, %v1429_v41, %v1431_v10  ;;  %v12984_v11 = vsel %vm1391_vm3, %v1431_v10, %v1433_v30  ;;  %v1439_v41 = vrot.slane %v12458_v63, 1  ;;  %v1441_v10 = vrot.slane %v12464_v0, 1 }
 0x127   : > { %9855 = vmatmul.mubr.msk.f32.gmra.mrb[14].mxu0 %vm311_vm1, %v12956_v6  ;;  %15960 = vst [vmem:[#allocation92_spill] sm:$0xff] %v12980_v19  ;;  %15961 = vst [vmem:[#allocation93_spill] sm:$0xff] %v12984_v11  ;;  %v1437_v6 = vrot.slane %v12456_v62, 1 }
 0x128   : > { %9857 = vmatprep.mubr.msk.f32.mxu0 %vm311_vm1, %v12960_v16  ;;  %v1435_v16 = vrot.slane %v12450_v61, 1 }
 0x12a   : > { %v12992_v4 = vsel %vm1391_vm3, %v1433_v30, %v1435_v16  ;;  %v1443_v30 = vrot.slane %v12466_v1, 1 }
 0x12b   : > { %9858 = vmatmul.mubr.msk.f32.gmra.mrb[16].mxu0 %vm311_vm1, %v12968_v5  ;;  %15962 = vst [vmem:[#allocation94_spill] sm:$0xff] %v12992_v4  ;;  %v1445_v5 = vrot.slane %v12472_v2, 1 }
 0x12c   : > { %9860 = vmatprep.mubr.msk.f32.mxu0 %vm311_vm1, %v12972_v8  ;;  %v12996_v8 = vsel %vm1391_vm3, %v1435_v16, %v1437_v6  ;;  %v13016_v16 = vsel %vm1391_vm3, %v1441_v10, %v1443_v30 }
 0x12d   : > { %15963 = vst [vmem:[#allocation95_spill] sm:$0xff] %v12996_v8  ;;  %15966 = vst [vmem:[#allocation98_spill] sm:$0xff] %v13016_v16 }
 0x12f   : > { %9861 = vmatmul.mubr.msk.f32.gmra.mrb[18].mxu0 %vm311_vm1, %v12980_v19  ;;  %v13004_v19 = vsel %vm1391_vm3, %v1437_v6, %v1439_v41  ;;  %v13020_v6 = vsel %vm1391_vm3, %v1443_v30, %v1445_v5 }
 0x130   : > { %9863 = vmatprep.mubr.msk.f32.mxu0 %vm311_vm1, %v12984_v11  ;;  %15964 = vst [vmem:[#allocation96_spill] sm:$0xff] %v13004_v19  ;;  %v13008_v11 = vsel %vm1391_vm3, %v1439_v41, %v1441_v10  ;;  %15967 = vst [vmem:[#allocation99_spill] sm:$0xff] %v13020_v6  ;;  %v13024_v41 = vld [vmem:[%s12191_s11 + $0xf8] sm:$0xff] }
 0x131   : > { %15965 = vst [vmem:[#allocation97_spill] sm:$0xff] %v13008_v11  ;;  %15968 = vst [vmem:[#allocation100_spill] sm:$0xff] %v13024_v41 }
 0x132   : > { %404 = vst.msk [vmem:[#allocation2 + $0x1a0] sm:$0xff] %vm311_vm1, %v13024_v41 }
 0x133   : > { %9864 = vmatmul.mubr.msk.f32.gmra.mrb[20].mxu0 %vm311_vm1, %v12992_v4  ;;  %v1449_v4 = vrot.slane %v12480_v15, 1 }
 0x134   : > { %9866 = vmatprep.mubr.msk.f32.mxu0 %vm311_vm1, %v12996_v8  ;;  %v1447_v8 = vrot.slane %v12474_v13, 1 }
 0x136   : > { %v13033_v10 = vsel %vm1391_vm3, %v1445_v5, %v1447_v8  ;;  %v13037_v30 = vsel %vm1391_vm3, %v1447_v8, %v1449_v4 }
 0x137   : > { %9867 = vmatmul.mubr.msk.f32.gmra.mrb[22].mxu0 %vm311_vm1, %v13004_v19  ;;  %15969 = vst [vmem:[#allocation101_spill] sm:$0xff] %v13033_v10  ;;  %15970 = vst [vmem:[#allocation102_spill] sm:$0xff] %v13037_v30  ;;  %v1453_v19 = vrot.slane %v12491_v46, 1 }
 0x138   : > { %9869 = vmatprep.mubr.msk.f32.mxu0 %vm311_vm1, %v13008_v11  ;;  %v1451_v11 = vrot.slane %v12482_v12, 1 }
 0x13a   : > { %v13045_v41 = vsel %vm1391_vm3, %v1449_v4, %v1451_v11  ;;  %v13049_v5 = vsel %vm1391_vm3, %v1451_v11, %v1453_v19 }
 0x13b   : > { %9870 = vmatmul.mubr.msk.f32.gmra.mrb[24].mxu0 %vm311_vm1, %v13016_v16  ;;  %15971 = vst [vmem:[#allocation103_spill] sm:$0xff] %v13045_v41  ;;  %15972 = vst [vmem:[#allocation104_spill] sm:$0xff] %v13049_v5  ;;  %v1457_v16 = vrot.slane %v12499_v45, 1 }
 0x13c   : > { %9872 = vmatprep.mubr.msk.f32.mxu0 %vm311_vm1, %v13020_v6  ;;  %v1455_v6 = vrot.slane %v12493_v43, 1 }
 0x13e   : > { %v13057_v8 = vsel %vm1391_vm3, %v1453_v19, %v1455_v6  ;;  %v13061_v4 = vsel %vm1391_vm3, %v1455_v6, %v1457_v16 }
 0x13f   : > { %9873 = vmatmul.mubr.msk.f32.gmra.mrb[26].mxu0 %vm311_vm1, %v13033_v10  ;;  %15973 = vst [vmem:[#allocation105_spill] sm:$0xff] %v13057_v8  ;;  %15974 = vst [vmem:[#allocation106_spill] sm:$0xff] %v13061_v4  ;;  %v1461_v10 = vrot.slane %v12515_v38, 1 }
 0x140   : > { %9875 = vmatprep.mubr.msk.f32.mxu0 %vm311_vm1, %v13037_v30  ;;  %v1459_v30 = vrot.slane %v12509_v40, 1 }
 0x142   : > { %v13069_v11 = vsel %vm1391_vm3, %v1457_v16, %v1459_v30  ;;  %v13073_v19 = vsel %vm1391_vm3, %v1459_v30, %v1461_v10 }
 0x143   : > { %9876 = vmatmul.mubr.msk.f32.gmra.mrb[28].mxu0 %vm311_vm1, %v13045_v41  ;;  %15975 = vst [vmem:[#allocation107_spill] sm:$0xff] %v13069_v11  ;;  %15976 = vst [vmem:[#allocation108_spill] sm:$0xff] %v13073_v19  ;;  %v1465_v41 = vrot.slane %v12523_v49, 1 }
 0x144   : > { %9878 = vmatprep.mubr.msk.f32.mxu0 %vm311_vm1, %v13049_v5  ;;  %v1463_v5 = vrot.slane %v12517_v39, 1 }
 0x146   : > { %v13081_v6 = vsel %vm1391_vm3, %v1461_v10, %v1463_v5  ;;  %v13085_v16 = vsel %vm1391_vm3, %v1463_v5, %v1465_v41 }
 0x147   : > { %9879 = vmatmul.mubr.msk.f32.gmra.mrb[30].mxu0 %vm311_vm1, %v13057_v8  ;;  %15977 = vst [vmem:[#allocation109_spill] sm:$0xff] %v13081_v6  ;;  %15978 = vst [vmem:[#allocation110_spill] sm:$0xff] %v13085_v16  ;;  %v1469_v8 = vrot.slane %v12531_v47, 1 }
 0x148   : > { %9881 = vmatprep.mubr.msk.f32.mxu0 %vm311_vm1, %v13061_v4  ;;  %v1467_v4 = vrot.slane %v12525_v50, 1 }
 0x14a   : > { %v13093_v30 = vsel %vm1391_vm3, %v1465_v41, %v1467_v4  ;;  %v13097_v10 = vsel %vm1391_vm3, %v1467_v4, %v1469_v8 }
 0x14b   : > { %9882 = vmatmul.mubr.msk.f32.gmra.mrb[32].mxu0 %vm311_vm1, %v13069_v11  ;;  %15979 = vst [vmem:[#allocation111_spill] sm:$0xff] %v13093_v30  ;;  %15980 = vst [vmem:[#allocation112_spill] sm:$0xff] %v13097_v10  ;;  %v1473_v11 = vrot.slane %v12539_v35, 1 }
 0x14c   : > { %9884 = vmatprep.mubr.msk.f32.mxu0 %vm311_vm1, %v13073_v19  ;;  %v1471_v19 = vrot.slane %v12533_v37, 1 }
 0x14e   : > { %v13105_v5 = vsel %vm1391_vm3, %v1469_v8, %v1471_v19  ;;  %v13109_v41 = vsel %vm1391_vm3, %v1471_v19, %v1473_v11 }
 0x14f   : > { %9885 = vmatmul.mubr.msk.f32.gmra.mrb[34].mxu0 %vm311_vm1, %v13081_v6  ;;  %15981 = vst [vmem:[#allocation113_spill] sm:$0xff] %v13105_v5  ;;  %15982 = vst [vmem:[#allocation114_spill] sm:$0xff] %v13109_v41  ;;  %v1477_v6 = vrot.slane %v12547_v33, 1 }
 0x150   : > { %9887 = vmatprep.mubr.msk.f32.mxu0 %vm311_vm1, %v13085_v16  ;;  %v1475_v16 = vrot.slane %v12541_v32, 1 }
 0x152   : > { %v13117_v4 = vsel %vm1391_vm3, %v1473_v11, %v1475_v16  ;;  %v13121_v8 = vsel %vm1391_vm3, %v1475_v16, %v1477_v6  ;;  %v13136_v16 = vld [vmem:[#allocation2 + $0x198] sm:$0xff] }
 0x153   : > { %9888 = vmatmul.mubr.msk.f32.gmra.mrb[36].mxu0 %vm311_vm1, %v13093_v30  ;;  %15983 = vst [vmem:[#allocation115_spill] sm:$0xff] %v13117_v4  ;;  %15984 = vst [vmem:[#allocation116_spill] sm:$0xff] %v13121_v8  ;;  %v1481_v30 = vrot.slane %v12555_v24, 1 }
 0x154   : > { %9890 = vmatprep.mubr.msk.f32.mxu0 %vm311_vm1, %v13097_v10  ;;  %v1479_v10 = vrot.slane %v12549_v31, 1 }
 0x156   : > { %v13129_v19 = vsel %vm1391_vm3, %v1477_v6, %v1479_v10  ;;  %v13133_v11 = vsel %vm1391_vm3, %v1479_v10, %v1481_v30  ;;  %v15721_v6 = vrot.slane %v13136_v16, 1 }
 0x157   : > { %9891 = vmatmul.mubr.msk.f32.gmra.mrb[38].mxu0 %vm311_vm1, %v13105_v5  ;;  %v1485_v5 = vrot.slane %v12563_v21, 1 }
 0x158   : > { %9893 = vmatprep.mubr.msk.f32.mxu0 %vm311_vm1, %v13109_v41  ;;  %v1483_v41 = vrot.slane %v12557_v28, 1 }
 0x159   : > { %v13156_v10 = vsel %vm1391_vm3, %v1485_v5, %v15721_v6  ;;  %v15991_v6 = vld [vmem:[#allocation41_spill] sm:$0xff] }
 0x15b   : > { %9894 = vmatmul.mubr.msk.f32.gmra.mrb[40].mxu0 %vm311_vm1, %v13117_v4  ;;  %v13147_v4 = vsel %vm1391_vm3, %v1483_v41, %v1485_v5  ;;  %v15986_v5 = vld [vmem:[#allocation36_spill] sm:$0xff] }
 0x15c   : > { %9896 = vmatprep.mubr.msk.f32.mxu0 %vm311_vm1, %v13121_v8  ;;  %v13143_v8 = vsel %vm1391_vm3, %v1481_v30, %v1483_v41  ;;  %v8144_v30 = vld [vmem:[%s15527_s1 + $0x14] sm:$0xf]  ;;  %v15990_v41 = vld [vmem:[#allocation40_spill] sm:$0xff] }
 0x15f   : > { %9897 = vmatmul.mubr.msk.f32.gmra.mrb[42].mxu0 %vm311_vm1, %v13129_v19 }
 0x160   : > { %9899 = vmatprep.mubr.msk.f32.mxu0 %vm311_vm1, %v13133_v11 }
 0x163   : > { %9900 = vmatmul.mubr.msk.f32.gmra.mrb[44].mxu0 %vm311_vm1, %v13143_v8 }
 0x164   : > { %9902 = vmatprep.mubr.msk.f32.mxu0 %vm311_vm1, %v13147_v4 }
 0x167   : > { %9903 = vmatmul.mubr.msk.f32.gmra.mrb[46].mxu0 %vm311_vm1, %v13156_v10 }
 0x168   : > { %9907 = vmatprep.mubr.msk.f32.mxu0 %vm311_vm1, %v12588_v20  ;;  %v15985_v20 = vld [vmem:[#allocation35_spill] sm:$0xff] }
 0x16b   : > { %9908 = vmatmul.mubr.msk.f32.vlgmr.msra.gmra.mrb[0].mxu0 %vm311_vm1, %v12591_v23  ;;  %v15987_v23 = vld [vmem:[#allocation37_spill] sm:$0xff] }
 0x16c   : > { %9980 = vmatpush3.msk.msra.mxu0 %vm608_vm0, %v12874_v3  ;;  %9910 = vmatprep.mubr.msk.f32.mxu0 %vm311_vm1, %v12601_v14  ;;  %v15988_v3 = vld [vmem:[#allocation38_spill] sm:$0xff]  ;;  %v15989_v14 = vld [vmem:[#allocation39_spill] sm:$0xff] }
 0x16d   : > { %10053 = vmatprep.subr.msk.mxu0 %vm608_vm0, %v8144_v30 }
 0x16f   : > { %9911 = vmatmul.mubr.msk.f32.gmra.mrb[2].mxu0 %vm311_vm1, %v12605_v22 }
 0x170   : > { %9913 = vmatprep.mubr.msk.f32.mxu0 %vm311_vm1, %v12613_v18  ;;  %v15992_v18 = vld [vmem:[#allocation42_spill] sm:$0xff] }
 0x173   : > { %9914 = vmatmul.mubr.msk.f32.gmra.mrb[4].mxu0 %vm311_vm1, %v15985_v20  ;;  %v15993_v20 = vld [vmem:[#allocation43_spill] sm:$0xff] }
 0x174   : > { %9916 = vmatprep.mubr.msk.f32.mxu0 %vm311_vm1, %v15986_v5  ;;  %v15994_v5 = vld [vmem:[#allocation44_spill] sm:$0xff] }
 0x177   : > { %9917 = vmatmul.mubr.msk.f32.gmra.mrb[6].mxu0 %vm311_vm1, %v15987_v23  ;;  %v15995_v23 = vld [vmem:[#allocation45_spill] sm:$0xff] }
 0x178   : > { %9919 = vmatprep.mubr.msk.f32.mxu0 %vm311_vm1, %v15988_v3  ;;  %v15996_v3 = vld [vmem:[#allocation46_spill] sm:$0xff] }
 0x17b   : > { %9920 = vmatmul.mubr.msk.f32.gmra.mrb[8].mxu0 %vm311_vm1, %v15989_v14  ;;  %v15997_v14 = vld [vmem:[#allocation47_spill] sm:$0xff] }
 0x17c   : > { %9922 = vmatprep.mubr.msk.f32.mxu0 %vm311_vm1, %v15990_v41  ;;  %v15998_v41 = vld [vmem:[#allocation48_spill] sm:$0xff] }
 0x17f   : > { %9923 = vmatmul.mubr.msk.f32.gmra.mrb[10].mxu0 %vm311_vm1, %v15991_v6  ;;  %v15999_v6 = vld [vmem:[#allocation49_spill] sm:$0xff] }
 0x180   : > { %9925 = vmatprep.mubr.msk.f32.mxu0 %vm311_vm1, %v15992_v18  ;;  %v16000_v18 = vld [vmem:[#allocation50_spill] sm:$0xff] }
 0x183   : > { %9926 = vmatmul.mubr.msk.f32.gmra.mrb[12].mxu0 %vm311_vm1, %v15993_v20  ;;  %v16001_v20 = vld [vmem:[#allocation51_spill] sm:$0xff] }
 0x184   : > { %9928 = vmatprep.mubr.msk.f32.mxu0 %vm311_vm1, %v15994_v5  ;;  %v16002_v5 = vld [vmem:[#allocation52_spill] sm:$0xff] }
 0x187   : > { %9929 = vmatmul.mubr.msk.f32.gmra.mrb[14].mxu0 %vm311_vm1, %v15995_v23  ;;  %v16003_v23 = vld [vmem:[#allocation53_spill] sm:$0xff] }
 0x188   : > { %9931 = vmatprep.mubr.msk.f32.mxu0 %vm311_vm1, %v15996_v3  ;;  %v16004_v3 = vld [vmem:[#allocation55_spill] sm:$0xff] }
 0x18b   : > { %9932 = vmatmul.mubr.msk.f32.gmra.mrb[16].mxu0 %vm311_vm1, %v15997_v14  ;;  %v16005_v14 = vld [vmem:[#allocation56_spill] sm:$0xff] }
 0x18c   : > { %9934 = vmatprep.mubr.msk.f32.mxu0 %vm311_vm1, %v15998_v41  ;;  %v16006_v41 = vld [vmem:[#allocation57_spill] sm:$0xff] }
 0x18f   : > { %9935 = vmatmul.mubr.msk.f32.gmra.mrb[18].mxu0 %vm311_vm1, %v15999_v6  ;;  %v16007_v6 = vld [vmem:[#allocation58_spill] sm:$0xff] }
 0x190   : > { %9937 = vmatprep.mubr.msk.f32.mxu0 %vm311_vm1, %v16000_v18  ;;  %v16008_v18 = vld [vmem:[#allocation59_spill] sm:$0xff] }
 0x193   : > { %9938 = vmatmul.mubr.msk.f32.gmra.mrb[20].mxu0 %vm311_vm1, %v16001_v20  ;;  %v16009_v20 = vld [vmem:[#allocation60_spill] sm:$0xff] }
 0x194   : > { %9940 = vmatprep.mubr.msk.f32.mxu0 %vm311_vm1, %v16002_v5  ;;  %v16010_v5 = vld [vmem:[#allocation61_spill] sm:$0xff] }
 0x197   : > { %9941 = vmatmul.mubr.msk.f32.gmra.mrb[22].mxu0 %vm311_vm1, %v16003_v23  ;;  %v16011_v23 = vld [vmem:[#allocation62_spill] sm:$0xff] }
 0x198   : > { %9943 = vmatprep.mubr.msk.f32.mxu0 %vm311_vm1, %v16004_v3  ;;  %v16012_v3 = vld [vmem:[#allocation63_spill] sm:$0xff] }
 0x19b   : > { %9944 = vmatmul.mubr.msk.f32.gmra.mrb[24].mxu0 %vm311_vm1, %v16005_v14  ;;  %v16013_v14 = vld [vmem:[#allocation64_spill] sm:$0xff] }
 0x19c   : > { %9946 = vmatprep.mubr.msk.f32.mxu0 %vm311_vm1, %v16006_v41  ;;  %v16014_v41 = vld [vmem:[#allocation65_spill] sm:$0xff] }
 0x19f   : > { %9947 = vmatmul.mubr.msk.f32.gmra.mrb[26].mxu0 %vm311_vm1, %v16007_v6  ;;  %v16015_v6 = vld [vmem:[#allocation66_spill] sm:$0xff] }
 0x1a0   : > { %9949 = vmatprep.mubr.msk.f32.mxu0 %vm311_vm1, %v16008_v18  ;;  %v16016_v18 = vld [vmem:[#allocation67_spill] sm:$0xff] }
 0x1a3   : > { %9950 = vmatmul.mubr.msk.f32.gmra.mrb[28].mxu0 %vm311_vm1, %v16009_v20  ;;  %v16017_v20 = vld [vmem:[#allocation68_spill] sm:$0xff] }
 0x1a4   : > { %9952 = vmatprep.mubr.msk.f32.mxu0 %vm311_vm1, %v16010_v5 }
 0x1a7   : > { %9953 = vmatmul.mubr.msk.f32.gmra.mrb[30].mxu0 %vm311_vm1, %v16011_v23  ;;  %v16018_v23 = vld [vmem:[#allocation70_spill] sm:$0xff] }
 0x1a8   : > { %9955 = vmatprep.mubr.msk.f32.mxu0 %vm311_vm1, %v16012_v3  ;;  %v13256_v3 = vld [vmem:[#allocation2 + $0x1a8] sm:$0xff] }
 0x1ab   : > { %9956 = vmatmul.mubr.msk.f32.gmra.mrb[32].mxu0 %vm311_vm1, %v16013_v14  ;;  %v13248_v14 = vld [vmem:[#allocation2 + $0x1a0] sm:$0xff] }
 0x1ac   : > { %9958 = vmatprep.mubr.msk.f32.mxu0 %vm311_vm1, %v16014_v41  ;;  %v16019_v41 = vld [vmem:[#allocation72_spill] sm:$0xff] }
 0x1af   : > { %9959 = vmatmul.mubr.msk.f32.gmra.mrb[34].mxu0 %vm311_vm1, %v16015_v6  ;;  %v16020_v6 = vld [vmem:[#allocation73_spill] sm:$0xff] }
 0x1b0   : > { %9961 = vmatprep.mubr.msk.f32.mxu0 %vm311_vm1, %v16016_v18  ;;  %v1913_v18 = vrot.slane %v13136_v16, 7 }
 0x1b3   : > { %9962 = vmatmul.mubr.msk.f32.gmra.mrb[36].mxu0 %vm311_vm1, %v16017_v20  ;;  %v1915_v20 = vrot.slane %v13248_v14, 7 }
 0x1b4   : > { %9964 = vmatprep.mubr.msk.f32.mxu0 %vm311_vm1, %v12822_v17  ;;  %v16021_v17 = vld [vmem:[#allocation74_spill] sm:$0xff] }
 0x1b7   : > { %9965 = vmatmul.mubr.msk.f32.gmra.mrb[38].mxu0 %vm311_vm1, %v16018_v23 }
 0x1b8   : > { %9967 = vmatprep.mubr.msk.f32.mxu0 %vm311_vm1, %v12834_v7  ;;  %v16022_v7 = vrot.slane %v12563_v21, 7 }
 0x1ba   : > { %v13265_v23 = vsel %vm902_vm2, %v16022_v7, %v1913_v18 }
 0x1bb   : > { %9968 = vmatmul.mubr.msk.f32.gmra.mrb[40].mxu0 %vm311_vm1, %v16019_v41  ;;  %v1917_v41 = vrot.slane %v13256_v3, 7 }
 0x1bc   : > { %9970 = vmatprep.mubr.msk.f32.mxu0 %vm311_vm1, %v16020_v6  ;;  %v13269_v6 = vsel %vm902_vm2, %v1913_v18, %v1915_v20  ;;  %v8194_v18 = vld [vmem:[%s15527_s1 + $0x18] sm:$0xf] }
 0x1bf   : > { %9971 = vmatmul.mubr.msk.f32.gmra.mrb[42].mxu0 %vm311_vm1, %v16021_v17 }
 0x1c0   : > { %9973 = vmatprep.mubr.msk.f32.mxu0 %vm311_vm1, %v12859_v9  ;;  %v13278_v9 = vsel %vm902_vm2, %v1915_v20, %v1917_v41 }
 0x1c3   : > { %9974 = vmatmul.mubr.msk.f32.gmra.mrb[44].mxu0 %vm311_vm1, %v13265_v23 }
 0x1c4   : > { %9976 = vmatprep.mubr.msk.f32.mxu0 %vm311_vm1, %v13269_v6 }
 0x1c7   : > { %9977 = vmatmul.mubr.msk.f32.gmra.mrb[46].mxu0 %vm311_vm1, %v13278_v9 }
 0x1c8   : > { %9981 = vmatprep.mubr.msk.f32.mxu0 %vm311_vm1, %v12287_v25  ;;  %v16026_v25 = vld [vmem:[#allocation79_spill] sm:$0xff] }
 0x1cb   : > { %9982 = vmatmul.mubr.msk.f32.vlgmr.msra.gmra.mrb[0].mxu0 %vm311_vm1, %v12289_v26  ;;  %v16027_v26 = vld [vmem:[#allocation80_spill] sm:$0xff] }
 0x1cc   : > { %10054 = vmatpush3.msk.msra.mxu0 %vm608_vm0, %v8144_v30  ;;  %9984 = vmatprep.mubr.msk.f32.mxu0 %vm311_vm1, %v12299_v27  ;;  %v16028_v27 = vld [vmem:[#allocation81_spill] sm:$0xff] }
 0x1cd   : > { %10127 = vmatprep.subr.msk.mxu0 %vm608_vm0, %v8194_v18 }
 0x1cf   : > { %9985 = vmatmul.mubr.msk.f32.gmra.mrb[2].mxu0 %vm311_vm1, %v12304_v29  ;;  %v16030_v29 = vld [vmem:[#allocation83_spill] sm:$0xff] }
 0x1d0   : > { %9987 = vmatprep.mubr.msk.f32.mxu0 %vm311_vm1, %v12332_v34  ;;  %v16034_v34 = vld [vmem:[#allocation87_spill] sm:$0xff] }
 0x1d3   : > { %9988 = vmatmul.mubr.msk.f32.gmra.mrb[4].mxu0 %vm311_vm1, %v12337_v36  ;;  %v16036_v36 = vld [vmem:[#allocation89_spill] sm:$0xff] }
 0x1d4   : > { %9990 = vmatprep.mubr.msk.f32.mxu0 %vm311_vm1, %v12366_v42  ;;  %v16041_v42 = vld [vmem:[#allocation94_spill] sm:$0xff] }
 0x1d7   : > { %9991 = vmatmul.mubr.msk.f32.gmra.mrb[6].mxu0 %vm311_vm1, %v12375_v44  ;;  %v16043_v44 = vld [vmem:[#allocation96_spill] sm:$0xff] }
 0x1d8   : > { %9993 = vmatprep.mubr.msk.f32.mxu0 %vm311_vm1, %v12394_v48  ;;  %v16047_v48 = vld [vmem:[#allocation101_spill] sm:$0xff] }
 0x1db   : > { %9994 = vmatmul.mubr.msk.f32.gmra.mrb[8].mxu0 %vm311_vm1, %v12406_v51  ;;  %v16048_v51 = vld [vmem:[#allocation102_spill] sm:$0xff] }
 0x1dc   : > { %9996 = vmatprep.mubr.msk.f32.mxu0 %vm311_vm1, %v12416_v52  ;;  %v16049_v52 = vld [vmem:[#allocation103_spill] sm:$0xff] }
 0x1df   : > { %9997 = vmatmul.mubr.msk.f32.gmra.mrb[10].mxu0 %vm311_vm1, %v12418_v53  ;;  %v16050_v53 = vld [vmem:[#allocation104_spill] sm:$0xff] }
 0x1e0   : > { %9999 = vmatprep.mubr.msk.f32.mxu0 %vm311_vm1, %v12424_v54  ;;  %v16051_v54 = vld [vmem:[#allocation105_spill] sm:$0xff] }
 0x1e3   : > { %10000 = vmatmul.mubr.msk.f32.gmra.mrb[12].mxu0 %vm311_vm1, %v12426_v55  ;;  %v16052_v55 = vld [vmem:[#allocation106_spill] sm:$0xff] }
 0x1e4   : > { %10002 = vmatprep.mubr.msk.f32.mxu0 %vm311_vm1, %v12432_v56  ;;  %v16053_v56 = vld [vmem:[#allocation107_spill] sm:$0xff] }
 0x1e7   : > { %10003 = vmatmul.mubr.msk.f32.gmra.mrb[14].mxu0 %vm311_vm1, %v12434_v57  ;;  %v16054_v57 = vld [vmem:[#allocation108_spill] sm:$0xff] }
 0x1e8   : > { %10005 = vmatprep.mubr.msk.f32.mxu0 %vm311_vm1, %v12440_v58  ;;  %v16055_v58 = vld [vmem:[#allocation109_spill] sm:$0xff] }
 0x1eb   : > { %10006 = vmatmul.mubr.msk.f32.gmra.mrb[16].mxu0 %vm311_vm1, %v12442_v59  ;;  %v16056_v59 = vld [vmem:[#allocation110_spill] sm:$0xff] }
 0x1ec   : > { %10008 = vmatprep.mubr.msk.f32.mxu0 %vm311_vm1, %v12448_v60  ;;  %v16057_v60 = vld [vmem:[#allocation111_spill] sm:$0xff] }
 0x1ef   : > { %10009 = vmatmul.mubr.msk.f32.gmra.mrb[18].mxu0 %vm311_vm1, %v12450_v61  ;;  %v16058_v61 = vld [vmem:[#allocation112_spill] sm:$0xff] }
 0x1f0   : > { %10011 = vmatprep.mubr.msk.f32.mxu0 %vm311_vm1, %v12456_v62  ;;  %v16059_v62 = vld [vmem:[#allocation113_spill] sm:$0xff] }
 0x1f3   : > { %10012 = vmatmul.mubr.msk.f32.gmra.mrb[20].mxu0 %vm311_vm1, %v12458_v63  ;;  %v16060_v63 = vld [vmem:[#allocation114_spill] sm:$0xff] }
 0x1f4   : > { %10014 = vmatprep.mubr.msk.f32.mxu0 %vm311_vm1, %v12464_v0  ;;  %v16061_v0 = vld [vmem:[#allocation115_spill] sm:$0xff] }
 0x1f7   : > { %10015 = vmatmul.mubr.msk.f32.gmra.mrb[22].mxu0 %vm311_vm1, %v12466_v1  ;;  %v16062_v1 = vld [vmem:[#allocation116_spill] sm:$0xff] }
 0x1f8   : > { %10017 = vmatprep.mubr.msk.f32.mxu0 %vm311_vm1, %v12472_v2  ;;  %v2584_v2 = vrot.slane %v13248_v14, 1 }
 0x1fb   : > { %10018 = vmatmul.mubr.msk.f32.gmra.mrb[24].mxu0 %vm311_vm1, %v12474_v13  ;;  %v2586_v13 = vrot.slane %v13256_v3, 1 }
 0x1fc   : > { %10020 = vmatprep.mubr.msk.f32.mxu0 %vm311_vm1, %v12480_v15  ;;  %v8244_v15 = vld [vmem:[%s15527_s1 + $0x1c] sm:$0xf] }
 0x1fd   : > { %v13489_v20 = vsel %vm1391_vm3, %v2584_v2, %v2586_v13 }
 0x1ff   : > { %10021 = vmatmul.mubr.msk.f32.gmra.mrb[26].mxu0 %vm311_vm1, %v12482_v12  ;;  %v16023_v12 = vld [vmem:[#allocation76_spill] sm:$0xff] }
 0x200   : > { %10023 = vmatprep.mubr.msk.f32.mxu0 %vm311_vm1, %v12491_v46  ;;  %v16045_v46 = vld [vmem:[#allocation98_spill] sm:$0xff] }
 0x203   : > { %10024 = vmatmul.mubr.msk.f32.gmra.mrb[28].mxu0 %vm311_vm1, %v12493_v43  ;;  %v16042_v43 = vld [vmem:[#allocation95_spill] sm:$0xff] }
 0x204   : > { %10026 = vmatprep.mubr.msk.f32.mxu0 %vm311_vm1, %v12499_v45  ;;  %v16044_v45 = vld [vmem:[#allocation97_spill] sm:$0xff] }
 0x207   : > { %10027 = vmatmul.mubr.msk.f32.gmra.mrb[30].mxu0 %vm311_vm1, %v12509_v40  ;;  %v16040_v40 = vld [vmem:[#allocation93_spill] sm:$0xff] }
 0x208   : > { %10029 = vmatprep.mubr.msk.f32.mxu0 %vm311_vm1, %v12515_v38  ;;  %v16038_v38 = vld [vmem:[#allocation91_spill] sm:$0xff] }
 0x20b   : > { %10030 = vmatmul.mubr.msk.f32.gmra.mrb[32].mxu0 %vm311_vm1, %v12517_v39  ;;  %v16039_v39 = vld [vmem:[#allocation92_spill] sm:$0xff] }
 0x20c   : > { %10032 = vmatprep.mubr.msk.f32.mxu0 %vm311_vm1, %v12523_v49  ;;  %v13476_v49 = vld [vmem:[#allocation2 + $0x1b0] sm:$0xff] }
 0x20d   : > { %v15726_v30 = vrot.slane %v13476_v49, 1 }
 0x20f   : > { %10033 = vmatmul.mubr.msk.f32.gmra.mrb[34].mxu0 %vm311_vm1, %v12525_v50  ;;  %v16063_v50 = vrot.slane %v13136_v16, 1 }
 0x210   : > { %10035 = vmatprep.mubr.msk.f32.mxu0 %vm311_vm1, %v12531_v47  ;;  %v16046_v47 = vld [vmem:[#allocation99_spill] sm:$0xff] }
 0x211   : > { %v13485_v7 = vsel %vm1391_vm3, %v16063_v50, %v2584_v2  ;;  %v16066_v2 = vld [vmem:[#allocation36_spill] sm:$0xff]  ;;  %v16069_v50 = vld [vmem:[#allocation39_spill] sm:$0xff] }
 0x213   : > { %10036 = vmatmul.mubr.msk.f32.gmra.mrb[36].mxu0 %vm311_vm1, %v12533_v37  ;;  %v16037_v37 = vld [vmem:[#allocation90_spill] sm:$0xff] }
 0x214   : > { %10038 = vmatprep.mubr.msk.f32.mxu0 %vm311_vm1, %v12539_v35  ;;  %v16035_v35 = vld [vmem:[#allocation88_spill] sm:$0xff] }
 0x217   : > { %10039 = vmatmul.mubr.msk.f32.gmra.mrb[38].mxu0 %vm311_vm1, %v12541_v32  ;;  %v16032_v32 = vld [vmem:[#allocation85_spill] sm:$0xff] }
 0x218   : > { %10041 = vmatprep.mubr.msk.f32.mxu0 %vm311_vm1, %v12547_v33  ;;  %v16033_v33 = vld [vmem:[#allocation86_spill] sm:$0xff] }
 0x21b   : > { %10042 = vmatmul.mubr.msk.f32.gmra.mrb[40].mxu0 %vm311_vm1, %v12549_v31  ;;  %v16031_v31 = vld [vmem:[#allocation84_spill] sm:$0xff] }
 0x21c   : > { %10044 = vmatprep.mubr.msk.f32.mxu0 %vm311_vm1, %v12555_v24  ;;  %v16024_v24 = vld [vmem:[#allocation77_spill] sm:$0xff] }
 0x21f   : > { %10045 = vmatmul.mubr.msk.f32.gmra.mrb[42].mxu0 %vm311_vm1, %v12557_v28  ;;  %v16029_v28 = vld [vmem:[#allocation82_spill] sm:$0xff] }
 0x220   : > { %10047 = vmatprep.mubr.msk.f32.mxu0 %vm311_vm1, %v12563_v21  ;;  %v16025_v21 = vld [vmem:[#allocation78_spill] sm:$0xff] }
 0x223   : > { %10048 = vmatmul.mubr.msk.f32.gmra.mrb[44].mxu0 %vm311_vm1, %v13136_v16 }
 0x224   : > { %10050 = vmatprep.mubr.msk.f32.mxu0 %vm311_vm1, %v13248_v14 }
 0x227   : > { %10051 = vmatmul.mubr.msk.f32.gmra.mrb[46].mxu0 %vm311_vm1, %v13256_v3 }
 0x228   : > { %10055 = vmatprep.mubr.msk.f32.mxu0 %vm311_vm1, %v16023_v12  ;;  %v8294_v12 = vld [vmem:[%s15527_s1 + $0x20] sm:$0xf] }
 0x22b   : > { %10056 = vmatmul.mubr.msk.f32.vlgmr.msra.gmra.mrb[0].mxu0 %vm311_vm1, %v16024_v24  ;;  %v16064_v24 = vld [vmem:[#allocation34_spill] sm:$0xff] }
 0x22c   : > { %10128 = vmatpush3.msk.msra.mxu0 %vm608_vm0, %v8194_v18  ;;  %10058 = vmatprep.mubr.msk.f32.mxu0 %vm311_vm1, %v16025_v21  ;;  %v13498_v18 = vsel %vm1391_vm3, %v2586_v13, %v15726_v30  ;;  %v16065_v21 = vld [vmem:[#allocation35_spill] sm:$0xff]  ;;  %v16067_v13 = vld [vmem:[#allocation37_spill] sm:$0xff] }
 0x22d   : > { %10201 = vmatprep.subr.msk.mxu0 %vm608_vm0, %v8244_v15  ;;  %v16073_v30 = vld [vmem:[#allocation43_spill] sm:$0xff] }
 0x22f   : > { %10059 = vmatmul.mubr.msk.f32.gmra.mrb[2].mxu0 %vm311_vm1, %v16026_v25 }
 0x230   : > { %10061 = vmatprep.mubr.msk.f32.mxu0 %vm311_vm1, %v16027_v26 }
 0x233   : > { %10062 = vmatmul.mubr.msk.f32.gmra.mrb[4].mxu0 %vm311_vm1, %v16028_v27 }
 0x234   : > { %10064 = vmatprep.mubr.msk.f32.mxu0 %vm311_vm1, %v16029_v28 }
 0x237   : > { %10065 = vmatmul.mubr.msk.f32.gmra.mrb[6].mxu0 %vm311_vm1, %v16030_v29 }
 0x238   : > { %10067 = vmatprep.mubr.msk.f32.mxu0 %vm311_vm1, %v16031_v31 }
 0x23b   : > { %10068 = vmatmul.mubr.msk.f32.gmra.mrb[8].mxu0 %vm311_vm1, %v16032_v32 }
 0x23c   : > { %10070 = vmatprep.mubr.msk.f32.mxu0 %vm311_vm1, %v16033_v33 }
 0x23f   : > { %10071 = vmatmul.mubr.msk.f32.gmra.mrb[10].mxu0 %vm311_vm1, %v16034_v34 }
 0x240   : > { %10073 = vmatprep.mubr.msk.f32.mxu0 %vm311_vm1, %v16035_v35 }
 0x243   : > { %10074 = vmatmul.mubr.msk.f32.gmra.mrb[12].mxu0 %vm311_vm1, %v16036_v36 }
 0x244   : > { %10076 = vmatprep.mubr.msk.f32.mxu0 %vm311_vm1, %v16037_v37 }
 0x247   : > { %10077 = vmatmul.mubr.msk.f32.gmra.mrb[14].mxu0 %vm311_vm1, %v16038_v38 }
 0x248   : > { %10079 = vmatprep.mubr.msk.f32.mxu0 %vm311_vm1, %v16039_v39 }
 0x24b   : > { %10080 = vmatmul.mubr.msk.f32.gmra.mrb[16].mxu0 %vm311_vm1, %v16040_v40 }
 0x24c   : > { %10082 = vmatprep.mubr.msk.f32.mxu0 %vm311_vm1, %v16041_v42 }
 0x24f   : > { %10083 = vmatmul.mubr.msk.f32.gmra.mrb[18].mxu0 %vm311_vm1, %v16042_v43 }
 0x250   : > { %10085 = vmatprep.mubr.msk.f32.mxu0 %vm311_vm1, %v16043_v44 }
 0x253   : > { %10086 = vmatmul.mubr.msk.f32.gmra.mrb[20].mxu0 %vm311_vm1, %v16044_v45 }
 0x254   : > { %10088 = vmatprep.mubr.msk.f32.mxu0 %vm311_vm1, %v16045_v46 }
 0x257   : > { %10089 = vmatmul.mubr.msk.f32.gmra.mrb[22].mxu0 %vm311_vm1, %v16046_v47 }
 0x258   : > { %10091 = vmatprep.mubr.msk.f32.mxu0 %vm311_vm1, %v16047_v48 }
 0x25b   : > { %10092 = vmatmul.mubr.msk.f32.gmra.mrb[24].mxu0 %vm311_vm1, %v16048_v51 }
 0x25c   : > { %10094 = vmatprep.mubr.msk.f32.mxu0 %vm311_vm1, %v16049_v52 }
 0x25f   : > { %10095 = vmatmul.mubr.msk.f32.gmra.mrb[26].mxu0 %vm311_vm1, %v16050_v53 }
 0x260   : > { %10097 = vmatprep.mubr.msk.f32.mxu0 %vm311_vm1, %v16051_v54 }
 0x263   : > { %10098 = vmatmul.mubr.msk.f32.gmra.mrb[28].mxu0 %vm311_vm1, %v16052_v55 }
 0x264   : > { %10100 = vmatprep.mubr.msk.f32.mxu0 %vm311_vm1, %v16053_v56 }
 0x267   : > { %10101 = vmatmul.mubr.msk.f32.gmra.mrb[30].mxu0 %vm311_vm1, %v16054_v57 }
 0x268   : > { %10103 = vmatprep.mubr.msk.f32.mxu0 %vm311_vm1, %v16055_v58 }
 0x26b   : > { %10104 = vmatmul.mubr.msk.f32.gmra.mrb[32].mxu0 %vm311_vm1, %v16056_v59 }
 0x26c   : > { %10106 = vmatprep.mubr.msk.f32.mxu0 %vm311_vm1, %v16057_v60 }
 0x26f   : > { %10107 = vmatmul.mubr.msk.f32.gmra.mrb[34].mxu0 %vm311_vm1, %v16058_v61 }
 0x270   : > { %10109 = vmatprep.mubr.msk.f32.mxu0 %vm311_vm1, %v16059_v62 }
 0x273   : > { %10110 = vmatmul.mubr.msk.f32.gmra.mrb[36].mxu0 %vm311_vm1, %v16060_v63 }
 0x274   : > { %10112 = vmatprep.mubr.msk.f32.mxu0 %vm311_vm1, %v16061_v0 }
 0x277   : > { %10113 = vmatmul.mubr.msk.f32.gmra.mrb[38].mxu0 %vm311_vm1, %v16062_v1 }
 0x278   : > { %10115 = vmatprep.mubr.msk.f32.mxu0 %vm311_vm1, %v13129_v19 }
 0x27b   : > { %10116 = vmatmul.mubr.msk.f32.gmra.mrb[40].mxu0 %vm311_vm1, %v13133_v11 }
 0x27c   : > { %10118 = vmatprep.mubr.msk.f32.mxu0 %vm311_vm1, %v13143_v8 }
 0x27f   : > { %10119 = vmatmul.mubr.msk.f32.gmra.mrb[42].mxu0 %vm311_vm1, %v13147_v4 }
 0x280   : > { %10121 = vmatprep.mubr.msk.f32.mxu0 %vm311_vm1, %v13156_v10 }
 0x283   : > { %10122 = vmatmul.mubr.msk.f32.gmra.mrb[44].mxu0 %vm311_vm1, %v13485_v7 }
 0x284   : > { %10124 = vmatprep.mubr.msk.f32.mxu0 %vm311_vm1, %v13489_v20 }
 0x287   : > { %10125 = vmatmul.mubr.msk.f32.gmra.mrb[46].mxu0 %vm311_vm1, %v13498_v18 }
 0x288   : > { %10129 = vmatprep.mubr.msk.f32.mxu0 %vm311_vm1, %v12605_v22  ;;  %v16068_v22 = vld [vmem:[#allocation38_spill] sm:$0xff] }
 0x28b   : > { %10130 = vmatmul.mubr.msk.f32.vlgmr.msra.gmra.mrb[0].mxu0 %vm311_vm1, %v16064_v24  ;;  %v16070_v24 = vld [vmem:[#allocation40_spill] sm:$0xff] }
 0x28c   : > { %10202 = vmatpush3.msk.msra.mxu0 %vm608_vm0, %v8244_v15  ;;  %10132 = vmatprep.mubr.msk.f32.mxu0 %vm311_vm1, %v16065_v21  ;;  %v16071_v15 = vld [vmem:[#allocation41_spill] sm:$0xff]  ;;  %v16072_v21 = vld [vmem:[#allocation42_spill] sm:$0xff] }
 0x28d   : > { %10275 = vmatprep.subr.msk.mxu0 %vm608_vm0, %v8294_v12 }
 0x28f   : > { %10133 = vmatmul.mubr.msk.f32.gmra.mrb[2].mxu0 %vm311_vm1, %v16066_v2  ;;  %v16074_v2 = vld [vmem:[#allocation44_spill] sm:$0xff] }
 0x290   : > { %10135 = vmatprep.mubr.msk.f32.mxu0 %vm311_vm1, %v16067_v13  ;;  %v16075_v13 = vld [vmem:[#allocation45_spill] sm:$0xff] }
 0x293   : > { %10136 = vmatmul.mubr.msk.f32.gmra.mrb[4].mxu0 %vm311_vm1, %v16068_v22  ;;  %v16076_v22 = vld [vmem:[#allocation46_spill] sm:$0xff] }
 0x294   : > { %10138 = vmatprep.mubr.msk.f32.mxu0 %vm311_vm1, %v16069_v50  ;;  %v16077_v50 = vld [vmem:[#allocation47_spill] sm:$0xff] }
 0x297   : > { %10139 = vmatmul.mubr.msk.f32.gmra.mrb[6].mxu0 %vm311_vm1, %v16070_v24  ;;  %v16078_v24 = vld [vmem:[#allocation48_spill] sm:$0xff] }
 0x298   : > { %10141 = vmatprep.mubr.msk.f32.mxu0 %vm311_vm1, %v16071_v15  ;;  %v16079_v15 = vld [vmem:[#allocation49_spill] sm:$0xff] }
 0x29b   : > { %10142 = vmatmul.mubr.msk.f32.gmra.mrb[8].mxu0 %vm311_vm1, %v16072_v21  ;;  %v16080_v21 = vld [vmem:[#allocation50_spill] sm:$0xff] }
 0x29c   : > { %10144 = vmatprep.mubr.msk.f32.mxu0 %vm311_vm1, %v16073_v30  ;;  %v16081_v30 = vld [vmem:[#allocation51_spill] sm:$0xff] }
 0x29f   : > { %10145 = vmatmul.mubr.msk.f32.gmra.mrb[10].mxu0 %vm311_vm1, %v16074_v2  ;;  %v16082_v2 = vld [vmem:[#allocation52_spill] sm:$0xff] }
 0x2a0   : > { %10147 = vmatprep.mubr.msk.f32.mxu0 %vm311_vm1, %v16075_v13  ;;  %v16083_v13 = vld [vmem:[#allocation53_spill] sm:$0xff] }
 0x2a3   : > { %10148 = vmatmul.mubr.msk.f32.gmra.mrb[12].mxu0 %vm311_vm1, %v16076_v22  ;;  %v16084_v22 = vld [vmem:[#allocation55_spill] sm:$0xff] }
 0x2a4   : > { %10150 = vmatprep.mubr.msk.f32.mxu0 %vm311_vm1, %v16077_v50  ;;  %v16085_v50 = vld [vmem:[#allocation56_spill] sm:$0xff] }
 0x2a7   : > { %10151 = vmatmul.mubr.msk.f32.gmra.mrb[14].mxu0 %vm311_vm1, %v16078_v24  ;;  %v16086_v24 = vld [vmem:[#allocation57_spill] sm:$0xff] }
 0x2a8   : > { %10153 = vmatprep.mubr.msk.f32.mxu0 %vm311_vm1, %v16079_v15  ;;  %v16087_v15 = vld [vmem:[#allocation58_spill] sm:$0xff] }
 0x2ab   : > { %10154 = vmatmul.mubr.msk.f32.gmra.mrb[16].mxu0 %vm311_vm1, %v16080_v21  ;;  %v16088_v21 = vld [vmem:[#allocation59_spill] sm:$0xff] }
 0x2ac   : > { %10156 = vmatprep.mubr.msk.f32.mxu0 %vm311_vm1, %v16081_v30  ;;  %v16089_v30 = vld [vmem:[#allocation60_spill] sm:$0xff] }
 0x2af   : > { %10157 = vmatmul.mubr.msk.f32.gmra.mrb[18].mxu0 %vm311_vm1, %v16082_v2  ;;  %v16090_v2 = vld [vmem:[#allocation62_spill] sm:$0xff] }
 0x2b0   : > { %10159 = vmatprep.mubr.msk.f32.mxu0 %vm311_vm1, %v16083_v13  ;;  %v16091_v13 = vld [vmem:[#allocation63_spill] sm:$0xff] }
 0x2b3   : > { %10160 = vmatmul.mubr.msk.f32.gmra.mrb[20].mxu0 %vm311_vm1, %v16084_v22  ;;  %v16092_v22 = vld [vmem:[#allocation64_spill] sm:$0xff] }
 0x2b4   : > { %10162 = vmatprep.mubr.msk.f32.mxu0 %vm311_vm1, %v16085_v50  ;;  %v16093_v50 = vld [vmem:[#allocation65_spill] sm:$0xff] }
 0x2b7   : > { %10163 = vmatmul.mubr.msk.f32.gmra.mrb[22].mxu0 %vm311_vm1, %v16086_v24  ;;  %v16094_v24 = vld [vmem:[#allocation66_spill] sm:$0xff] }
 0x2b8   : > { %10165 = vmatprep.mubr.msk.f32.mxu0 %vm311_vm1, %v16087_v15  ;;  %v16095_v15 = vld [vmem:[#allocation67_spill] sm:$0xff] }
 0x2bb   : > { %10166 = vmatmul.mubr.msk.f32.gmra.mrb[24].mxu0 %vm311_vm1, %v16088_v21  ;;  %v16096_v21 = vld [vmem:[#allocation68_spill] sm:$0xff] }
 0x2bc   : > { %10168 = vmatprep.mubr.msk.f32.mxu0 %vm311_vm1, %v16089_v30  ;;  %v16098_v30 = vld [vmem:[#allocation70_spill] sm:$0xff] }
 0x2bf   : > { %10169 = vmatmul.mubr.msk.f32.gmra.mrb[26].mxu0 %vm311_vm1, %v16010_v5  ;;  %v16097_v5 = vld [vmem:[#allocation69_spill] sm:$0xff] }
 0x2c0   : > { %10171 = vmatprep.mubr.msk.f32.mxu0 %vm311_vm1, %v16090_v2  ;;  %v16099_v2 = vld [vmem:[#allocation71_spill] sm:$0xff] }
 0x2c3   : > { %10172 = vmatmul.mubr.msk.f32.gmra.mrb[28].mxu0 %vm311_vm1, %v16091_v13  ;;  %v16100_v13 = vld [vmem:[#allocation72_spill] sm:$0xff] }
 0x2c4   : > { %10174 = vmatprep.mubr.msk.f32.mxu0 %vm311_vm1, %v16092_v22  ;;  %v16101_v22 = vld [vmem:[#allocation73_spill] sm:$0xff] }
 0x2c7   : > { %10175 = vmatmul.mubr.msk.f32.gmra.mrb[30].mxu0 %vm311_vm1, %v16093_v50  ;;  %v13589_v50 = vld [vmem:[#allocation2 + $0x1b8] sm:$0xff] }
 0x2c8   : > { %10177 = vmatprep.mubr.msk.f32.mxu0 %vm311_vm1, %v16094_v24  ;;  %v16102_v24 = vld [vmem:[#allocation75_spill] sm:$0xff] }
 0x2cb   : > { %10178 = vmatmul.mubr.msk.f32.gmra.mrb[32].mxu0 %vm311_vm1, %v16095_v15  ;;  %v2924_v15 = vrot.slane %v13476_v49, 7 }
 0x2cc   : > { %10180 = vmatprep.mubr.msk.f32.mxu0 %vm311_vm1, %v16096_v21  ;;  %v2926_v21 = vrot.slane %v13589_v50, 7 }
 0x2cf   : > { %10181 = vmatmul.mubr.msk.f32.gmra.mrb[34].mxu0 %vm311_vm1, %v16097_v5  ;;  %v13597_v5 = vld [vmem:[#allocation2 + $0x1c0] sm:$0xff] }
 0x2d0   : > { %10183 = vmatprep.mubr.msk.f32.mxu0 %vm311_vm1, %v16098_v30  ;;  %v2928_v30 = vrot.slane %v13597_v5, 7 }
 0x2d3   : > { %10184 = vmatmul.mubr.msk.f32.gmra.mrb[36].mxu0 %vm311_vm1, %v16099_v2  ;;  %v2929_v2 = vsel %vm902_vm2, %v2926_v21, %v2928_v30  ;;  %v11802_v30 = vld [vmem:[#allocation2 + $0x98] sm:$0xff] }
 0x2d4   : > { %10186 = vmatprep.mubr.msk.f32.mxu0 %vm311_vm1, %v16100_v13  ;;  %v11795_v13 = vld [vmem:[#allocation2 + $0x60] sm:$0xff] }
 0x2d7   : > { %10187 = vmatmul.mubr.msk.f32.gmra.mrb[38].mxu0 %vm311_vm1, %v16101_v22  ;;  %v11796_v22 = vld [vmem:[#allocation2 + $0x68] sm:$0xff] }
 0x2d8   : > { %10189 = vmatprep.mubr.msk.f32.mxu0 %vm311_vm1, %v16021_v17  ;;  %v2925_v17 = vsel %vm902_vm2, %v1917_v41, %v2924_v15  ;;  %v11794_v41 = vld [vmem:[#allocation2 + $0x58] sm:$0xff] }
 0x2db   : > { %10190 = vmatmul.mubr.msk.f32.gmra.mrb[40].mxu0 %vm311_vm1, %v16102_v24  ;;  %v11797_v24 = vld [vmem:[#allocation2 + $0x70] sm:$0xff] }
 0x2dc   : > { %10192 = vmatprep.mubr.msk.f32.mxu0 %vm311_vm1, %v13265_v23  ;;  %v2927_v23 = vsel %vm902_vm2, %v2924_v15, %v2926_v21  ;;  %v11798_v15 = vld [vmem:[#allocation2 + $0x78] sm:$0xff]  ;;  %v11799_v21 = vld [vmem:[#allocation2 + $0x80] sm:$0xff] }
 0x2df   : > { %10193 = vmatmul.mubr.msk.f32.gmra.mrb[42].mxu0 %vm311_vm1, %v13269_v6  ;;  %v11792_v6 = vld [vmem:[#allocation2 + $0x48] sm:$0xff] }
 0x2e0   : > { %10195 = vmatprep.mubr.msk.f32.mxu0 %vm311_vm1, %v13278_v9  ;;  %v11793_v9 = vld [vmem:[#allocation2 + $0x50] sm:$0xff] }
 0x2e3   : > { %10196 = vmatmul.mubr.msk.f32.gmra.mrb[44].mxu0 %vm311_vm1, %v2925_v17  ;;  %v11800_v17 = vld [vmem:[#allocation2 + $0x88] sm:$0xff] }
 0x2e4   : > { %10198 = vmatprep.mubr.msk.f32.mxu0 %vm311_vm1, %v2927_v23  ;;  %v11803_v23 = vld [vmem:[#allocation2 + $0xa0] sm:$0xff] }
 0x2e7   : > { %10199 = vmatmul.mubr.msk.f32.gmra.mrb[46].mxu0 %vm311_vm1, %v2929_v2  ;;  %v11804_v2 = vld [vmem:[#allocation2 + $0xa8] sm:$0xff] }
 0x2e8   : > { %10203 = vmatprep.mubr.msk.f32.mxu0 %vm311_vm1, %v11792_v6  ;;  %v11805_v6 = vld [vmem:[#allocation2 + $0xb0] sm:$0xff] }
 0x2eb   : > { %10204 = vmatmul.mubr.msk.f32.vlgmr.msra.gmra.mrb[0].mxu0 %vm311_vm1, %v11793_v9  ;;  %v11806_v9 = vld [vmem:[#allocation2 + $0xb8] sm:$0xff] }
 0x2ec   : > { %10276 = vmatpush3.msk.msra.mxu0 %vm608_vm0, %v8294_v12  ;;  %10206 = vmatprep.mubr.msk.f32.mxu0 %vm311_vm1, %v11794_v41  ;;  %v11801_v12 = vld [vmem:[#allocation2 + $0x90] sm:$0xff]  ;;  %v11807_v41 = vld [vmem:[#allocation2 + $0xc0] sm:$0xff] }
 0x2ef   : > { %10207 = vmatmul.mubr.msk.f32.gmra.mrb[2].mxu0 %vm311_vm1, %v11795_v13  ;;  %v11808_v13 = vld [vmem:[#allocation2 + $0xc8] sm:$0xff] }
 0x2f0   : > { %10209 = vmatprep.mubr.msk.f32.mxu0 %vm311_vm1, %v11796_v22  ;;  %v11809_v22 = vld [vmem:[#allocation2 + $0xd0] sm:$0xff] }
 0x2f3   : > { %10210 = vmatmul.mubr.msk.f32.gmra.mrb[4].mxu0 %vm311_vm1, %v11797_v24  ;;  %v11810_v24 = vld [vmem:[#allocation2 + $0xd8] sm:$0xff] }
 0x2f4   : > { %10212 = vmatprep.mubr.msk.f32.mxu0 %vm311_vm1, %v11798_v15  ;;  %v11811_v15 = vld [vmem:[#allocation2 + $0xe0] sm:$0xff] }
 0x2f7   : > { %10213 = vmatmul.mubr.msk.f32.gmra.mrb[6].mxu0 %vm311_vm1, %v11799_v21  ;;  %v11812_v21 = vld [vmem:[#allocation2 + $0xe8] sm:$0xff] }
 0x2f8   : > { %10215 = vmatprep.mubr.msk.f32.mxu0 %vm311_vm1, %v11800_v17  ;;  %v11813_v17 = vld [vmem:[#allocation2 + $0xf0] sm:$0xff] }
 0x2fb   : > { %10216 = vmatmul.mubr.msk.f32.gmra.mrb[8].mxu0 %vm311_vm1, %v11801_v12  ;;  %v11814_v12 = vld [vmem:[#allocation2 + $0xf8] sm:$0xff] }
 0x2fc   : > { %10218 = vmatprep.mubr.msk.f32.mxu0 %vm311_vm1, %v11802_v30  ;;  %v11815_v30 = vld [vmem:[#allocation2 + $0x100] sm:$0xff] }
 0x2ff   : > { %10219 = vmatmul.mubr.msk.f32.gmra.mrb[10].mxu0 %vm311_vm1, %v11803_v23  ;;  %v11816_v23 = vld [vmem:[#allocation2 + $0x108] sm:$0xff] }
 0x300   : > { %10221 = vmatprep.mubr.msk.f32.mxu0 %vm311_vm1, %v11804_v2  ;;  %v11817_v2 = vld [vmem:[#allocation2 + $0x110] sm:$0xff] }
 0x303   : > { %10222 = vmatmul.mubr.msk.f32.gmra.mrb[12].mxu0 %vm311_vm1, %v11805_v6  ;;  %v11818_v6 = vld [vmem:[#allocation2 + $0x118] sm:$0xff] }
 0x304   : > { %10224 = vmatprep.mubr.msk.f32.mxu0 %vm311_vm1, %v11806_v9  ;;  %v11819_v9 = vld [vmem:[#allocation2 + $0x120] sm:$0xff] }
 0x307   : > { %10225 = vmatmul.mubr.msk.f32.gmra.mrb[14].mxu0 %vm311_vm1, %v11807_v41  ;;  %v11820_v41 = vld [vmem:[#allocation2 + $0x128] sm:$0xff] }
 0x308   : > { %10227 = vmatprep.mubr.msk.f32.mxu0 %vm311_vm1, %v11808_v13  ;;  %v11821_v13 = vld [vmem:[#allocation2 + $0x130] sm:$0xff] }
 0x30b   : > { %10228 = vmatmul.mubr.msk.f32.gmra.mrb[16].mxu0 %vm311_vm1, %v11809_v22  ;;  %v11822_v22 = vld [vmem:[#allocation2 + $0x138] sm:$0xff] }
 0x30c   : > { %10230 = vmatprep.mubr.msk.f32.mxu0 %vm311_vm1, %v11810_v24  ;;  %v11823_v24 = vld [vmem:[#allocation2 + $0x140] sm:$0xff] }
 0x30f   : > { %10231 = vmatmul.mubr.msk.f32.gmra.mrb[18].mxu0 %vm311_vm1, %v11811_v15  ;;  %v11824_v15 = vld [vmem:[#allocation2 + $0x148] sm:$0xff] }
 0x310   : > { %10233 = vmatprep.mubr.msk.f32.mxu0 %vm311_vm1, %v11812_v21  ;;  %v11825_v21 = vld [vmem:[#allocation2 + $0x150] sm:$0xff] }
 0x313   : > { %10234 = vmatmul.mubr.msk.f32.gmra.mrb[20].mxu0 %vm311_vm1, %v11813_v17  ;;  %v11826_v17 = vld [vmem:[#allocation2 + $0x158] sm:$0xff] }
 0x314   : > { %10236 = vmatprep.mubr.msk.f32.mxu0 %vm311_vm1, %v11814_v12  ;;  %v11827_v12 = vld [vmem:[#allocation2 + $0x160] sm:$0xff] }
 0x317   : > { %10237 = vmatmul.mubr.msk.f32.gmra.mrb[22].mxu0 %vm311_vm1, %v11815_v30  ;;  %v11828_v30 = vld [vmem:[#allocation2 + $0x168] sm:$0xff] }
 0x318   : > { %10239 = vmatprep.mubr.msk.f32.mxu0 %vm311_vm1, %v11816_v23  ;;  %v11829_v23 = vld [vmem:[#allocation2 + $0x170] sm:$0xff] }
 0x31b   : > { %10240 = vmatmul.mubr.msk.f32.gmra.mrb[24].mxu0 %vm311_vm1, %v11817_v2  ;;  %v11830_v2 = vld [vmem:[#allocation2 + $0x178] sm:$0xff] }
 0x31c   : > { %10242 = vmatprep.mubr.msk.f32.mxu0 %vm311_vm1, %v11818_v6  ;;  %v11831_v6 = vld [vmem:[#allocation2 + $0x180] sm:$0xff] }
 0x31f   : > { %10243 = vmatmul.mubr.msk.f32.gmra.mrb[26].mxu0 %vm311_vm1, %v11819_v9  ;;  %v11832_v9 = vld [vmem:[#allocation2 + $0x188] sm:$0xff] }
 0x320   : > { %10245 = vmatprep.mubr.msk.f32.mxu0 %vm311_vm1, %v11820_v41  ;;  %v11833_v41 = vld [vmem:[#allocation2 + $0x190] sm:$0xff] }
 0x323   : > { %10246 = vmatmul.mubr.msk.f32.gmra.mrb[28].mxu0 %vm311_vm1, %v11821_v13 }
 0x324   : > { %10248 = vmatprep.mubr.msk.f32.mxu0 %vm311_vm1, %v11822_v22 }
 0x327   : > { %10249 = vmatmul.mubr.msk.f32.gmra.mrb[30].mxu0 %vm311_vm1, %v11823_v24  ;;  %v13846_v24 = vld [vmem:[#allocation3 + $0x40] sm:$0xff] }
 0x328   : > { %10251 = vmatprep.mubr.msk.f32.mxu0 %vm311_vm1, %v11824_v15 }
 0x32b   : > { %10252 = vmatmul.mubr.msk.f32.gmra.mrb[32].mxu0 %vm311_vm1, %v11825_v21 }
 0x32c   : > { %10254 = vmatprep.mubr.msk.f32.mxu0 %vm311_vm1, %v11826_v17 }
 0x32f   : > { %10255 = vmatmul.mubr.msk.f32.gmra.mrb[34].mxu0 %vm311_vm1, %v11827_v12 }
 0x330   : > { %10257 = vmatprep.mubr.msk.f32.mxu0 %vm311_vm1, %v11828_v30 }
 0x333   : > { %10258 = vmatmul.mubr.msk.f32.gmra.mrb[36].mxu0 %vm311_vm1, %v11829_v23 }
 0x334   : > { %10260 = vmatprep.mubr.msk.f32.mxu0 %vm311_vm1, %v11830_v2 }
 0x337   : > { %10261 = vmatmul.mubr.msk.f32.gmra.mrb[38].mxu0 %vm311_vm1, %v11831_v6 }
 0x338   : > { %10263 = vmatprep.mubr.msk.f32.mxu0 %vm311_vm1, %v11832_v9  ;;  %v13862_v9 = vld [vmem:[#allocation3 + $0x58] sm:$0xff] }
 0x33b   : > { %10264 = vmatmul.mubr.msk.f32.gmra.mrb[40].mxu0 %vm311_vm1, %v11833_v41 }
 0x33c   : > { %10266 = vmatprep.mubr.msk.f32.mxu0 %vm311_vm1, %v13136_v16  ;;  %v3595_v16 = vrot.slane %v13589_v50, 1 }
 0x33f   : > { %10267 = vmatmul.mubr.msk.f32.gmra.mrb[42].mxu0 %vm311_vm1, %v13248_v14 }
 0x340   : > { %10269 = vmatprep.mubr.msk.f32.mxu0 %vm311_vm1, %v13256_v3  ;;  %v3597_v3 = vrot.slane %v13597_v5, 1 }
 0x343   : > { %10270 = vmatmul.mubr.msk.f32.gmra.mrb[44].mxu0 %vm311_vm1, %v13476_v49 }
 0x344   : > { %10272 = vmatprep.mubr.msk.f32.mxu0 %vm311_vm1, %v13589_v50 }
 0x347   : > { %10273 = vmatmul.mubr.msk.f32.gmra.mrb[46].mxu0 %vm311_vm1, %v13597_v5 }
 0x348   : > { %10277 = vmatprep.mubr.msk.f32.mxu0 %vm311_vm1, %v16026_v25  ;;  %v8346_v25 = vld [vmem:[%s15530_s4 + $0x4] sm:$0xf] }
 0x349   : > { %10349 = vmatprep.subr.msk.mxu1 %vm608_vm0, %v8346_v25 }
 0x34a   : > { %10350 = vmatpush3.msk.msra.mxu1 %vm608_vm0, %v8346_v25 }
 0x34b   : > { %10278 = vmatmul.mubr.msk.f32.vlgmr.msra.gmra.mrb[0].mxu0 %vm311_vm1, %v16027_v26  ;;  %v13771_v26 = vld [vmem:[#allocation3 + $0x18] sm:$0xff] }
 0x34c   : > { %10280 = vmatprep.mubr.msk.f32.mxu0 %vm311_vm1, %v16028_v27  ;;  %10351 = vmatprep.mubr.msk.f32.mxu1 %vm311_vm1, %v13771_v26  ;;  %v13776_v27 = vld [vmem:[#allocation3 + $0x20] sm:$0xff] }
 0x34d   : > { %10352 = vmatmul.mubr.msk.f32.vlgmr.msra.gmra.mrb[0].mxu1 %vm311_vm1, %v13776_v27 }
 0x34f   : > { %10281 = vmatmul.mubr.msk.f32.gmra.mrb[2].mxu0 %vm311_vm1, %v16029_v28  ;;  %v13780_v28 = vld [vmem:[#allocation3 + $0x28] sm:$0xff] }
 0x350   : > { %10283 = vmatprep.mubr.msk.f32.mxu0 %vm311_vm1, %v16030_v29  ;;  %10354 = vmatprep.mubr.msk.f32.mxu1 %vm311_vm1, %v13780_v28  ;;  %v4190_v29 = vld [vmem:[%s15530_s4] sm:$0xf] }
 0x351   : > { %10423 = vmatprep.subr.msk.mxu1 %vm608_vm0, %v4190_v29 }
 0x352   : > { %10424 = vmatpush3.msk.msra.mxu1 %vm608_vm0, %v4190_v29 }
 0x353   : > { %10284 = vmatmul.mubr.msk.f32.gmra.mrb[4].mxu0 %vm311_vm1, %v16031_v31  ;;  %v4631_v31 = vrot.slane %v13771_v26, 7 }
 0x354   : > { %10286 = vmatprep.mubr.msk.f32.mxu0 %vm311_vm1, %v16032_v32  ;;  %v4633_v32 = vrot.slane %v13776_v27, 7 }
 0x357   : > { %10287 = vmatmul.mubr.msk.f32.gmra.mrb[6].mxu0 %vm311_vm1, %v16033_v33  ;;  %v13794_v33 = vld [vmem:[%s15530_s4 + $0x8] sm:$0xf] }
 0x358   : > { %10289 = vmatprep.mubr.msk.f32.mxu0 %vm311_vm1, %v16034_v34  ;;  %v13799_v34 = vsel %vm902_vm2, %v4631_v31, %v4633_v32  ;;  %10497 = vmatprep.subr.msk.mxu1 %vm608_vm0, %v13794_v33 }
 0x35b   : > { %10290 = vmatmul.mubr.msk.f32.gmra.mrb[8].mxu0 %vm311_vm1, %v16035_v35  ;;  %v4635_v35 = vrot.slane %v13780_v28, 7 }
 0x35c   : > { %10292 = vmatprep.mubr.msk.f32.mxu0 %vm311_vm1, %v16036_v36 }
 0x35d   : > { %v13807_v36 = vsel %vm902_vm2, %v4633_v32, %v4635_v35 }
 0x35f   : > { %10293 = vmatmul.mubr.msk.f32.gmra.mrb[10].mxu0 %vm311_vm1, %v16037_v37  ;;  %v13812_v37 = vld [vmem:[%s15528_s2] ss:$0 sm:$0xff] }
 0x360   : > { %10295 = vmatprep.mubr.msk.f32.mxu0 %vm311_vm1, %v16038_v38 }
 0x363   : > { %10296 = vmatmul.mubr.msk.f32.gmra.mrb[12].mxu0 %vm311_vm1, %v16039_v39  ;;  %v13817_v39 = vld [vmem:[%s15529_s3] ss:$0 sm:$0xff] }
 0x364   : > { %10298 = vmatprep.mubr.msk.f32.mxu0 %vm311_vm1, %v16040_v40 }
 0x367   : > { %10299 = vmatmul.mubr.msk.f32.gmra.mrb[14].mxu0 %vm311_vm1, %v16041_v42 }
 0x368   : > { %10301 = vmatprep.mubr.msk.f32.mxu0 %vm311_vm1, %v16042_v43 }
 0x36b   : > { %10302 = vmatmul.mubr.msk.f32.gmra.mrb[16].mxu0 %vm311_vm1, %v16043_v44 }
 0x36c   : > { %10304 = vmatprep.mubr.msk.f32.mxu0 %vm311_vm1, %v16044_v45 }
 0x36f   : > { %10305 = vmatmul.mubr.msk.f32.gmra.mrb[18].mxu0 %vm311_vm1, %v16045_v46 }
 0x370   : > { %10307 = vmatprep.mubr.msk.f32.mxu0 %vm311_vm1, %v16046_v47 }
 0x373   : > { %10308 = vmatmul.mubr.msk.f32.gmra.mrb[20].mxu0 %vm311_vm1, %v16047_v48 }
 0x374   : > { %10310 = vmatprep.mubr.msk.f32.mxu0 %vm311_vm1, %v16048_v51 }
 0x377   : > { %10311 = vmatmul.mubr.msk.f32.gmra.mrb[22].mxu0 %vm311_vm1, %v16049_v52 }
 0x378   : > { %10313 = vmatprep.mubr.msk.f32.mxu0 %vm311_vm1, %v16050_v53 }
 0x37b   : > { %10314 = vmatmul.mubr.msk.f32.gmra.mrb[24].mxu0 %vm311_vm1, %v16051_v54 }
 0x37c   : > { %10316 = vmatprep.mubr.msk.f32.mxu0 %vm311_vm1, %v16052_v55 }
 0x37f   : > { %10317 = vmatmul.mubr.msk.f32.gmra.mrb[26].mxu0 %vm311_vm1, %v16053_v56 }
 0x380   : > { %10319 = vmatprep.mubr.msk.f32.mxu0 %vm311_vm1, %v16054_v57 }
 0x383   : > { %10320 = vmatmul.mubr.msk.f32.gmra.mrb[28].mxu0 %vm311_vm1, %v16055_v58 }
 0x384   : > { %10322 = vmatprep.mubr.msk.f32.mxu0 %vm311_vm1, %v16056_v59 }
 0x387   : > { %10323 = vmatmul.mubr.msk.f32.gmra.mrb[30].mxu0 %vm311_vm1, %v16057_v60 }
 0x388   : > { %10325 = vmatprep.mubr.msk.f32.mxu0 %vm311_vm1, %v16058_v61 }
 0x38b   : > { %10326 = vmatmul.mubr.msk.f32.gmra.mrb[32].mxu0 %vm311_vm1, %v16059_v62 }
 0x38c   : > { %10328 = vmatprep.mubr.msk.f32.mxu0 %vm311_vm1, %v16060_v63 }
 0x38f   : > { %10329 = vmatmul.mubr.msk.f32.gmra.mrb[34].mxu0 %vm311_vm1, %v16061_v0 }
 0x390   : > { %10331 = vmatprep.mubr.msk.f32.mxu0 %vm311_vm1, %v16062_v1 }
 0x393   : > { %10332 = vmatmul.mubr.msk.f32.gmra.mrb[36].mxu0 %vm311_vm1, %v13129_v19  ;;  %v460_v19 = vld [vmem:[#allocation2 + $0x1c8] sm:$0xff] }
 0x394   : > { %10334 = vmatprep.mubr.msk.f32.mxu0 %vm311_vm1, %v13133_v11  ;;  %v3599_v11 = vrot.slane %v460_v19, 1 }
 0x396   : > { %v3600_v14 = vsel %vm1391_vm3, %v3597_v3, %v3599_v11 }
 0x397   : > { %10335 = vmatmul.mubr.msk.f32.gmra.mrb[38].mxu0 %vm311_vm1, %v13143_v8  ;;  %v16103_v8 = vrot.slane %v13476_v49, 1 }
 0x398   : > { %10337 = vmatprep.mubr.msk.f32.mxu0 %vm311_vm1, %v13147_v4 }
 0x399   : > { %v3596_v4 = vsel %vm1391_vm3, %v16103_v8, %v3595_v16 }
 0x39b   : > { %10338 = vmatmul.mubr.msk.f32.gmra.mrb[40].mxu0 %vm311_vm1, %v13156_v10  ;;  %v3598_v10 = vsel %vm1391_vm3, %v3595_v16, %v3597_v3 }
 0x39c   : > { %10340 = vmatprep.mubr.msk.f32.mxu0 %vm311_vm1, %v13485_v7 }
 0x39f   : > { %10341 = vmatmul.mubr.msk.f32.gmra.mrb[42].mxu0 %vm311_vm1, %v13489_v20 }
 0x3a0   : > { %10343 = vmatprep.mubr.msk.f32.mxu0 %vm311_vm1, %v13498_v18 }
 0x3a3   : > { %10344 = vmatmul.mubr.msk.f32.gmra.mrb[44].mxu0 %vm311_vm1, %v3596_v4 }
 0x3a4   : > { %10346 = vmatprep.mubr.msk.f32.mxu0 %vm311_vm1, %v3598_v10 }
 0x3a7   : > { %10347 = vmatmul.mubr.msk.f32.gmra.mrb[46].mxu0 %vm311_vm1, %v3600_v14 }
 0x41e   : > { %v10279_v38 = vpop.f32.mrb[0].mxu0 }
 0x41f   : > { %v3939_v40 = vmul.f32 %v10279_v38, %v13812_v37  ;;  %v3676_v42 = vpop.f32.mrb[1].mxu0 }
 0x420   : > { %v3938_v43 = vmul.f32 %v13812_v37, %v3676_v42  ;;  %v13882_v42 = vld [vmem:[#allocation3 + $0x70] sm:$0xff] }
 0x421   : > { %v3978_v44 = vadd.f32 %v13817_v39, %v3939_v40 }
 0x422   : > { %v3977_v45 = vadd.f32 %v13817_v39, %v3938_v43  ;;  %v10282_v46 = vpop.f32.mrb[2].mxu0 }
 0x423   : > { %v4010_v47 = vmax.f32 %v3978_v44, 0.0  ;;  %v3940_v48 = vmul.f32 %v10282_v46, %v13812_v37  ;;  %v3686_v51 = vpop.f32.mrb[3].mxu0 }
 0x424   : > { %v4009_v52 = vmax.f32 %v3977_v45, 0.0 }
 0x425   : > { %4103 = vst.msk [vmem:[#allocation3 + $0x38] sm:$0xff] %vm311_vm1, %v4010_v47  ;;  %v3979_v53 = vadd.f32 %v13817_v39, %v3940_v48 }
 0x426   : > { %4102 = vst.msk [vmem:[#allocation3 + $0x30] sm:$0xff] %vm311_vm1, %v4009_v52  ;;  %v10285_v54 = vpop.f32.mrb[4].mxu0 }
 0x427   : > { %v4011_v55 = vmax.f32 %v3979_v53, 0.0  ;;  %v3695_v56 = vpop.f32.mrb[5].mxu0  ;;  %v13898_v53 = vld [vmem:[#allocation3 + $0x88] sm:$0xff] }
 0x428   : > { %v3941_v57 = vmul.f32 %v13812_v37, %v3695_v56 }
 0x429   : > { %4104 = vst.msk [vmem:[#allocation3 + $0x48] sm:$0xff] %vm311_vm1, %v4011_v55 }
 0x42a   : > { %v3980_v58 = vadd.f32 %v13817_v39, %v3941_v57  ;;  %v10288_v59 = vpop.f32.mrb[6].mxu0 }
 0x42b   : > { %v3943_v60 = vmul.f32 %v10288_v59, %v13812_v37  ;;  %v3704_v61 = vpop.f32.mrb[7].mxu0 }
 0x42c   : > { %v4012_v62 = vmax.f32 %v3980_v58, 0.0  ;;  %v3942_v63 = vmul.f32 %v13812_v37, %v3704_v61  ;;  %v13839_v20 = vld [vmem:[#allocation3 + $0x38] sm:$0xff] }
 0x42d   : > { %v3982_v0 = vadd.f32 %v13817_v39, %v3943_v60  ;;  %v13833_v1 = vld [vmem:[#allocation3 + $0x30] sm:$0xff] }
 0x42e   : > { %4105 = vst.msk [vmem:[#allocation3 + $0x50] sm:$0xff] %vm311_vm1, %v4012_v62  ;;  %v3981_v49 = vadd.f32 %v13817_v39, %v3942_v63  ;;  %v10291_v7 = vpop.f32.mrb[8].mxu0  ;;  %10355 = vmatmul.mubr.msk.f32.gmra.mrb[2].mxu1 %vm311_vm1, %v13833_v1 }
 0x42f   : > { %v4014_v18 = vmax.f32 %v3982_v0, 0.0  ;;  %v3944_v50 = vmul.f32 %v10291_v7, %v13812_v37  ;;  %v3714_v5 = vpop.f32.mrb[9].mxu0  ;;  %10357 = vmatprep.mubr.msk.f32.mxu1 %vm311_vm1, %v13839_v20 }
 0x430   : > { %v4013_v13 = vmax.f32 %v3981_v49, 0.0  ;;  %v13851_v21 = vld [vmem:[#allocation3 + $0x48] sm:$0xff] }
 0x431   : > { %4107 = vst.msk [vmem:[#allocation3 + $0x68] sm:$0xff] %vm311_vm1, %v4014_v18  ;;  %v3983_v22 = vadd.f32 %v13817_v39, %v3944_v50  ;;  %v13918_v50 = vld [vmem:[#allocation3 + $0xa0] sm:$0xff] }
 0x432   : > { %4106 = vst.msk [vmem:[#allocation3 + $0x60] sm:$0xff] %vm311_vm1, %v4013_v13  ;;  %v10294_v15 = vpop.f32.mrb[10].mxu0  ;;  %10358 = vmatmul.mubr.msk.f32.gmra.mrb[4].mxu1 %vm311_vm1, %v13846_v24 }
 0x433   : > { %v4015_v17 = vmax.f32 %v3983_v22, 0.0  ;;  %v3723_v12 = vpop.f32.mrb[11].mxu0  ;;  %10360 = vmatprep.mubr.msk.f32.mxu1 %vm311_vm1, %v13851_v21 }
 0x434   : > { %v3945_v30 = vmul.f32 %v13812_v37, %v3723_v12 }
 0x435   : > { %4108 = vst.msk [vmem:[#allocation3 + $0x78] sm:$0xff] %vm311_vm1, %v4015_v17  ;;  %v13857_v23 = vld [vmem:[#allocation3 + $0x50] sm:$0xff] }
 0x436   : > { %v3984_v2 = vadd.f32 %v13817_v39, %v3945_v30  ;;  %v10297_v6 = vpop.f32.mrb[12].mxu0  ;;  %10361 = vmatmul.mubr.msk.f32.gmra.mrb[6].mxu1 %vm311_vm1, %v13857_v23 }
 0x437   : > { %v3947_v41 = vmul.f32 %v10297_v6, %v13812_v37  ;;  %v3732_v16 = vpop.f32.mrb[13].mxu0  ;;  %10363 = vmatprep.mubr.msk.f32.mxu1 %vm311_vm1, %v13862_v9  ;;  %v13934_v6 = vld [vmem:[#allocation3 + $0xb8] sm:$0xff] }
 0x438   : > { %v4016_v3 = vmax.f32 %v3984_v2, 0.0  ;;  %v3946_v19 = vmul.f32 %v13812_v37, %v3732_v16  ;;  %v13875_v14 = vld [vmem:[#allocation3 + $0x68] sm:$0xff] }
 0x439   : > { %v3986_v8 = vadd.f32 %v13817_v39, %v3947_v41  ;;  %v13869_v4 = vld [vmem:[#allocation3 + $0x60] sm:$0xff] }
 0x43a   : > { %4109 = vst.msk [vmem:[#allocation3 + $0x80] sm:$0xff] %vm311_vm1, %v4016_v3  ;;  %v3985_v11 = vadd.f32 %v13817_v39, %v3946_v19  ;;  %v10300_v10 = vpop.f32.mrb[14].mxu0  ;;  %10364 = vmatmul.mubr.msk.f32.gmra.mrb[8].mxu1 %vm311_vm1, %v13869_v4 }
 0x43b   : > { %v4018_v25 = vmax.f32 %v3986_v8, 0.0  ;;  %v3948_v29 = vmul.f32 %v10300_v10, %v13812_v37  ;;  %v3742_v32 = vpop.f32.mrb[15].mxu0  ;;  %10366 = vmatprep.mubr.msk.f32.mxu1 %vm311_vm1, %v13875_v14 }
 0x43c   : > { %v4017_v38 = vmax.f32 %v3985_v11, 0.0  ;;  %v13887_v44 = vld [vmem:[#allocation3 + $0x78] sm:$0xff] }
 0x43d   : > { %4111 = vst.msk [vmem:[#allocation3 + $0x98] sm:$0xff] %vm311_vm1, %v4018_v25  ;;  %v3987_v40 = vadd.f32 %v13817_v39, %v3948_v29 }
 0x43e   : > { %4110 = vst.msk [vmem:[#allocation3 + $0x90] sm:$0xff] %vm311_vm1, %v4017_v38  ;;  %v10303_v43 = vpop.f32.mrb[16].mxu0  ;;  %10367 = vmatmul.mubr.msk.f32.gmra.mrb[10].mxu1 %vm311_vm1, %v13882_v42 }
 0x43f   : > { %v4019_v45 = vmax.f32 %v3987_v40, 0.0  ;;  %v3751_v46 = vpop.f32.mrb[17].mxu0  ;;  %10369 = vmatprep.mubr.msk.f32.mxu1 %vm311_vm1, %v13887_v44 }
 0x440   : > { %v3949_v47 = vmul.f32 %v13812_v37, %v3751_v46  ;;  %v13954_v46 = vld [vmem:[#allocation3 + $0xd0] sm:$0xff] }
 0x441   : > { %4112 = vst.msk [vmem:[#allocation3 + $0xa8] sm:$0xff] %vm311_vm1, %v4019_v45  ;;  %v13893_v48 = vld [vmem:[#allocation3 + $0x80] sm:$0xff] }
 0x442   : > { %v3988_v51 = vadd.f32 %v13817_v39, %v3949_v47  ;;  %v10306_v52 = vpop.f32.mrb[18].mxu0  ;;  %10370 = vmatmul.mubr.msk.f32.gmra.mrb[12].mxu1 %vm311_vm1, %v13893_v48 }
 0x443   : > { %v3951_v54 = vmul.f32 %v10306_v52, %v13812_v37  ;;  %v3760_v55 = vpop.f32.mrb[19].mxu0  ;;  %10372 = vmatprep.mubr.msk.f32.mxu1 %vm311_vm1, %v13898_v53 }
 0x444   : > { %v4020_v56 = vmax.f32 %v3988_v51, 0.0  ;;  %v3950_v57 = vmul.f32 %v13812_v37, %v3760_v55  ;;  %v13911_v62 = vld [vmem:[#allocation3 + $0x98] sm:$0xff] }
 0x445   : > { %v3990_v58 = vadd.f32 %v13817_v39, %v3951_v54  ;;  %v13905_v59 = vld [vmem:[#allocation3 + $0x90] sm:$0xff] }
 0x446   : > { %4113 = vst.msk [vmem:[#allocation3 + $0xb0] sm:$0xff] %vm311_vm1, %v4020_v56  ;;  %v3989_v60 = vadd.f32 %v13817_v39, %v3950_v57  ;;  %v10309_v61 = vpop.f32.mrb[20].mxu0  ;;  %10373 = vmatmul.mubr.msk.f32.gmra.mrb[14].mxu1 %vm311_vm1, %v13905_v59 }
 0x447   : > { %v4022_v63 = vmax.f32 %v3990_v58, 0.0  ;;  %v3952_v0 = vmul.f32 %v10309_v61, %v13812_v37  ;;  %v3770_v49 = vpop.f32.mrb[21].mxu0  ;;  %10375 = vmatprep.mubr.msk.f32.mxu1 %vm311_vm1, %v13911_v62 }
 0x448   : > { %v4021_v7 = vmax.f32 %v3989_v60, 0.0  ;;  %v13923_v13 = vld [vmem:[#allocation3 + $0xa8] sm:$0xff] }
 0x449   : > { %4115 = vst.msk [vmem:[#allocation3 + $0xc8] sm:$0xff] %vm311_vm1, %v4022_v63  ;;  %v3991_v18 = vadd.f32 %v13817_v39, %v3952_v0  ;;  %v13970_v60 = vld [vmem:[#allocation3 + $0xe8] sm:$0xff] }
 0x44a   : > { %4114 = vst.msk [vmem:[#allocation3 + $0xc0] sm:$0xff] %vm311_vm1, %v4021_v7  ;;  %v10312_v5 = vpop.f32.mrb[22].mxu0  ;;  %10376 = vmatmul.mubr.msk.f32.gmra.mrb[16].mxu1 %vm311_vm1, %v13918_v50 }
 0x44b   : > { %v4023_v22 = vmax.f32 %v3991_v18, 0.0  ;;  %v3779_v15 = vpop.f32.mrb[23].mxu0  ;;  %10378 = vmatprep.mubr.msk.f32.mxu1 %vm311_vm1, %v13923_v13 }
 0x44c   : > { %v3953_v17 = vmul.f32 %v13812_v37, %v3779_v15 }
 0x44d   : > { %4116 = vst.msk [vmem:[#allocation3 + $0xd8] sm:$0xff] %vm311_vm1, %v4023_v22  ;;  %v13929_v12 = vld [vmem:[#allocation3 + $0xb0] sm:$0xff] }
 0x44e   : > { %v3992_v30 = vadd.f32 %v13817_v39, %v3953_v17  ;;  %v10315_v2 = vpop.f32.mrb[24].mxu0  ;;  %10379 = vmatmul.mubr.msk.f32.gmra.mrb[18].mxu1 %vm311_vm1, %v13929_v12 }
 0x44f   : > { %v3955_v41 = vmul.f32 %v10315_v2, %v13812_v37  ;;  %v3788_v16 = vpop.f32.mrb[25].mxu0  ;;  %10381 = vmatprep.mubr.msk.f32.mxu1 %vm311_vm1, %v13934_v6 }
 0x450   : > { %v4024_v3 = vmax.f32 %v3992_v30, 0.0  ;;  %v3954_v19 = vmul.f32 %v13812_v37, %v3788_v16  ;;  %v13947_v29 = vld [vmem:[#allocation3 + $0xc8] sm:$0xff] }
 0x451   : > { %v3994_v8 = vadd.f32 %v13817_v39, %v3955_v41  ;;  %v13941_v11 = vld [vmem:[#allocation3 + $0xc0] sm:$0xff] }
 0x452   : > { %4117 = vst.msk [vmem:[#allocation3 + $0xe0] sm:$0xff] %vm311_vm1, %v4024_v3  ;;  %v3993_v10 = vadd.f32 %v13817_v39, %v3954_v19  ;;  %v10318_v25 = vpop.f32.mrb[26].mxu0  ;;  %10382 = vmatmul.mubr.msk.f32.gmra.mrb[20].mxu1 %vm311_vm1, %v13941_v11  ;;  %v13990_v3 = vld [vmem:[#allocation3 + $0x100] sm:$0xff]  ;;  %v5118_v19 = vrot.slane %v13771_v26, 1  ;;  %v4641_v26 = vrot.slane %v13846_v24, 7 }
 0x453   : > { %v4026_v32 = vmax.f32 %v3994_v8, 0.0  ;;  %v3956_v38 = vmul.f32 %v10318_v25, %v13812_v37  ;;  %v3798_v40 = vpop.f32.mrb[27].mxu0  ;;  %10384 = vmatprep.mubr.msk.f32.mxu1 %vm311_vm1, %v13947_v29  ;;  %v5119_v8 = vrot.slane %v13776_v27, 1 }
 0x454   : > { %v4025_v43 = vmax.f32 %v3993_v10, 0.0  ;;  %v13959_v51 = vld [vmem:[#allocation3 + $0xd8] sm:$0xff] }
 0x455   : > { %4119 = vst.msk [vmem:[#allocation3 + $0xf8] sm:$0xff] %vm311_vm1, %v4026_v32  ;;  %v3995_v45 = vadd.f32 %v13817_v39, %v3956_v38 }
 0x456   : > { %4118 = vst.msk [vmem:[#allocation3 + $0xf0] sm:$0xff] %vm311_vm1, %v4025_v43  ;;  %v10321_v47 = vpop.f32.mrb[28].mxu0  ;;  %10385 = vmatmul.mubr.msk.f32.gmra.mrb[22].mxu1 %vm311_vm1, %v13954_v46  ;;  %v15727_v43 = vrot.slane %v13780_v28, 1 }
 0x457   : > { %v4027_v52 = vmax.f32 %v3995_v45, 0.0  ;;  %v3807_v54 = vpop.f32.mrb[29].mxu0  ;;  %10387 = vmatprep.mubr.msk.f32.mxu1 %vm311_vm1, %v13959_v51 }
 0x458   : > { %v3957_v55 = vmul.f32 %v13812_v37, %v3807_v54  ;;  %v14012_v54 = vsel %vm1391_vm3, %v5118_v19, %v5119_v8  ;;  %v14037_v19 = vld [vmem:[#allocation3 + $0x130] sm:$0xff] }
 0x459   : > { %4120 = vst.msk [vmem:[#allocation3 + $0x108] sm:$0xff] %vm311_vm1, %v4027_v52  ;;  %v13965_v56 = vld [vmem:[#allocation3 + $0xe0] sm:$0xff]  ;;  %v14009_v52 = vld [vmem:[#allocation3 + $0x118] sm:$0xff] }
 0x45a   : > { %v3996_v57 = vadd.f32 %v13817_v39, %v3957_v55  ;;  %v10324_v58 = vpop.f32.mrb[30].mxu0  ;;  %10388 = vmatmul.mubr.msk.f32.gmra.mrb[24].mxu1 %vm311_vm1, %v13965_v56 }
 0x45b   : > { %v3959_v61 = vmul.f32 %v10324_v58, %v13812_v37  ;;  %v3816_v63 = vpop.f32.mrb[31].mxu0  ;;  %10390 = vmatprep.mubr.msk.f32.mxu1 %vm311_vm1, %v13970_v60  ;;  %v14020_v58 = vsel %vm1391_vm3, %v5119_v8, %v15727_v43  ;;  %v4657_v43 = vrot.slane %v13893_v48, 7 }
 0x45c   : > { %v4028_v0 = vmax.f32 %v3996_v57, 0.0  ;;  %v3958_v49 = vmul.f32 %v13812_v37, %v3816_v63  ;;  %v13983_v15 = vld [vmem:[#allocation3 + $0xf8] sm:$0xff] }
 0x45d   : > { %v3998_v7 = vadd.f32 %v13817_v39, %v3959_v61  ;;  %v13977_v18 = vld [vmem:[#allocation3 + $0xf0] sm:$0xff] }
 0x45e   : > { %4121 = vst.msk [vmem:[#allocation3 + $0x110] sm:$0xff] %vm311_vm1, %v4028_v0  ;;  %v3997_v5 = vadd.f32 %v13817_v39, %v3958_v49  ;;  %v10327_v22 = vpop.f32.mrb[32].mxu0  ;;  %10391 = vmatmul.mubr.msk.f32.gmra.mrb[26].mxu1 %vm311_vm1, %v13977_v18 }
 0x45f   : > { %v4030_v17 = vmax.f32 %v3998_v7, 0.0  ;;  %v3960_v30 = vmul.f32 %v10327_v22, %v13812_v37  ;;  %v3826_v2 = vpop.f32.mrb[33].mxu0  ;;  %10393 = vmatprep.mubr.msk.f32.mxu1 %vm311_vm1, %v13983_v15 }
 0x460   : > { %v4029_v41 = vmax.f32 %v3997_v5, 0.0  ;;  %v13997_v25 = vld [vmem:[#allocation3 + $0x108] sm:$0xff] }
 0x461   : > { %4123 = vst.msk [vmem:[#allocation3 + $0x128] sm:$0xff] %vm311_vm1, %v4030_v17  ;;  %v3999_v16 = vadd.f32 %v13817_v39, %v3960_v30 }
 0x462   : > { %4122 = vst.msk [vmem:[#allocation3 + $0x120] sm:$0xff] %vm311_vm1, %v4029_v41  ;;  %v10330_v10 = vpop.f32.mrb[34].mxu0  ;;  %10394 = vmatmul.mubr.msk.f32.gmra.mrb[28].mxu1 %vm311_vm1, %v13990_v3 }
 0x463   : > { %v4031_v32 = vmax.f32 %v3999_v16, 0.0  ;;  %v3835_v38 = vpop.f32.mrb[35].mxu0  ;;  %10396 = vmatprep.mubr.msk.f32.mxu1 %vm311_vm1, %v13997_v25 }
 0x464   : > { %v3961_v40 = vmul.f32 %v13812_v37, %v3835_v38 }
 0x465   : > { %4124 = vst.msk [vmem:[#allocation3 + $0x138] sm:$0xff] %vm311_vm1, %v4031_v32  ;;  %v14004_v27 = vld [vmem:[#allocation3 + $0x110] sm:$0xff] }
 0x466   : > { %v4000_v45 = vadd.f32 %v13817_v39, %v3961_v40  ;;  %v10333_v47 = vpop.f32.mrb[36].mxu0  ;;  %10397 = vmatmul.mubr.msk.f32.gmra.mrb[30].mxu1 %vm311_vm1, %v14004_v27 }
 0x467   : > { %v3963_v55 = vmul.f32 %v10333_v47, %v13812_v37  ;;  %v3844_v57 = vpop.f32.mrb[37].mxu0  ;;  %10399 = vmatprep.mubr.msk.f32.mxu1 %vm311_vm1, %v14009_v52 }
 0x468   : > { %v4032_v61 = vmax.f32 %v4000_v45, 0.0  ;;  %v3962_v63 = vmul.f32 %v13812_v37, %v3844_v57  ;;  %v14030_v22 = vld [vmem:[#allocation3 + $0x128] sm:$0xff] }
 0x469   : > { %v4002_v0 = vadd.f32 %v13817_v39, %v3963_v55  ;;  %v14024_v49 = vld [vmem:[#allocation3 + $0x120] sm:$0xff]  ;;  %v14053_v57 = vld [vmem:[#allocation3 + $0x148] sm:$0xff] }
 0x46a   : > { %4125 = vst.msk [vmem:[#allocation3 + $0x140] sm:$0xff] %vm311_vm1, %v4032_v61  ;;  %v4001_v7 = vadd.f32 %v13817_v39, %v3962_v63  ;;  %v10336_v5 = vpop.f32.mrb[38].mxu0  ;;  %10400 = vmatmul.mubr.msk.f32.gmra.mrb[32].mxu1 %vm311_vm1, %v14024_v49 }
 0x46b   : > { %v4034_v17 = vmax.f32 %v4002_v0, 0.0  ;;  %v3964_v30 = vmul.f32 %v10336_v5, %v13812_v37  ;;  %v3854_v2 = vpop.f32.mrb[39].mxu0  ;;  %10402 = vmatprep.mubr.msk.f32.mxu1 %vm311_vm1, %v14030_v22 }
 0x46c   : > { %v4033_v41 = vmax.f32 %v4001_v7, 0.0  ;;  %v14042_v10 = vld [vmem:[#allocation3 + $0x138] sm:$0xff] }
 0x46d   : > { %4127 = vst.msk [vmem:[#allocation3 + $0x158] sm:$0xff] %vm311_vm1, %v4034_v17  ;;  %v4003_v16 = vadd.f32 %v13817_v39, %v3964_v30 }
 0x46e   : > { %4126 = vst.msk [vmem:[#allocation3 + $0x150] sm:$0xff] %vm311_vm1, %v4033_v41  ;;  %v10339_v8 = vpop.f32.mrb[40].mxu0  ;;  %10403 = vmatmul.mubr.msk.f32.gmra.mrb[34].mxu1 %vm311_vm1, %v14037_v19 }
 0x46f   : > { %v4035_v32 = vmax.f32 %v4003_v16, 0.0  ;;  %v3863_v38 = vpop.f32.mrb[41].mxu0  ;;  %10405 = vmatprep.mubr.msk.f32.mxu1 %vm311_vm1, %v14042_v10 }
 0x470   : > { %v3965_v40 = vmul.f32 %v13812_v37, %v3863_v38 }
 0x471   : > { %4128 = vst.msk [vmem:[#allocation3 + $0x168] sm:$0xff] %vm311_vm1, %v4035_v32  ;;  %v14048_v45 = vld [vmem:[#allocation3 + $0x140] sm:$0xff] }
 0x472   : > { %v4004_v47 = vadd.f32 %v13817_v39, %v3965_v40  ;;  %v10342_v55 = vpop.f32.mrb[42].mxu0  ;;  %10406 = vmatmul.mubr.msk.f32.gmra.mrb[36].mxu1 %vm311_vm1, %v14048_v45 }
 0x473   : > { %v3967_v61 = vmul.f32 %v10342_v55, %v13812_v37  ;;  %v3872_v63 = vpop.f32.mrb[43].mxu0  ;;  %10408 = vmatprep.mubr.msk.f32.mxu1 %vm311_vm1, %v14053_v57 }
 0x474   : > { %v4036_v0 = vmax.f32 %v4004_v47, 0.0  ;;  %v3966_v7 = vmul.f32 %v13812_v37, %v3872_v63  ;;  %v14066_v41 = vld [vmem:[#allocation3 + $0x158] sm:$0xff]  ;;  %v14073_v47 = vld [vmem:[#allocation3 + $0x160] sm:$0xff] }
 0x475   : > { %v4006_v5 = vadd.f32 %v13817_v39, %v3967_v61  ;;  %v14060_v17 = vld [vmem:[#allocation3 + $0x150] sm:$0xff] }
 0x476   : > { %4129 = vst.msk [vmem:[#allocation3 + $0x170] sm:$0xff] %vm311_vm1, %v4036_v0  ;;  %v4005_v30 = vadd.f32 %v13817_v39, %v3966_v7  ;;  %v10345_v2 = vpop.f32.mrb[44].mxu0  ;;  %10409 = vmatmul.mubr.msk.f32.gmra.mrb[38].mxu1 %vm311_vm1, %v14060_v17 }
 0x477   : > { %v4038_v16 = vmax.f32 %v4006_v5, 0.0  ;;  %v3968_v8 = vmul.f32 %v10345_v2, %v13812_v37  ;;  %v3882_v32 = vpop.f32.mrb[45].mxu0  ;;  %10411 = vmatprep.mubr.msk.f32.mxu1 %vm311_vm1, %v14066_v41 }
 0x478   : > { %v4037_v38 = vmax.f32 %v4005_v30, 0.0  ;;  %v14078_v61 = vld [vmem:[#allocation3 + $0x168] sm:$0xff]  ;;  %v4134_v30 = vld [vmem:[#allocation3 + $0x10] sm:$0xff] }
 0x479   : > { %4131 = vst.msk [vmem:[#allocation3 + $0x188] sm:$0xff] %vm311_vm1, %v4038_v16  ;;  %v4007_v40 = vadd.f32 %v13817_v39, %v3968_v8  ;;  %v14089_v16 = vld [vmem:[#allocation3 + $0x178] sm:$0xff]  ;;  %v4630_v32 = vrot.slane %v4134_v30, 7  ;;  %v4647_v30 = vrot.slane %v13862_v9, 7 }
 0x47a   : > { %4130 = vst.msk [vmem:[#allocation3 + $0x180] sm:$0xff] %vm311_vm1, %v4037_v38  ;;  %v10348_v55 = vpop.f32.mrb[46].mxu0  ;;  %10412 = vmatmul.mubr.msk.f32.gmra.mrb[40].mxu1 %vm311_vm1, %v14073_v47 }
 0x47b   : > { %v4039_v63 = vmax.f32 %v4007_v40, 0.0  ;;  %v3891_v0 = vpop.f32.mrb[47].mxu0  ;;  %10414 = vmatprep.mubr.msk.f32.mxu1 %vm311_vm1, %v14078_v61  ;;  %v14105_v40 = vld [vmem:[#allocation3 + $0x190] sm:$0xff]  ;;  %v4637_v55 = vrot.slane %v13833_v1, 7 }
 0x47c   : > { %v3969_v7 = vmul.f32 %v13812_v37, %v3891_v0  ;;  %v4639_v0 = vrot.slane %v13839_v20, 7 }
 0x47d   : > { %4132 = vst.msk [vmem:[#allocation3 + $0x198] sm:$0xff] %vm311_vm1, %v4039_v63  ;;  %v14084_v5 = vld [vmem:[#allocation3 + $0x170] sm:$0xff]  ;;  %v14114_v63 = vld [vmem:[%s15530_s4 + $0xc] sm:$0xf] }
 0x47e   : > { %v4008_v2 = vadd.f32 %v13817_v39, %v3969_v7  ;;  %10415 = vmatmul.mubr.msk.f32.gmra.mrb[42].mxu1 %vm311_vm1, %v14084_v5  ;;  %v4632_v39 = vsel %vm902_vm2, %v4630_v32, %v4631_v31  ;;  %v14129_v31 = vsel %vm902_vm2, %v4635_v35, %v4637_v55  ;;  %v4645_v7 = vrot.slane %v13857_v23, 7 }
 0x47f   : > { %10417 = vmatprep.mubr.msk.f32.mxu1 %vm311_vm1, %v14089_v16 }
 0x480   : > { %v4040_v8 = vmax.f32 %v4008_v2, 0.0  ;;  %v14098_v37 = vld [vmem:[#allocation3 + $0x188] sm:$0xff]  ;;  %v14158_v32 = vsel %vm902_vm2, %v4645_v7, %v4647_v30 }
 0x481   : > { %v14093_v38 = vld [vmem:[#allocation3 + $0x180] sm:$0xff]  ;;  %16104 = vst [vmem:[#allocation61_spill] sm:$0xff] %v14158_v32 }
 0x482   : > { %4133 = vst.msk [vmem:[#allocation3 + $0x1a0] sm:$0xff] %vm311_vm1, %v4040_v8  ;;  %10418 = vmatmul.mubr.msk.f32.gmra.mrb[44].mxu1 %vm311_vm1, %v14093_v38  ;;  %v4649_v8 = vrot.slane %v13869_v4, 7 }
 0x483   : > { %10420 = vmatprep.mubr.msk.f32.mxu1 %vm311_vm1, %v14098_v37 }
 0x486   : > { %10421 = vmatmul.mubr.msk.f32.gmra.mrb[46].mxu1 %vm311_vm1, %v14105_v40 }
 0x487   : > { %10425 = vmatprep.mubr.msk.f32.mxu1 %vm311_vm1, %v4632_v39  ;;  %v4651_v39 = vrot.slane %v13875_v14, 7 }
 0x48a   : > { %10426 = vmatmul.mubr.msk.f32.vlgmr.msra.gmra.mrb[0].mxu1 %vm311_vm1, %v13799_v34  ;;  %v14134_v34 = vsel %vm902_vm2, %v4637_v55, %v4639_v0  ;;  %v14164_v55 = vsel %vm902_vm2, %v4647_v30, %v4649_v8 }
 0x48b   : > { %10498 = vmatpush3.msk.msra.mxu1 %vm608_vm0, %v13794_v33  ;;  %10428 = vmatprep.mubr.msk.f32.mxu1 %vm311_vm1, %v13807_v36  ;;  %v4643_v33 = vrot.slane %v13851_v21, 7  ;;  %v14140_v36 = vsel %vm902_vm2, %v4639_v0, %v4641_v26  ;;  %16105 = vst [vmem:[#allocation74_spill] sm:$0xff] %v14164_v55  ;;  %v4653_v0 = vrot.slane %v13882_v42, 7 }
 0x48c   : > { %10571 = vmatprep.subr.msk.mxu1 %vm608_vm0, %v14114_v63 }
 0x48d   : > { %v14146_v35 = vsel %vm902_vm2, %v4641_v26, %v4643_v33  ;;  %v14152_v2 = vsel %vm902_vm2, %v4643_v33, %v4645_v7  ;;  %v14170_v26 = vsel %vm902_vm2, %v4649_v8, %v4651_v39  ;;  %v4655_v33 = vrot.slane %v13887_v44, 7 }
 0x48e   : > { %10429 = vmatmul.mubr.msk.f32.gmra.mrb[2].mxu1 %vm311_vm1, %v14129_v31  ;;  %16106 = vst [vmem:[#allocation76_spill] sm:$0xff] %v14170_v26  ;;  %v14176_v7 = vsel %vm902_vm2, %v4651_v39, %v4653_v0 }
 0x48f   : > { %10431 = vmatprep.mubr.msk.f32.mxu1 %vm311_vm1, %v14134_v34  ;;  %16107 = vst [vmem:[#allocation77_spill] sm:$0xff] %v14176_v7  ;;  %v14182_v30 = vsel %vm902_vm2, %v4653_v0, %v4655_v33  ;;  %v14188_v8 = vsel %vm902_vm2, %v4655_v33, %v4657_v43 }
 0x490   : > { %16108 = vst [vmem:[#allocation78_spill] sm:$0xff] %v14182_v30  ;;  %16109 = vst [vmem:[#allocation79_spill] sm:$0xff] %v14188_v8 }
 0x492   : > { %10432 = vmatmul.mubr.msk.f32.gmra.mrb[4].mxu1 %vm311_vm1, %v14140_v36 }
 0x493   : > { %10434 = vmatprep.mubr.msk.f32.mxu1 %vm311_vm1, %v14146_v35 }
 0x496   : > { %10435 = vmatmul.mubr.msk.f32.gmra.mrb[6].mxu1 %vm311_vm1, %v14152_v2 }
 0x497   : > { %10437 = vmatprep.mubr.msk.f32.mxu1 %vm311_vm1, %v14158_v32 }
 0x49a   : > { %10438 = vmatmul.mubr.msk.f32.gmra.mrb[8].mxu1 %vm311_vm1, %v14164_v55  ;;  %v4659_v55 = vrot.slane %v13898_v53, 7 }
 0x49b   : > { %10440 = vmatprep.mubr.msk.f32.mxu1 %vm311_vm1, %v14170_v26  ;;  %v4661_v26 = vrot.slane %v13905_v59, 7 }
 0x49c   : > { %v14194_v39 = vsel %vm902_vm2, %v4657_v43, %v4659_v55 }
 0x49d   : > { %16110 = vst [vmem:[#allocation80_spill] sm:$0xff] %v14194_v39  ;;  %v14200_v0 = vsel %vm902_vm2, %v4659_v55, %v4661_v26 }
 0x49e   : > { %10441 = vmatmul.mubr.msk.f32.gmra.mrb[10].mxu1 %vm311_vm1, %v14176_v7  ;;  %v4663_v7 = vrot.slane %v13911_v62, 7  ;;  %16111 = vst [vmem:[#allocation81_spill] sm:$0xff] %v14200_v0 }
 0x49f   : > { %10443 = vmatprep.mubr.msk.f32.mxu1 %vm311_vm1, %v14182_v30  ;;  %v4665_v30 = vrot.slane %v13918_v50, 7 }
 0x4a0   : > { %v14206_v33 = vsel %vm902_vm2, %v4661_v26, %v4663_v7 }
 0x4a1   : > { %16112 = vst [vmem:[#allocation82_spill] sm:$0xff] %v14206_v33  ;;  %v14212_v43 = vsel %vm902_vm2, %v4663_v7, %v4665_v30 }
 0x4a2   : > { %10444 = vmatmul.mubr.msk.f32.gmra.mrb[12].mxu1 %vm311_vm1, %v14188_v8  ;;  %v4667_v8 = vrot.slane %v13923_v13, 7  ;;  %16113 = vst [vmem:[#allocation83_spill] sm:$0xff] %v14212_v43 }
 0x4a3   : > { %10446 = vmatprep.mubr.msk.f32.mxu1 %vm311_vm1, %v14194_v39  ;;  %v4669_v39 = vrot.slane %v13929_v12, 7 }
 0x4a4   : > { %v14218_v55 = vsel %vm902_vm2, %v4665_v30, %v4667_v8 }
 0x4a5   : > { %16114 = vst [vmem:[#allocation84_spill] sm:$0xff] %v14218_v55  ;;  %v14224_v26 = vsel %vm902_vm2, %v4667_v8, %v4669_v39 }
 0x4a6   : > { %10447 = vmatmul.mubr.msk.f32.gmra.mrb[14].mxu1 %vm311_vm1, %v14200_v0  ;;  %v4671_v0 = vrot.slane %v13934_v6, 7  ;;  %16115 = vst [vmem:[#allocation85_spill] sm:$0xff] %v14224_v26 }
 0x4a7   : > { %10449 = vmatprep.mubr.msk.f32.mxu1 %vm311_vm1, %v14206_v33  ;;  %v4673_v33 = vrot.slane %v13941_v11, 7 }
 0x4a8   : > { %v14230_v7 = vsel %vm902_vm2, %v4669_v39, %v4671_v0 }
 0x4a9   : > { %16116 = vst [vmem:[#allocation86_spill] sm:$0xff] %v14230_v7  ;;  %v14236_v30 = vsel %vm902_vm2, %v4671_v0, %v4673_v33 }
 0x4aa   : > { %10450 = vmatmul.mubr.msk.f32.gmra.mrb[16].mxu1 %vm311_vm1, %v14212_v43  ;;  %v4675_v43 = vrot.slane %v13947_v29, 7  ;;  %16117 = vst [vmem:[#allocation87_spill] sm:$0xff] %v14236_v30 }
 0x4ab   : > { %10452 = vmatprep.mubr.msk.f32.mxu1 %vm311_vm1, %v14218_v55  ;;  %v4677_v55 = vrot.slane %v13954_v46, 7 }
 0x4ac   : > { %v14242_v8 = vsel %vm902_vm2, %v4673_v33, %v4675_v43 }
 0x4ad   : > { %16118 = vst [vmem:[#allocation88_spill] sm:$0xff] %v14242_v8  ;;  %v14248_v39 = vsel %vm902_vm2, %v4675_v43, %v4677_v55 }
 0x4ae   : > { %10453 = vmatmul.mubr.msk.f32.gmra.mrb[18].mxu1 %vm311_vm1, %v14224_v26  ;;  %v4679_v26 = vrot.slane %v13959_v51, 7  ;;  %16119 = vst [vmem:[#allocation89_spill] sm:$0xff] %v14248_v39 }
 0x4af   : > { %10455 = vmatprep.mubr.msk.f32.mxu1 %vm311_vm1, %v14230_v7  ;;  %v4681_v7 = vrot.slane %v13965_v56, 7 }
 0x4b0   : > { %v14254_v0 = vsel %vm902_vm2, %v4677_v55, %v4679_v26 }
 0x4b1   : > { %16120 = vst [vmem:[#allocation90_spill] sm:$0xff] %v14254_v0  ;;  %v14260_v33 = vsel %vm902_vm2, %v4679_v26, %v4681_v7 }
 0x4b2   : > { %10456 = vmatmul.mubr.msk.f32.gmra.mrb[20].mxu1 %vm311_vm1, %v14236_v30  ;;  %v4683_v30 = vrot.slane %v13970_v60, 7  ;;  %16121 = vst [vmem:[#allocation91_spill] sm:$0xff] %v14260_v33 }
 0x4b3   : > { %10458 = vmatprep.mubr.msk.f32.mxu1 %vm311_vm1, %v14242_v8  ;;  %v4685_v8 = vrot.slane %v13977_v18, 7 }
 0x4b4   : > { %v14266_v43 = vsel %vm902_vm2, %v4681_v7, %v4683_v30 }
 0x4b5   : > { %16122 = vst [vmem:[#allocation92_spill] sm:$0xff] %v14266_v43  ;;  %v14272_v55 = vsel %vm902_vm2, %v4683_v30, %v4685_v8 }
 0x4b6   : > { %10459 = vmatmul.mubr.msk.f32.gmra.mrb[22].mxu1 %vm311_vm1, %v14248_v39  ;;  %v4687_v39 = vrot.slane %v13983_v15, 7  ;;  %16123 = vst [vmem:[#allocation93_spill] sm:$0xff] %v14272_v55 }
 0x4b7   : > { %10461 = vmatprep.mubr.msk.f32.mxu1 %vm311_vm1, %v14254_v0  ;;  %v4689_v0 = vrot.slane %v13990_v3, 7 }
 0x4b8   : > { %v14278_v26 = vsel %vm902_vm2, %v4685_v8, %v4687_v39 }
 0x4b9   : > { %16124 = vst [vmem:[#allocation94_spill] sm:$0xff] %v14278_v26  ;;  %v14284_v7 = vsel %vm902_vm2, %v4687_v39, %v4689_v0 }
 0x4ba   : > { %10462 = vmatmul.mubr.msk.f32.gmra.mrb[24].mxu1 %vm311_vm1, %v14260_v33  ;;  %v4691_v33 = vrot.slane %v13997_v25, 7  ;;  %16125 = vst [vmem:[#allocation95_spill] sm:$0xff] %v14284_v7 }
 0x4bb   : > { %10464 = vmatprep.mubr.msk.f32.mxu1 %vm311_vm1, %v14266_v43  ;;  %v4693_v43 = vrot.slane %v14004_v27, 7 }
 0x4bc   : > { %v14290_v30 = vsel %vm902_vm2, %v4689_v0, %v4691_v33 }
 0x4bd   : > { %16126 = vst [vmem:[#allocation96_spill] sm:$0xff] %v14290_v30  ;;  %v14296_v8 = vsel %vm902_vm2, %v4691_v33, %v4693_v43 }
 0x4be   : > { %10465 = vmatmul.mubr.msk.f32.gmra.mrb[26].mxu1 %vm311_vm1, %v14272_v55  ;;  %v4695_v55 = vrot.slane %v14009_v52, 7  ;;  %16127 = vst [vmem:[#allocation97_spill] sm:$0xff] %v14296_v8 }
 0x4bf   : > { %10467 = vmatprep.mubr.msk.f32.mxu1 %vm311_vm1, %v14278_v26  ;;  %v4697_v26 = vrot.slane %v14024_v49, 7 }
 0x4c0   : > { %v14302_v39 = vsel %vm902_vm2, %v4693_v43, %v4695_v55 }
 0x4c1   : > { %16128 = vst [vmem:[#allocation98_spill] sm:$0xff] %v14302_v39  ;;  %v14308_v0 = vsel %vm902_vm2, %v4695_v55, %v4697_v26 }
 0x4c2   : > { %10468 = vmatmul.mubr.msk.f32.gmra.mrb[28].mxu1 %vm311_vm1, %v14284_v7  ;;  %v4699_v7 = vrot.slane %v14030_v22, 7  ;;  %16129 = vst [vmem:[#allocation99_spill] sm:$0xff] %v14308_v0 }
 0x4c3   : > { %10470 = vmatprep.mubr.msk.f32.mxu1 %vm311_vm1, %v14290_v30  ;;  %v4701_v30 = vrot.slane %v14037_v19, 7 }
 0x4c4   : > { %v14314_v33 = vsel %vm902_vm2, %v4697_v26, %v4699_v7 }
 0x4c5   : > { %16130 = vst [vmem:[#allocation101_spill] sm:$0xff] %v14314_v33  ;;  %v14320_v43 = vsel %vm902_vm2, %v4699_v7, %v4701_v30 }
 0x4c6   : > { %10471 = vmatmul.mubr.msk.f32.gmra.mrb[30].mxu1 %vm311_vm1, %v14296_v8  ;;  %v4703_v8 = vrot.slane %v14042_v10, 7  ;;  %16131 = vst [vmem:[#allocation102_spill] sm:$0xff] %v14320_v43 }
 0x4c7   : > { %10473 = vmatprep.mubr.msk.f32.mxu1 %vm311_vm1, %v14302_v39  ;;  %v4705_v39 = vrot.slane %v14048_v45, 7 }
 0x4c8   : > { %v14326_v55 = vsel %vm902_vm2, %v4701_v30, %v4703_v8 }
 0x4c9   : > { %16132 = vst [vmem:[#allocation103_spill] sm:$0xff] %v14326_v55  ;;  %v14332_v26 = vsel %vm902_vm2, %v4703_v8, %v4705_v39 }
 0x4ca   : > { %10474 = vmatmul.mubr.msk.f32.gmra.mrb[32].mxu1 %vm311_vm1, %v14308_v0  ;;  %v4707_v0 = vrot.slane %v14053_v57, 7  ;;  %16133 = vst [vmem:[#allocation104_spill] sm:$0xff] %v14332_v26 }
 0x4cb   : > { %10476 = vmatprep.mubr.msk.f32.mxu1 %vm311_vm1, %v14314_v33  ;;  %v4709_v33 = vrot.slane %v14060_v17, 7 }
 0x4cc   : > { %v14338_v7 = vsel %vm902_vm2, %v4705_v39, %v4707_v0 }
 0x4cd   : > { %16134 = vst [vmem:[#allocation105_spill] sm:$0xff] %v14338_v7  ;;  %v14344_v30 = vsel %vm902_vm2, %v4707_v0, %v4709_v33 }
 0x4ce   : > { %10477 = vmatmul.mubr.msk.f32.gmra.mrb[34].mxu1 %vm311_vm1, %v14320_v43  ;;  %v4711_v43 = vrot.slane %v14066_v41, 7  ;;  %16135 = vst [vmem:[#allocation106_spill] sm:$0xff] %v14344_v30 }
 0x4cf   : > { %10479 = vmatprep.mubr.msk.f32.mxu1 %vm311_vm1, %v14326_v55  ;;  %v4713_v55 = vrot.slane %v14073_v47, 7 }
 0x4d0   : > { %v14350_v8 = vsel %vm902_vm2, %v4709_v33, %v4711_v43 }
 0x4d1   : > { %16136 = vst [vmem:[#allocation107_spill] sm:$0xff] %v14350_v8  ;;  %v14356_v39 = vsel %vm902_vm2, %v4711_v43, %v4713_v55 }
 0x4d2   : > { %10480 = vmatmul.mubr.msk.f32.gmra.mrb[36].mxu1 %vm311_vm1, %v14332_v26  ;;  %v4715_v26 = vrot.slane %v14078_v61, 7  ;;  %16137 = vst [vmem:[#allocation108_spill] sm:$0xff] %v14356_v39 }
 0x4d3   : > { %10482 = vmatprep.mubr.msk.f32.mxu1 %vm311_vm1, %v14338_v7  ;;  %v4717_v7 = vrot.slane %v14084_v5, 7 }
 0x4d4   : > { %v14362_v0 = vsel %vm902_vm2, %v4713_v55, %v4715_v26 }
 0x4d5   : > { %16138 = vst [vmem:[#allocation109_spill] sm:$0xff] %v14362_v0  ;;  %v14368_v33 = vsel %vm902_vm2, %v4715_v26, %v4717_v7 }
 0x4d6   : > { %10483 = vmatmul.mubr.msk.f32.gmra.mrb[38].mxu1 %vm311_vm1, %v14344_v30  ;;  %v4719_v30 = vrot.slane %v14089_v16, 7  ;;  %16139 = vst [vmem:[#allocation110_spill] sm:$0xff] %v14368_v33 }
 0x4d7   : > { %10485 = vmatprep.mubr.msk.f32.mxu1 %vm311_vm1, %v14350_v8  ;;  %v4721_v8 = vrot.slane %v14093_v38, 7 }
 0x4d8   : > { %v14374_v43 = vsel %vm902_vm2, %v4717_v7, %v4719_v30 }
 0x4d9   : > { %16140 = vst [vmem:[#allocation111_spill] sm:$0xff] %v14374_v43  ;;  %v14380_v55 = vsel %vm902_vm2, %v4719_v30, %v4721_v8  ;;  %v5125_v30 = vrot.slane %v13839_v20, 1 }
 0x4da   : > { %10486 = vmatmul.mubr.msk.f32.gmra.mrb[40].mxu1 %vm311_vm1, %v14356_v39  ;;  %v4723_v39 = vrot.slane %v14098_v37, 7  ;;  %16141 = vst [vmem:[#allocation112_spill] sm:$0xff] %v14380_v55 }
 0x4db   : > { %10488 = vmatprep.mubr.msk.f32.mxu1 %vm311_vm1, %v14362_v0  ;;  %v15800_v0 = vrot.slane %v14105_v40, 7 }
 0x4dc   : > { %v14386_v26 = vsel %vm902_vm2, %v4721_v8, %v4723_v39  ;;  %v14404_v8 = vld [vmem:[%s15530_s4 + $0x10] sm:$0xf] }
 0x4dd   : > { %16142 = vst [vmem:[#allocation113_spill] sm:$0xff] %v14386_v26  ;;  %v14393_v7 = vsel %vm902_vm2, %v4723_v39, %v15800_v0  ;;  %v5169_v0 = vrot.slane %v13970_v60, 1 }
 0x4de   : > { %10489 = vmatmul.mubr.msk.f32.gmra.mrb[42].mxu1 %vm311_vm1, %v14368_v33  ;;  %16143 = vst [vmem:[#allocation114_spill] sm:$0xff] %v14393_v7 }
 0x4df   : > { %10491 = vmatprep.mubr.msk.f32.mxu1 %vm311_vm1, %v14374_v43  ;;  %v5123_v43 = vrot.slane %v13833_v1, 1  ;;  %v16144_v1 = vrot.slane %v13780_v28, 1 }
 0x4e1   : > { %v5124_v39 = vsel %vm1391_vm3, %v16144_v1, %v5123_v43  ;;  %v14418_v20 = vsel %vm1391_vm3, %v5123_v43, %v5125_v30  ;;  %v5135_v43 = vrot.slane %v13869_v4, 1  ;;  %v5141_v1 = vrot.slane %v13887_v44, 1 }
 0x4e2   : > { %10492 = vmatmul.mubr.msk.f32.gmra.mrb[44].mxu1 %vm311_vm1, %v14380_v55 }
 0x4e3   : > { %10494 = vmatprep.mubr.msk.f32.mxu1 %vm311_vm1, %v14386_v26  ;;  %v5127_v26 = vrot.slane %v13846_v24, 1  ;;  %v5129_v24 = vrot.slane %v13851_v21, 1 }
 0x4e5   : > { %v14424_v28 = vsel %vm1391_vm3, %v5125_v30, %v5127_v26  ;;  %v5137_v30 = vrot.slane %v13875_v14, 1 }
 0x4e6   : > { %10495 = vmatmul.mubr.msk.f32.gmra.mrb[46].mxu1 %vm311_vm1, %v14393_v7 }
 0x4e7   : > { %10499 = vmatprep.mubr.msk.f32.mxu1 %vm311_vm1, %v14012_v54  ;;  %v5131_v54 = vrot.slane %v13857_v23, 1  ;;  %v14454_v4 = vsel %vm1391_vm3, %v5135_v43, %v5137_v30 }
 0x4e9   : > { %v14436_v21 = vsel %vm1391_vm3, %v5129_v24, %v5131_v54 }
 0x4ea   : > { %10500 = vmatmul.mubr.msk.f32.vlgmr.msra.gmra.mrb[0].mxu1 %vm311_vm1, %v14020_v58  ;;  %v14430_v58 = vsel %vm1391_vm3, %v5127_v26, %v5129_v24  ;;  %v5139_v26 = vrot.slane %v13882_v42, 1  ;;  %v5145_v24 = vrot.slane %v13898_v53, 1 }
 0x4eb   : > { %10572 = vmatpush3.msk.msra.mxu1 %vm608_vm0, %v14114_v63  ;;  %10502 = vmatprep.mubr.msk.f32.mxu1 %vm311_vm1, %v5124_v39  ;;  %v5133_v63 = vrot.slane %v13862_v9, 1  ;;  %v5143_v39 = vrot.slane %v13893_v48, 1 }
 0x4ec   : > { %10645 = vmatprep.subr.msk.mxu1 %vm608_vm0, %v14404_v8  ;;  %v14460_v14 = vsel %vm1391_vm3, %v5137_v30, %v5139_v26  ;;  %v14466_v42 = vsel %vm1391_vm3, %v5139_v26, %v5141_v1  ;;  %v5153_v30 = vrot.slane %v13923_v13, 1  ;;  %v5155_v26 = vrot.slane %v13929_v12, 1 }
 0x4ed   : > { %v14442_v23 = vsel %vm1391_vm3, %v5131_v54, %v5133_v63  ;;  %v14448_v9 = vsel %vm1391_vm3, %v5133_v63, %v5135_v43  ;;  %v14472_v44 = vsel %vm1391_vm3, %v5141_v1, %v5143_v39  ;;  %v5147_v54 = vrot.slane %v13905_v59, 1 }
 0x4ee   : > { %10503 = vmatmul.mubr.msk.f32.gmra.mrb[2].mxu1 %vm311_vm1, %v14418_v20  ;;  %v14478_v48 = vsel %vm1391_vm3, %v5143_v39, %v5145_v24  ;;  %v5149_v63 = vrot.slane %v13911_v62, 1  ;;  %v5151_v43 = vrot.slane %v13918_v50, 1  ;;  %v5157_v1 = vrot.slane %v13934_v6, 1 }
 0x4ef   : > { %10505 = vmatprep.mubr.msk.f32.mxu1 %vm311_vm1, %v14424_v28  ;;  %v14484_v53 = vsel %vm1391_vm3, %v5145_v24, %v5147_v54  ;;  %v14508_v13 = vsel %vm1391_vm3, %v5153_v30, %v5155_v26  ;;  %v5159_v39 = vrot.slane %v13941_v11, 1  ;;  %v5161_v24 = vrot.slane %v13947_v29, 1 }
 0x4f0   : > { %v14490_v59 = vsel %vm1391_vm3, %v5147_v54, %v5149_v63  ;;  %v14496_v62 = vsel %vm1391_vm3, %v5149_v63, %v5151_v43  ;;  %v14502_v50 = vsel %vm1391_vm3, %v5151_v43, %v5153_v30  ;;  %v14514_v12 = vsel %vm1391_vm3, %v5155_v26, %v5157_v1 }
 0x4f1   : > { %v14520_v6 = vsel %vm1391_vm3, %v5157_v1, %v5159_v39  ;;  %v5163_v54 = vrot.slane %v13954_v46, 1  ;;  %v14526_v63 = vsel %vm1391_vm3, %v5159_v39, %v5161_v24  ;;  %v5165_v43 = vrot.slane %v13959_v51, 1 }
 0x4f2   : > { %10506 = vmatmul.mubr.msk.f32.gmra.mrb[4].mxu1 %vm311_vm1, %v14430_v58  ;;  %16145 = vst [vmem:[#allocation115_spill] sm:$0xff] %v14526_v63  ;;  %v5167_v26 = vrot.slane %v13965_v56, 1 }
 0x4f3   : > { %10508 = vmatprep.mubr.msk.f32.mxu1 %vm311_vm1, %v14436_v21  ;;  %v14532_v30 = vsel %vm1391_vm3, %v5161_v24, %v5163_v54  ;;  %v14538_v1 = vsel %vm1391_vm3, %v5163_v54, %v5165_v43 }
 0x4f4   : > { %16146 = vst [vmem:[#allocation116_spill] sm:$0xff] %v14532_v30  ;;  %16147 = vst [vmem:[#allocation34_spill] sm:$0xff] %v14538_v1  ;;  %v14544_v39 = vsel %vm1391_vm3, %v5165_v43, %v5167_v26  ;;  %v14550_v24 = vsel %vm1391_vm3, %v5167_v26, %v5169_v0 }
 0x4f5   : > { %16148 = vst [vmem:[#allocation35_spill] sm:$0xff] %v14544_v39  ;;  %16149 = vst [vmem:[#allocation36_spill] sm:$0xff] %v14550_v24 }
 0x4f6   : > { %10509 = vmatmul.mubr.msk.f32.gmra.mrb[6].mxu1 %vm311_vm1, %v14442_v23 }
 0x4f7   : > { %10511 = vmatprep.mubr.msk.f32.mxu1 %vm311_vm1, %v14448_v9 }
 0x4fa   : > { %10512 = vmatmul.mubr.msk.f32.gmra.mrb[8].mxu1 %vm311_vm1, %v14454_v4 }
 0x4fb   : > { %10514 = vmatprep.mubr.msk.f32.mxu1 %vm311_vm1, %v14460_v14 }
 0x4fe   : > { %10515 = vmatmul.mubr.msk.f32.gmra.mrb[10].mxu1 %vm311_vm1, %v14466_v42 }
 0x4ff   : > { %10517 = vmatprep.mubr.msk.f32.mxu1 %vm311_vm1, %v14472_v44 }
 0x502   : > { %10518 = vmatmul.mubr.msk.f32.gmra.mrb[12].mxu1 %vm311_vm1, %v14478_v48 }
 0x503   : > { %10520 = vmatprep.mubr.msk.f32.mxu1 %vm311_vm1, %v14484_v53 }
 0x506   : > { %10521 = vmatmul.mubr.msk.f32.gmra.mrb[14].mxu1 %vm311_vm1, %v14490_v59 }
 0x507   : > { %10523 = vmatprep.mubr.msk.f32.mxu1 %vm311_vm1, %v14496_v62 }
 0x50a   : > { %10524 = vmatmul.mubr.msk.f32.gmra.mrb[16].mxu1 %vm311_vm1, %v14502_v50 }
 0x50b   : > { %10526 = vmatprep.mubr.msk.f32.mxu1 %vm311_vm1, %v14508_v13 }
 0x50e   : > { %10527 = vmatmul.mubr.msk.f32.gmra.mrb[18].mxu1 %vm311_vm1, %v14514_v12 }
 0x50f   : > { %10529 = vmatprep.mubr.msk.f32.mxu1 %vm311_vm1, %v14520_v6 }
 0x512   : > { %10530 = vmatmul.mubr.msk.f32.gmra.mrb[20].mxu1 %vm311_vm1, %v14526_v63  ;;  %v5171_v63 = vrot.slane %v13977_v18, 1 }
 0x513   : > { %10532 = vmatprep.mubr.msk.f32.mxu1 %vm311_vm1, %v14532_v30  ;;  %v5173_v30 = vrot.slane %v13983_v15, 1 }
 0x514   : > { %v14556_v54 = vsel %vm1391_vm3, %v5169_v0, %v5171_v63 }
 0x515   : > { %16150 = vst [vmem:[#allocation37_spill] sm:$0xff] %v14556_v54  ;;  %v14562_v43 = vsel %vm1391_vm3, %v5171_v63, %v5173_v30 }
 0x516   : > { %10533 = vmatmul.mubr.msk.f32.gmra.mrb[22].mxu1 %vm311_vm1, %v14538_v1  ;;  %v5175_v1 = vrot.slane %v13990_v3, 1  ;;  %16151 = vst [vmem:[#allocation38_spill] sm:$0xff] %v14562_v43 }
 0x517   : > { %10535 = vmatprep.mubr.msk.f32.mxu1 %vm311_vm1, %v14544_v39  ;;  %v5177_v39 = vrot.slane %v13997_v25, 1 }
 0x518   : > { %v14568_v26 = vsel %vm1391_vm3, %v5173_v30, %v5175_v1 }
 0x519   : > { %16152 = vst [vmem:[#allocation39_spill] sm:$0xff] %v14568_v26  ;;  %v14574_v0 = vsel %vm1391_vm3, %v5175_v1, %v5177_v39 }
 0x51a   : > { %10536 = vmatmul.mubr.msk.f32.gmra.mrb[24].mxu1 %vm311_vm1, %v14550_v24  ;;  %v5179_v24 = vrot.slane %v14004_v27, 1  ;;  %16153 = vst [vmem:[#allocation40_spill] sm:$0xff] %v14574_v0 }
 0x51b   : > { %10538 = vmatprep.mubr.msk.f32.mxu1 %vm311_vm1, %v14556_v54  ;;  %v5181_v54 = vrot.slane %v14009_v52, 1 }
 0x51c   : > { %v14580_v63 = vsel %vm1391_vm3, %v5177_v39, %v5179_v24 }
 0x51d   : > { %16154 = vst [vmem:[#allocation41_spill] sm:$0xff] %v14580_v63  ;;  %v14586_v30 = vsel %vm1391_vm3, %v5179_v24, %v5181_v54 }
 0x51e   : > { %10539 = vmatmul.mubr.msk.f32.gmra.mrb[26].mxu1 %vm311_vm1, %v14562_v43  ;;  %v5183_v43 = vrot.slane %v14024_v49, 1  ;;  %16155 = vst [vmem:[#allocation42_spill] sm:$0xff] %v14586_v30 }
 0x51f   : > { %10541 = vmatprep.mubr.msk.f32.mxu1 %vm311_vm1, %v14568_v26  ;;  %v5185_v26 = vrot.slane %v14030_v22, 1 }
 0x520   : > { %v14592_v1 = vsel %vm1391_vm3, %v5181_v54, %v5183_v43 }
 0x521   : > { %16156 = vst [vmem:[#allocation43_spill] sm:$0xff] %v14592_v1  ;;  %v14598_v39 = vsel %vm1391_vm3, %v5183_v43, %v5185_v26 }
 0x522   : > { %10542 = vmatmul.mubr.msk.f32.gmra.mrb[28].mxu1 %vm311_vm1, %v14574_v0  ;;  %v5187_v0 = vrot.slane %v14037_v19, 1  ;;  %16157 = vst [vmem:[#allocation44_spill] sm:$0xff] %v14598_v39 }
 0x523   : > { %10544 = vmatprep.mubr.msk.f32.mxu1 %vm311_vm1, %v14580_v63  ;;  %v5189_v63 = vrot.slane %v14042_v10, 1 }
 0x524   : > { %v14604_v24 = vsel %vm1391_vm3, %v5185_v26, %v5187_v0 }
 0x525   : > { %16158 = vst [vmem:[#allocation45_spill] sm:$0xff] %v14604_v24  ;;  %v14610_v54 = vsel %vm1391_vm3, %v5187_v0, %v5189_v63 }
 0x526   : > { %10545 = vmatmul.mubr.msk.f32.gmra.mrb[30].mxu1 %vm311_vm1, %v14586_v30  ;;  %v5191_v30 = vrot.slane %v14048_v45, 1  ;;  %16159 = vst [vmem:[#allocation46_spill] sm:$0xff] %v14610_v54 }
 0x527   : > { %10547 = vmatprep.mubr.msk.f32.mxu1 %vm311_vm1, %v14592_v1  ;;  %v5193_v1 = vrot.slane %v14053_v57, 1 }
 0x528   : > { %v14616_v43 = vsel %vm1391_vm3, %v5189_v63, %v5191_v30 }
 0x529   : > { %16160 = vst [vmem:[#allocation47_spill] sm:$0xff] %v14616_v43  ;;  %v14622_v26 = vsel %vm1391_vm3, %v5191_v30, %v5193_v1 }
 0x52a   : > { %10548 = vmatmul.mubr.msk.f32.gmra.mrb[32].mxu1 %vm311_vm1, %v14598_v39  ;;  %v5195_v39 = vrot.slane %v14060_v17, 1  ;;  %16161 = vst [vmem:[#allocation48_spill] sm:$0xff] %v14622_v26 }
 0x52b   : > { %10550 = vmatprep.mubr.msk.f32.mxu1 %vm311_vm1, %v14604_v24  ;;  %v5197_v24 = vrot.slane %v14066_v41, 1 }
 0x52c   : > { %v14628_v0 = vsel %vm1391_vm3, %v5193_v1, %v5195_v39 }
 0x52d   : > { %16162 = vst [vmem:[#allocation49_spill] sm:$0xff] %v14628_v0  ;;  %v14634_v63 = vsel %vm1391_vm3, %v5195_v39, %v5197_v24 }
 0x52e   : > { %10551 = vmatmul.mubr.msk.f32.gmra.mrb[34].mxu1 %vm311_vm1, %v14610_v54  ;;  %v5199_v54 = vrot.slane %v14073_v47, 1  ;;  %16163 = vst [vmem:[#allocation50_spill] sm:$0xff] %v14634_v63 }
 0x52f   : > { %10553 = vmatprep.mubr.msk.f32.mxu1 %vm311_vm1, %v14616_v43  ;;  %v5201_v43 = vrot.slane %v14078_v61, 1 }
 0x530   : > { %v14640_v30 = vsel %vm1391_vm3, %v5197_v24, %v5199_v54 }
 0x531   : > { %16164 = vst [vmem:[#allocation51_spill] sm:$0xff] %v14640_v30  ;;  %v14646_v1 = vsel %vm1391_vm3, %v5199_v54, %v5201_v43 }
 0x532   : > { %10554 = vmatmul.mubr.msk.f32.gmra.mrb[36].mxu1 %vm311_vm1, %v14622_v26  ;;  %v5203_v26 = vrot.slane %v14084_v5, 1  ;;  %16165 = vst [vmem:[#allocation52_spill] sm:$0xff] %v14646_v1 }
 0x533   : > { %10556 = vmatprep.mubr.msk.f32.mxu1 %vm311_vm1, %v14628_v0  ;;  %v5205_v0 = vrot.slane %v14089_v16, 1 }
 0x534   : > { %v14652_v39 = vsel %vm1391_vm3, %v5201_v43, %v5203_v26  ;;  %v14667_v43 = vld [vmem:[#allocation3 + $0x198] sm:$0xff] }
 0x535   : > { %16166 = vst [vmem:[#allocation53_spill] sm:$0xff] %v14652_v39  ;;  %v14658_v24 = vsel %vm1391_vm3, %v5203_v26, %v5205_v0  ;;  %v15847_v26 = vrot.slane %v14667_v43, 1 }
 0x536   : > { %10557 = vmatmul.mubr.msk.f32.gmra.mrb[38].mxu1 %vm311_vm1, %v14634_v63  ;;  %v5207_v63 = vrot.slane %v14093_v38, 1  ;;  %16167 = vst [vmem:[#allocation55_spill] sm:$0xff] %v14658_v24 }
 0x537   : > { %10559 = vmatprep.mubr.msk.f32.mxu1 %vm311_vm1, %v14640_v30  ;;  %v5209_v30 = vrot.slane %v14098_v37, 1 }
 0x538   : > { %v14664_v54 = vsel %vm1391_vm3, %v5205_v0, %v5207_v63 }
 0x53a   : > { %10560 = vmatmul.mubr.msk.f32.gmra.mrb[40].mxu1 %vm311_vm1, %v14646_v1  ;;  %v5211_v1 = vrot.slane %v14105_v40, 1 }
 0x53b   : > { %10562 = vmatprep.mubr.msk.f32.mxu1 %vm311_vm1, %v14652_v39  ;;  %v14672_v39 = vsel %vm1391_vm3, %v5207_v63, %v5209_v30  ;;  %v14694_v63 = vld [vmem:[%s15530_s4 + $0x14] sm:$0xf] }
 0x53c   : > { %v14685_v0 = vsel %vm1391_vm3, %v5211_v1, %v15847_v26  ;;  %v16175_v26 = vld [vmem:[#allocation81_spill] sm:$0xff] }
 0x53d   : > { %16168 = vst [vmem:[#allocation56_spill] sm:$0xff] %v14685_v0 }
 0x53e   : > { %10563 = vmatmul.mubr.msk.f32.gmra.mrb[42].mxu1 %vm311_vm1, %v14658_v24  ;;  %v14678_v24 = vsel %vm1391_vm3, %v5209_v30, %v5211_v1  ;;  %v16173_v30 = vld [vmem:[#allocation79_spill] sm:$0xff]  ;;  %v16174_v1 = vld [vmem:[#allocation80_spill] sm:$0xff] }
 0x53f   : > { %10565 = vmatprep.mubr.msk.f32.mxu1 %vm311_vm1, %v14664_v54 }
 0x542   : > { %10566 = vmatmul.mubr.msk.f32.gmra.mrb[44].mxu1 %vm311_vm1, %v14672_v39 }
 0x543   : > { %10568 = vmatprep.mubr.msk.f32.mxu1 %vm311_vm1, %v14678_v24 }
 0x546   : > { %10569 = vmatmul.mubr.msk.f32.gmra.mrb[46].mxu1 %vm311_vm1, %v14685_v0 }
 0x547   : > { %10573 = vmatprep.mubr.msk.f32.mxu1 %vm311_vm1, %v14129_v31  ;;  %v16169_v31 = vld [vmem:[#allocation74_spill] sm:$0xff] }
 0x54a   : > { %10574 = vmatmul.mubr.msk.f32.vlgmr.msra.gmra.mrb[0].mxu1 %vm311_vm1, %v14134_v34  ;;  %v16170_v34 = vld [vmem:[#allocation76_spill] sm:$0xff] }
 0x54b   : > { %10646 = vmatpush3.msk.msra.mxu1 %vm608_vm0, %v14404_v8  ;;  %10576 = vmatprep.mubr.msk.f32.mxu1 %vm311_vm1, %v14140_v36  ;;  %v16171_v8 = vld [vmem:[#allocation77_spill] sm:$0xff]  ;;  %v16172_v36 = vld [vmem:[#allocation78_spill] sm:$0xff] }
 0x54c   : > { %10719 = vmatprep.subr.msk.mxu1 %vm608_vm0, %v14694_v63 }
 0x54e   : > { %10577 = vmatmul.mubr.msk.f32.gmra.mrb[2].mxu1 %vm311_vm1, %v14146_v35 }
 0x54f   : > { %10579 = vmatprep.mubr.msk.f32.mxu1 %vm311_vm1, %v14152_v2 }
 0x552   : > { %10580 = vmatmul.mubr.msk.f32.gmra.mrb[4].mxu1 %vm311_vm1, %v14158_v32  ;;  %v16176_v32 = vld [vmem:[#allocation82_spill] sm:$0xff] }
 0x553   : > { %10582 = vmatprep.mubr.msk.f32.mxu1 %vm311_vm1, %v16169_v31  ;;  %v16177_v31 = vld [vmem:[#allocation83_spill] sm:$0xff] }
 0x556   : > { %10583 = vmatmul.mubr.msk.f32.gmra.mrb[6].mxu1 %vm311_vm1, %v16170_v34  ;;  %v16178_v34 = vld [vmem:[#allocation84_spill] sm:$0xff] }
 0x557   : > { %10585 = vmatprep.mubr.msk.f32.mxu1 %vm311_vm1, %v16171_v8  ;;  %v16179_v8 = vld [vmem:[#allocation85_spill] sm:$0xff] }
 0x55a   : > { %10586 = vmatmul.mubr.msk.f32.gmra.mrb[8].mxu1 %vm311_vm1, %v16172_v36  ;;  %v16180_v36 = vld [vmem:[#allocation86_spill] sm:$0xff] }
 0x55b   : > { %10588 = vmatprep.mubr.msk.f32.mxu1 %vm311_vm1, %v16173_v30  ;;  %v16181_v30 = vld [vmem:[#allocation87_spill] sm:$0xff] }
 0x55e   : > { %10589 = vmatmul.mubr.msk.f32.gmra.mrb[10].mxu1 %vm311_vm1, %v16174_v1  ;;  %v16182_v1 = vld [vmem:[#allocation88_spill] sm:$0xff] }
 0x55f   : > { %10591 = vmatprep.mubr.msk.f32.mxu1 %vm311_vm1, %v16175_v26  ;;  %v16183_v26 = vld [vmem:[#allocation89_spill] sm:$0xff] }
 0x562   : > { %10592 = vmatmul.mubr.msk.f32.gmra.mrb[12].mxu1 %vm311_vm1, %v16176_v32  ;;  %v16184_v32 = vld [vmem:[#allocation90_spill] sm:$0xff] }
 0x563   : > { %10594 = vmatprep.mubr.msk.f32.mxu1 %vm311_vm1, %v16177_v31  ;;  %v16185_v31 = vld [vmem:[#allocation91_spill] sm:$0xff] }
 0x566   : > { %10595 = vmatmul.mubr.msk.f32.gmra.mrb[14].mxu1 %vm311_vm1, %v16178_v34  ;;  %v16186_v34 = vld [vmem:[#allocation92_spill] sm:$0xff] }
 0x567   : > { %10597 = vmatprep.mubr.msk.f32.mxu1 %vm311_vm1, %v16179_v8  ;;  %v16187_v8 = vld [vmem:[#allocation93_spill] sm:$0xff] }
 0x56a   : > { %10598 = vmatmul.mubr.msk.f32.gmra.mrb[16].mxu1 %vm311_vm1, %v16180_v36  ;;  %v16188_v36 = vld [vmem:[#allocation94_spill] sm:$0xff] }
 0x56b   : > { %10600 = vmatprep.mubr.msk.f32.mxu1 %vm311_vm1, %v16181_v30  ;;  %v16189_v30 = vld [vmem:[#allocation95_spill] sm:$0xff] }
 0x56e   : > { %10601 = vmatmul.mubr.msk.f32.gmra.mrb[18].mxu1 %vm311_vm1, %v16182_v1  ;;  %v16190_v1 = vld [vmem:[#allocation96_spill] sm:$0xff] }
 0x56f   : > { %10603 = vmatprep.mubr.msk.f32.mxu1 %vm311_vm1, %v16183_v26  ;;  %v16191_v26 = vld [vmem:[#allocation97_spill] sm:$0xff] }
 0x572   : > { %10604 = vmatmul.mubr.msk.f32.gmra.mrb[20].mxu1 %vm311_vm1, %v16184_v32  ;;  %v16192_v32 = vld [vmem:[#allocation98_spill] sm:$0xff] }
 0x573   : > { %10606 = vmatprep.mubr.msk.f32.mxu1 %vm311_vm1, %v16185_v31  ;;  %v16193_v31 = vld [vmem:[#allocation99_spill] sm:$0xff] }
 0x576   : > { %10607 = vmatmul.mubr.msk.f32.gmra.mrb[22].mxu1 %vm311_vm1, %v16186_v34  ;;  %v16194_v34 = vld [vmem:[#allocation101_spill] sm:$0xff] }
 0x577   : > { %10609 = vmatprep.mubr.msk.f32.mxu1 %vm311_vm1, %v16187_v8  ;;  %v16195_v8 = vld [vmem:[#allocation102_spill] sm:$0xff] }
 0x57a   : > { %10610 = vmatmul.mubr.msk.f32.gmra.mrb[24].mxu1 %vm311_vm1, %v16188_v36  ;;  %v16196_v36 = vld [vmem:[#allocation103_spill] sm:$0xff] }
 0x57b   : > { %10612 = vmatprep.mubr.msk.f32.mxu1 %vm311_vm1, %v16189_v30  ;;  %v16197_v30 = vld [vmem:[#allocation104_spill] sm:$0xff] }
 0x57e   : > { %10613 = vmatmul.mubr.msk.f32.gmra.mrb[26].mxu1 %vm311_vm1, %v16190_v1  ;;  %v16198_v1 = vld [vmem:[#allocation105_spill] sm:$0xff] }
 0x57f   : > { %10615 = vmatprep.mubr.msk.f32.mxu1 %vm311_vm1, %v16191_v26  ;;  %v16199_v26 = vld [vmem:[#allocation106_spill] sm:$0xff] }
 0x582   : > { %10616 = vmatmul.mubr.msk.f32.gmra.mrb[28].mxu1 %vm311_vm1, %v16192_v32  ;;  %v16200_v32 = vld [vmem:[#allocation107_spill] sm:$0xff] }
 0x583   : > { %10618 = vmatprep.mubr.msk.f32.mxu1 %vm311_vm1, %v16193_v31  ;;  %v16201_v31 = vld [vmem:[#allocation108_spill] sm:$0xff] }
 0x586   : > { %10619 = vmatmul.mubr.msk.f32.gmra.mrb[30].mxu1 %vm311_vm1, %v16194_v34  ;;  %v16202_v34 = vld [vmem:[#allocation109_spill] sm:$0xff] }
 0x587   : > { %10621 = vmatprep.mubr.msk.f32.mxu1 %vm311_vm1, %v16195_v8 }
 0x58a   : > { %10622 = vmatmul.mubr.msk.f32.gmra.mrb[32].mxu1 %vm311_vm1, %v16196_v36  ;;  %v16203_v36 = vld [vmem:[#allocation111_spill] sm:$0xff] }
 0x58b   : > { %10624 = vmatprep.mubr.msk.f32.mxu1 %vm311_vm1, %v16197_v30  ;;  %v14790_v30 = vld [vmem:[#allocation3 + $0x1a8] sm:$0xff] }
 0x58e   : > { %10625 = vmatmul.mubr.msk.f32.gmra.mrb[34].mxu1 %vm311_vm1, %v16198_v1  ;;  %v14784_v1 = vld [vmem:[#allocation3 + $0x1a0] sm:$0xff] }
 0x58f   : > { %10627 = vmatprep.mubr.msk.f32.mxu1 %vm311_vm1, %v16199_v26  ;;  %v5639_v26 = vrot.slane %v14667_v43, 7 }
 0x592   : > { %10628 = vmatmul.mubr.msk.f32.gmra.mrb[36].mxu1 %vm311_vm1, %v16200_v32  ;;  %v16204_v32 = vld [vmem:[#allocation113_spill] sm:$0xff] }
 0x593   : > { %10630 = vmatprep.mubr.msk.f32.mxu1 %vm311_vm1, %v16201_v31  ;;  %v5641_v31 = vrot.slane %v14784_v1, 7 }
 0x596   : > { %10631 = vmatmul.mubr.msk.f32.gmra.mrb[38].mxu1 %vm311_vm1, %v16202_v34  ;;  %v14803_v34 = vsel %vm902_vm2, %v5639_v26, %v5641_v31 }
 0x597   : > { %10633 = vmatprep.mubr.msk.f32.mxu1 %vm311_vm1, %v14368_v33  ;;  %v16205_v33 = vrot.slane %v14105_v40, 7  ;;  %16207 = vst [vmem:[#allocation58_spill] sm:$0xff] %v14803_v34 }
 0x59a   : > { %10634 = vmatmul.mubr.msk.f32.gmra.mrb[40].mxu1 %vm311_vm1, %v16203_v36  ;;  %v14797_v36 = vsel %vm902_vm2, %v16205_v33, %v5639_v26  ;;  %v11834_v33 = vld [vmem:[#allocation3 + $0x30] sm:$0xff]  ;;  %v11835_v26 = vld [vmem:[#allocation3 + $0x38] sm:$0xff] }
 0x59b   : > { %10636 = vmatprep.mubr.msk.f32.mxu1 %vm311_vm1, %v14380_v55  ;;  %16206 = vst [vmem:[#allocation57_spill] sm:$0xff] %v14797_v36  ;;  %v15854_v55 = vrot.slane %v14790_v30, 7 }
 0x59e   : > { %10637 = vmatmul.mubr.msk.f32.gmra.mrb[42].mxu1 %vm311_vm1, %v16204_v32 }
 0x59f   : > { %10639 = vmatprep.mubr.msk.f32.mxu1 %vm311_vm1, %v14393_v7  ;;  %v14810_v7 = vsel %vm902_vm2, %v5641_v31, %v15854_v55  ;;  %v14826_v31 = vld [vmem:[#allocation3 + $0x48] sm:$0xff]  ;;  %v14846_v55 = vld [vmem:[#allocation3 + $0x70] sm:$0xff] }
 0x5a0   : > { %16212 = vst [vmem:[#allocation64_spill] sm:$0xff] %v14846_v55 }
 0x5a2   : > { %10640 = vmatmul.mubr.msk.f32.gmra.mrb[44].mxu1 %vm311_vm1, %v14797_v36  ;;  %v14818_v36 = vld [vmem:[%s15530_s4 + $0x18] sm:$0xf] }
 0x5a3   : > { %10642 = vmatprep.mubr.msk.f32.mxu1 %vm311_vm1, %v14803_v34  ;;  %v11836_v34 = vld [vmem:[#allocation3 + $0x40] sm:$0xff] }
 0x5a6   : > { %10643 = vmatmul.mubr.msk.f32.gmra.mrb[46].mxu1 %vm311_vm1, %v14810_v7 }
 0x5a7   : > { %10647 = vmatprep.mubr.msk.f32.mxu1 %vm311_vm1, %v11834_v33  ;;  %v14830_v33 = vld [vmem:[#allocation3 + $0x50] sm:$0xff] }
 0x5a8   : > { %16208 = vst [vmem:[#allocation59_spill] sm:$0xff] %v14830_v33 }
 0x5aa   : > { %10648 = vmatmul.mubr.msk.f32.vlgmr.msra.gmra.mrb[0].mxu1 %vm311_vm1, %v11835_v26  ;;  %v14834_v26 = vld [vmem:[#allocation3 + $0x58] sm:$0xff] }
 0x5ab   : > { %10720 = vmatpush3.msk.msra.mxu1 %vm608_vm0, %v14694_v63  ;;  %10650 = vmatprep.mubr.msk.f32.mxu1 %vm311_vm1, %v11836_v34  ;;  %16209 = vst [vmem:[#allocation60_spill] sm:$0xff] %v14834_v26  ;;  %v14838_v63 = vld [vmem:[#allocation3 + $0x60] sm:$0xff]  ;;  %v14842_v34 = vld [vmem:[#allocation3 + $0x68] sm:$0xff] }
 0x5ac   : > { %10793 = vmatprep.subr.msk.mxu1 %vm608_vm0, %v14818_v36  ;;  %16210 = vst [vmem:[#allocation62_spill] sm:$0xff] %v14838_v63  ;;  %16211 = vst [vmem:[#allocation63_spill] sm:$0xff] %v14842_v34 }
 0x5ae   : > { %10651 = vmatmul.mubr.msk.f32.gmra.mrb[2].mxu1 %vm311_vm1, %v14826_v31 }
 0x5af   : > { %10653 = vmatprep.mubr.msk.f32.mxu1 %vm311_vm1, %v14830_v33  ;;  %v14850_v33 = vld [vmem:[#allocation3 + $0x78] sm:$0xff] }
 0x5b0   : > { %16213 = vst [vmem:[#allocation65_spill] sm:$0xff] %v14850_v33 }
 0x5b2   : > { %10654 = vmatmul.mubr.msk.f32.gmra.mrb[4].mxu1 %vm311_vm1, %v14834_v26  ;;  %v14854_v26 = vld [vmem:[#allocation3 + $0x80] sm:$0xff] }
 0x5b3   : > { %10656 = vmatprep.mubr.msk.f32.mxu1 %vm311_vm1, %v14838_v63  ;;  %16214 = vst [vmem:[#allocation66_spill] sm:$0xff] %v14854_v26  ;;  %v14858_v63 = vld [vmem:[#allocation3 + $0x88] sm:$0xff] }
 0x5b4   : > { %16215 = vst [vmem:[#allocation67_spill] sm:$0xff] %v14858_v63 }
 0x5b6   : > { %10657 = vmatmul.mubr.msk.f32.gmra.mrb[6].mxu1 %vm311_vm1, %v14842_v34  ;;  %v14862_v34 = vld [vmem:[#allocation3 + $0x90] sm:$0xff] }
 0x5b7   : > { %10659 = vmatprep.mubr.msk.f32.mxu1 %vm311_vm1, %v14846_v55  ;;  %16216 = vst [vmem:[#allocation68_spill] sm:$0xff] %v14862_v34  ;;  %v14866_v55 = vld [vmem:[#allocation3 + $0x98] sm:$0xff] }
 0x5ba   : > { %10660 = vmatmul.mubr.msk.f32.gmra.mrb[8].mxu1 %vm311_vm1, %v14850_v33  ;;  %v14870_v33 = vld [vmem:[#allocation3 + $0xa0] sm:$0xff] }
 0x5bb   : > { %10662 = vmatprep.mubr.msk.f32.mxu1 %vm311_vm1, %v14854_v26  ;;  %v14874_v26 = vld [vmem:[#allocation3 + $0xa8] sm:$0xff] }
 0x5be   : > { %10663 = vmatmul.mubr.msk.f32.gmra.mrb[10].mxu1 %vm311_vm1, %v14858_v63  ;;  %v14878_v63 = vld [vmem:[#allocation3 + $0xb0] sm:$0xff] }
 0x5bf   : > { %10665 = vmatprep.mubr.msk.f32.mxu1 %vm311_vm1, %v14862_v34  ;;  %v14882_v34 = vld [vmem:[#allocation3 + $0xb8] sm:$0xff] }
 0x5c2   : > { %10666 = vmatmul.mubr.msk.f32.gmra.mrb[12].mxu1 %vm311_vm1, %v14866_v55 }
 0x5c3   : > { %10668 = vmatprep.mubr.msk.f32.mxu1 %vm311_vm1, %v14870_v33 }
 0x5c6   : > { %10669 = vmatmul.mubr.msk.f32.gmra.mrb[14].mxu1 %vm311_vm1, %v14874_v26 }
 0x5c7   : > { %10671 = vmatprep.mubr.msk.f32.mxu1 %vm311_vm1, %v14878_v63 }
 0x5ca   : > { %10672 = vmatmul.mubr.msk.f32.gmra.mrb[16].mxu1 %vm311_vm1, %v14882_v34 }
 0x5cb   : > { %10674 = vmatprep.mubr.msk.f32.mxu1 %vm311_vm1, %v13941_v11  ;;  %v8695_v11 = vld [vmem:[%s15530_s4 + $0x1c] sm:$0xf] }
 0x5ce   : > { %10675 = vmatmul.mubr.msk.f32.gmra.mrb[18].mxu1 %vm311_vm1, %v13947_v29  ;;  %v16217_v29 = vld [vmem:[#allocation115_spill] sm:$0xff] }
 0x5cf   : > { %10677 = vmatprep.mubr.msk.f32.mxu1 %vm311_vm1, %v13954_v46  ;;  %v16218_v46 = vld [vmem:[#allocation116_spill] sm:$0xff] }
 0x5d2   : > { %10678 = vmatmul.mubr.msk.f32.gmra.mrb[20].mxu1 %vm311_vm1, %v13959_v51  ;;  %v16219_v51 = vld [vmem:[#allocation34_spill] sm:$0xff] }
 0x5d3   : > { %10680 = vmatprep.mubr.msk.f32.mxu1 %vm311_vm1, %v13965_v56  ;;  %v16220_v56 = vld [vmem:[#allocation35_spill] sm:$0xff] }
 0x5d6   : > { %10681 = vmatmul.mubr.msk.f32.gmra.mrb[22].mxu1 %vm311_vm1, %v13970_v60  ;;  %v16221_v60 = vld [vmem:[#allocation36_spill] sm:$0xff] }
 0x5d7   : > { %10683 = vmatprep.mubr.msk.f32.mxu1 %vm311_vm1, %v13977_v18  ;;  %v16222_v18 = vld [vmem:[#allocation37_spill] sm:$0xff] }
 0x5da   : > { %10684 = vmatmul.mubr.msk.f32.gmra.mrb[24].mxu1 %vm311_vm1, %v13983_v15  ;;  %v16223_v15 = vld [vmem:[#allocation38_spill] sm:$0xff] }
 0x5db   : > { %10686 = vmatprep.mubr.msk.f32.mxu1 %vm311_vm1, %v13990_v3  ;;  %v16224_v3 = vld [vmem:[#allocation39_spill] sm:$0xff] }
 0x5de   : > { %10687 = vmatmul.mubr.msk.f32.gmra.mrb[26].mxu1 %vm311_vm1, %v13997_v25  ;;  %v16225_v25 = vld [vmem:[#allocation40_spill] sm:$0xff] }
 0x5df   : > { %10689 = vmatprep.mubr.msk.f32.mxu1 %vm311_vm1, %v14004_v27  ;;  %v16226_v27 = vld [vmem:[#allocation41_spill] sm:$0xff] }
 0x5e2   : > { %10690 = vmatmul.mubr.msk.f32.gmra.mrb[28].mxu1 %vm311_vm1, %v14009_v52  ;;  %v16227_v52 = vld [vmem:[#allocation42_spill] sm:$0xff] }
 0x5e3   : > { %10692 = vmatprep.mubr.msk.f32.mxu1 %vm311_vm1, %v14024_v49  ;;  %v16228_v49 = vld [vmem:[#allocation43_spill] sm:$0xff] }
 0x5e6   : > { %10693 = vmatmul.mubr.msk.f32.gmra.mrb[30].mxu1 %vm311_vm1, %v14030_v22  ;;  %v16229_v22 = vld [vmem:[#allocation44_spill] sm:$0xff] }
 0x5e7   : > { %10695 = vmatprep.mubr.msk.f32.mxu1 %vm311_vm1, %v14037_v19  ;;  %v16230_v19 = vld [vmem:[#allocation45_spill] sm:$0xff] }
 0x5ea   : > { %10696 = vmatmul.mubr.msk.f32.gmra.mrb[32].mxu1 %vm311_vm1, %v14042_v10  ;;  %v16231_v10 = vld [vmem:[#allocation46_spill] sm:$0xff] }
 0x5eb   : > { %10698 = vmatprep.mubr.msk.f32.mxu1 %vm311_vm1, %v14048_v45  ;;  %v16232_v45 = vld [vmem:[#allocation47_spill] sm:$0xff] }
 0x5ee   : > { %10699 = vmatmul.mubr.msk.f32.gmra.mrb[34].mxu1 %vm311_vm1, %v14053_v57  ;;  %v16233_v57 = vld [vmem:[#allocation48_spill] sm:$0xff] }
 0x5ef   : > { %10701 = vmatprep.mubr.msk.f32.mxu1 %vm311_vm1, %v14060_v17  ;;  %v16234_v17 = vld [vmem:[#allocation49_spill] sm:$0xff] }
 0x5f2   : > { %10702 = vmatmul.mubr.msk.f32.gmra.mrb[36].mxu1 %vm311_vm1, %v14066_v41  ;;  %v16235_v41 = vld [vmem:[#allocation50_spill] sm:$0xff] }
 0x5f3   : > { %10704 = vmatprep.mubr.msk.f32.mxu1 %vm311_vm1, %v14073_v47  ;;  %v16236_v47 = vld [vmem:[#allocation51_spill] sm:$0xff] }
 0x5f6   : > { %10705 = vmatmul.mubr.msk.f32.gmra.mrb[38].mxu1 %vm311_vm1, %v14078_v61  ;;  %v16237_v61 = vld [vmem:[#allocation52_spill] sm:$0xff] }
 0x5f7   : > { %10707 = vmatprep.mubr.msk.f32.mxu1 %vm311_vm1, %v14084_v5  ;;  %v16238_v5 = vld [vmem:[#allocation53_spill] sm:$0xff] }
 0x5fa   : > { %10708 = vmatmul.mubr.msk.f32.gmra.mrb[40].mxu1 %vm311_vm1, %v14089_v16  ;;  %v16239_v16 = vld [vmem:[#allocation55_spill] sm:$0xff] }
 0x5fb   : > { %10710 = vmatprep.mubr.msk.f32.mxu1 %vm311_vm1, %v14093_v38  ;;  %v15038_v38 = vld [vmem:[#allocation3 + $0x1b0] sm:$0xff] }
 0x5fe   : > { %10711 = vmatmul.mubr.msk.f32.gmra.mrb[42].mxu1 %vm311_vm1, %v14098_v37  ;;  %v6310_v37 = vrot.slane %v14784_v1, 1 }
 0x5ff   : > { %10713 = vmatprep.mubr.msk.f32.mxu1 %vm311_vm1, %v14105_v40  ;;  %v6312_v40 = vrot.slane %v14790_v30, 1 }
 0x602   : > { %10714 = vmatmul.mubr.msk.f32.gmra.mrb[44].mxu1 %vm311_vm1, %v14667_v43 }
 0x603   : > { %10716 = vmatprep.mubr.msk.f32.mxu1 %vm311_vm1, %v14784_v1 }
 0x606   : > { %10717 = vmatmul.mubr.msk.f32.gmra.mrb[46].mxu1 %vm311_vm1, %v14790_v30 }
 0x607   : > { %10721 = vmatprep.mubr.msk.f32.mxu1 %vm311_vm1, %v14418_v20  ;;  %v15865_v20 = vrot.slane %v15038_v38, 1 }
 0x60a   : > { %10722 = vmatmul.mubr.msk.f32.vlgmr.msra.gmra.mrb[0].mxu1 %vm311_vm1, %v14424_v28  ;;  %v16240_v28 = vrot.slane %v14667_v43, 1 }
 0x60b   : > { %10794 = vmatpush3.msk.msra.mxu1 %vm608_vm0, %v14818_v36  ;;  %10724 = vmatprep.mubr.msk.f32.mxu1 %vm311_vm1, %v14430_v58  ;;  %v15055_v36 = vsel %vm1391_vm3, %v6310_v37, %v6312_v40 }
 0x60c   : > { %10867 = vmatprep.subr.msk.mxu1 %vm608_vm0, %v8695_v11  ;;  %v15050_v58 = vsel %vm1391_vm3, %v16240_v28, %v6310_v37  ;;  %16241 = vst [vmem:[#allocation69_spill] sm:$0xff] %v15055_v36  ;;  %v8745_v28 = vld [vmem:[%s15530_s4 + $0x20] sm:$0xf]  ;;  %v16243_v37 = vld [vmem:[#allocation61_spill] sm:$0xff] }
 0x60e   : > { %10725 = vmatmul.mubr.msk.f32.gmra.mrb[2].mxu1 %vm311_vm1, %v14436_v21 }
 0x60f   : > { %10727 = vmatprep.mubr.msk.f32.mxu1 %vm311_vm1, %v14442_v23 }
 0x612   : > { %10728 = vmatmul.mubr.msk.f32.gmra.mrb[4].mxu1 %vm311_vm1, %v14448_v9 }
 0x613   : > { %10730 = vmatprep.mubr.msk.f32.mxu1 %vm311_vm1, %v14454_v4 }
 0x616   : > { %10731 = vmatmul.mubr.msk.f32.gmra.mrb[6].mxu1 %vm311_vm1, %v14460_v14 }
 0x617   : > { %10733 = vmatprep.mubr.msk.f32.mxu1 %vm311_vm1, %v14466_v42 }
 0x61a   : > { %10734 = vmatmul.mubr.msk.f32.gmra.mrb[8].mxu1 %vm311_vm1, %v14472_v44 }
 0x61b   : > { %10736 = vmatprep.mubr.msk.f32.mxu1 %vm311_vm1, %v14478_v48 }
 0x61e   : > { %10737 = vmatmul.mubr.msk.f32.gmra.mrb[10].mxu1 %vm311_vm1, %v14484_v53 }
 0x61f   : > { %10739 = vmatprep.mubr.msk.f32.mxu1 %vm311_vm1, %v14490_v59 }
 0x622   : > { %10740 = vmatmul.mubr.msk.f32.gmra.mrb[12].mxu1 %vm311_vm1, %v14496_v62 }
 0x623   : > { %10742 = vmatprep.mubr.msk.f32.mxu1 %vm311_vm1, %v14502_v50 }
 0x626   : > { %10743 = vmatmul.mubr.msk.f32.gmra.mrb[14].mxu1 %vm311_vm1, %v14508_v13 }
 0x627   : > { %10745 = vmatprep.mubr.msk.f32.mxu1 %vm311_vm1, %v14514_v12 }
 0x62a   : > { %10746 = vmatmul.mubr.msk.f32.gmra.mrb[16].mxu1 %vm311_vm1, %v14520_v6 }
 0x62b   : > { %10748 = vmatprep.mubr.msk.f32.mxu1 %vm311_vm1, %v16217_v29 }
 0x62e   : > { %10749 = vmatmul.mubr.msk.f32.gmra.mrb[18].mxu1 %vm311_vm1, %v16218_v46 }
 0x62f   : > { %10751 = vmatprep.mubr.msk.f32.mxu1 %vm311_vm1, %v16219_v51 }
 0x632   : > { %10752 = vmatmul.mubr.msk.f32.gmra.mrb[20].mxu1 %vm311_vm1, %v16220_v56 }
 0x633   : > { %10754 = vmatprep.mubr.msk.f32.mxu1 %vm311_vm1, %v16221_v60 }
 0x636   : > { %10755 = vmatmul.mubr.msk.f32.gmra.mrb[22].mxu1 %vm311_vm1, %v16222_v18 }
 0x637   : > { %10757 = vmatprep.mubr.msk.f32.mxu1 %vm311_vm1, %v16223_v15 }
 0x63a   : > { %10758 = vmatmul.mubr.msk.f32.gmra.mrb[24].mxu1 %vm311_vm1, %v16224_v3 }
 0x63b   : > { %10760 = vmatprep.mubr.msk.f32.mxu1 %vm311_vm1, %v16225_v25 }
 0x63e   : > { %10761 = vmatmul.mubr.msk.f32.gmra.mrb[26].mxu1 %vm311_vm1, %v16226_v27 }
 0x63f   : > { %10763 = vmatprep.mubr.msk.f32.mxu1 %vm311_vm1, %v16227_v52 }
 0x642   : > { %10764 = vmatmul.mubr.msk.f32.gmra.mrb[28].mxu1 %vm311_vm1, %v16228_v49 }
 0x643   : > { %10766 = vmatprep.mubr.msk.f32.mxu1 %vm311_vm1, %v16229_v22 }
 0x646   : > { %10767 = vmatmul.mubr.msk.f32.gmra.mrb[30].mxu1 %vm311_vm1, %v16230_v19 }
 0x647   : > { %10769 = vmatprep.mubr.msk.f32.mxu1 %vm311_vm1, %v16231_v10 }
 0x64a   : > { %10770 = vmatmul.mubr.msk.f32.gmra.mrb[32].mxu1 %vm311_vm1, %v16232_v45 }
 0x64b   : > { %10772 = vmatprep.mubr.msk.f32.mxu1 %vm311_vm1, %v16233_v57 }
 0x64e   : > { %10773 = vmatmul.mubr.msk.f32.gmra.mrb[34].mxu1 %vm311_vm1, %v16234_v17 }
 0x64f   : > { %10775 = vmatprep.mubr.msk.f32.mxu1 %vm311_vm1, %v16235_v41 }
 0x652   : > { %10776 = vmatmul.mubr.msk.f32.gmra.mrb[36].mxu1 %vm311_vm1, %v16236_v47 }
 0x653   : > { %10778 = vmatprep.mubr.msk.f32.mxu1 %vm311_vm1, %v16237_v61 }
 0x656   : > { %10779 = vmatmul.mubr.msk.f32.gmra.mrb[38].mxu1 %vm311_vm1, %v16238_v5 }
 0x657   : > { %10781 = vmatprep.mubr.msk.f32.mxu1 %vm311_vm1, %v16239_v16 }
 0x65a   : > { %10782 = vmatmul.mubr.msk.f32.gmra.mrb[40].mxu1 %vm311_vm1, %v14664_v54 }
 0x65b   : > { %10784 = vmatprep.mubr.msk.f32.mxu1 %vm311_vm1, %v14672_v39 }
 0x65e   : > { %10785 = vmatmul.mubr.msk.f32.gmra.mrb[42].mxu1 %vm311_vm1, %v14678_v24 }
 0x65f   : > { %10787 = vmatprep.mubr.msk.f32.mxu1 %vm311_vm1, %v14685_v0  ;;  %v15062_v0 = vsel %vm1391_vm3, %v6312_v40, %v15865_v20  ;;  %v16244_v40 = vld [vmem:[#allocation74_spill] sm:$0xff]  ;;  %v16245_v20 = vld [vmem:[#allocation76_spill] sm:$0xff] }
 0x660   : > { %16242 = vst [vmem:[#allocation70_spill] sm:$0xff] %v15062_v0 }
 0x662   : > { %10788 = vmatmul.mubr.msk.f32.gmra.mrb[44].mxu1 %vm311_vm1, %v15050_v58 }
 0x663   : > { %10790 = vmatprep.mubr.msk.f32.mxu1 %vm311_vm1, %v15055_v36  ;;  %v16251_v36 = vld [vmem:[#allocation82_spill] sm:$0xff] }
 0x666   : > { %10791 = vmatmul.mubr.msk.f32.gmra.mrb[46].mxu1 %vm311_vm1, %v15062_v0  ;;  %v16247_v0 = vld [vmem:[#allocation78_spill] sm:$0xff] }
 0x667   : > { %10795 = vmatprep.mubr.msk.f32.mxu1 %vm311_vm1, %v14146_v35  ;;  %v16246_v35 = vld [vmem:[#allocation77_spill] sm:$0xff] }
 0x66a   : > { %10796 = vmatmul.mubr.msk.f32.vlgmr.msra.gmra.mrb[0].mxu1 %vm311_vm1, %v14152_v2  ;;  %v16248_v2 = vld [vmem:[#allocation79_spill] sm:$0xff] }
 0x66b   : > { %10868 = vmatpush3.msk.msra.mxu1 %vm608_vm0, %v8695_v11  ;;  %10798 = vmatprep.mubr.msk.f32.mxu1 %vm311_vm1, %v16243_v37  ;;  %v16249_v11 = vld [vmem:[#allocation80_spill] sm:$0xff]  ;;  %v16250_v37 = vld [vmem:[#allocation81_spill] sm:$0xff] }
 0x66c   : > { %10941 = vmatprep.subr.msk.mxu1 %vm608_vm0, %v8745_v28 }
 0x66e   : > { %10799 = vmatmul.mubr.msk.f32.gmra.mrb[2].mxu1 %vm311_vm1, %v16244_v40  ;;  %v16252_v40 = vld [vmem:[#allocation83_spill] sm:$0xff] }
 0x66f   : > { %10801 = vmatprep.mubr.msk.f32.mxu1 %vm311_vm1, %v16245_v20  ;;  %v16253_v20 = vld [vmem:[#allocation84_spill] sm:$0xff] }
 0x672   : > { %10802 = vmatmul.mubr.msk.f32.gmra.mrb[4].mxu1 %vm311_vm1, %v16246_v35  ;;  %v16254_v35 = vld [vmem:[#allocation85_spill] sm:$0xff] }
 0x673   : > { %10804 = vmatprep.mubr.msk.f32.mxu1 %vm311_vm1, %v16247_v0  ;;  %v16255_v0 = vld [vmem:[#allocation86_spill] sm:$0xff] }
 0x676   : > { %10805 = vmatmul.mubr.msk.f32.gmra.mrb[6].mxu1 %vm311_vm1, %v16248_v2  ;;  %v16256_v2 = vld [vmem:[#allocation87_spill] sm:$0xff] }
 0x677   : > { %10807 = vmatprep.mubr.msk.f32.mxu1 %vm311_vm1, %v16249_v11  ;;  %v16257_v11 = vld [vmem:[#allocation88_spill] sm:$0xff] }
 0x67a   : > { %10808 = vmatmul.mubr.msk.f32.gmra.mrb[8].mxu1 %vm311_vm1, %v16250_v37  ;;  %v16258_v37 = vld [vmem:[#allocation89_spill] sm:$0xff] }
 0x67b   : > { %10810 = vmatprep.mubr.msk.f32.mxu1 %vm311_vm1, %v16251_v36  ;;  %v16259_v36 = vld [vmem:[#allocation90_spill] sm:$0xff] }
 0x67e   : > { %10811 = vmatmul.mubr.msk.f32.gmra.mrb[10].mxu1 %vm311_vm1, %v16252_v40  ;;  %v16260_v40 = vld [vmem:[#allocation91_spill] sm:$0xff] }
 0x67f   : > { %10813 = vmatprep.mubr.msk.f32.mxu1 %vm311_vm1, %v16253_v20  ;;  %v16261_v20 = vld [vmem:[#allocation92_spill] sm:$0xff] }
 0x682   : > { %10814 = vmatmul.mubr.msk.f32.gmra.mrb[12].mxu1 %vm311_vm1, %v16254_v35  ;;  %v16262_v35 = vld [vmem:[#allocation93_spill] sm:$0xff] }
 0x683   : > { %10816 = vmatprep.mubr.msk.f32.mxu1 %vm311_vm1, %v16255_v0  ;;  %v16263_v0 = vld [vmem:[#allocation94_spill] sm:$0xff] }
 0x686   : > { %10817 = vmatmul.mubr.msk.f32.gmra.mrb[14].mxu1 %vm311_vm1, %v16256_v2  ;;  %v16264_v2 = vld [vmem:[#allocation95_spill] sm:$0xff] }
 0x687   : > { %10819 = vmatprep.mubr.msk.f32.mxu1 %vm311_vm1, %v16257_v11  ;;  %v16265_v11 = vld [vmem:[#allocation96_spill] sm:$0xff] }
 0x68a   : > { %10820 = vmatmul.mubr.msk.f32.gmra.mrb[16].mxu1 %vm311_vm1, %v16258_v37  ;;  %v16266_v37 = vld [vmem:[#allocation97_spill] sm:$0xff] }
 0x68b   : > { %10822 = vmatprep.mubr.msk.f32.mxu1 %vm311_vm1, %v16259_v36  ;;  %v16267_v36 = vld [vmem:[#allocation98_spill] sm:$0xff] }
 0x68e   : > { %10823 = vmatmul.mubr.msk.f32.gmra.mrb[18].mxu1 %vm311_vm1, %v16260_v40  ;;  %v16268_v40 = vld [vmem:[#allocation99_spill] sm:$0xff] }
 0x68f   : > { %10825 = vmatprep.mubr.msk.f32.mxu1 %vm311_vm1, %v16261_v20  ;;  %v16269_v20 = vld [vmem:[#allocation101_spill] sm:$0xff] }
 0x692   : > { %10826 = vmatmul.mubr.msk.f32.gmra.mrb[20].mxu1 %vm311_vm1, %v16262_v35  ;;  %v16270_v35 = vld [vmem:[#allocation103_spill] sm:$0xff] }
 0x693   : > { %10828 = vmatprep.mubr.msk.f32.mxu1 %vm311_vm1, %v16263_v0  ;;  %v16271_v0 = vld [vmem:[#allocation104_spill] sm:$0xff] }
 0x696   : > { %10829 = vmatmul.mubr.msk.f32.gmra.mrb[22].mxu1 %vm311_vm1, %v16264_v2  ;;  %v16272_v2 = vld [vmem:[#allocation105_spill] sm:$0xff] }
 0x697   : > { %10831 = vmatprep.mubr.msk.f32.mxu1 %vm311_vm1, %v16265_v11  ;;  %v16273_v11 = vld [vmem:[#allocation106_spill] sm:$0xff] }
 0x69a   : > { %10832 = vmatmul.mubr.msk.f32.gmra.mrb[24].mxu1 %vm311_vm1, %v16266_v37  ;;  %v16274_v37 = vld [vmem:[#allocation107_spill] sm:$0xff] }
 0x69b   : > { %10834 = vmatprep.mubr.msk.f32.mxu1 %vm311_vm1, %v16267_v36  ;;  %v16275_v36 = vld [vmem:[#allocation108_spill] sm:$0xff] }
 0x69e   : > { %10835 = vmatmul.mubr.msk.f32.gmra.mrb[26].mxu1 %vm311_vm1, %v16268_v40  ;;  %v16276_v40 = vld [vmem:[#allocation109_spill] sm:$0xff] }
 0x69f   : > { %10837 = vmatprep.mubr.msk.f32.mxu1 %vm311_vm1, %v16269_v20  ;;  %v16278_v20 = vld [vmem:[#allocation111_spill] sm:$0xff] }
 0x6a2   : > { %10838 = vmatmul.mubr.msk.f32.gmra.mrb[28].mxu1 %vm311_vm1, %v16195_v8  ;;  %v16277_v8 = vld [vmem:[#allocation110_spill] sm:$0xff] }
 0x6a3   : > { %10840 = vmatprep.mubr.msk.f32.mxu1 %vm311_vm1, %v16270_v35  ;;  %v16279_v35 = vld [vmem:[#allocation112_spill] sm:$0xff] }
 0x6a6   : > { %10841 = vmatmul.mubr.msk.f32.gmra.mrb[30].mxu1 %vm311_vm1, %v16271_v0  ;;  %v15153_v0 = vld [vmem:[#allocation3 + $0x1b8] sm:$0xff] }
 0x6a7   : > { %10843 = vmatprep.mubr.msk.f32.mxu1 %vm311_vm1, %v16272_v2  ;;  %v16280_v2 = vld [vmem:[#allocation114_spill] sm:$0xff] }
 0x6aa   : > { %10844 = vmatmul.mubr.msk.f32.gmra.mrb[32].mxu1 %vm311_vm1, %v16273_v11  ;;  %v16281_v11 = vld [vmem:[#allocation57_spill] sm:$0xff] }
 0x6ab   : > { %10846 = vmatprep.mubr.msk.f32.mxu1 %vm311_vm1, %v16274_v37  ;;  %v6650_v37 = vrot.slane %v15038_v38, 7 }
 0x6ae   : > { %10847 = vmatmul.mubr.msk.f32.gmra.mrb[34].mxu1 %vm311_vm1, %v16275_v36  ;;  %v6652_v36 = vrot.slane %v15153_v0, 7 }
 0x6af   : > { %10849 = vmatprep.mubr.msk.f32.mxu1 %vm311_vm1, %v16276_v40  ;;  %v15161_v40 = vld [vmem:[#allocation3 + $0x1c0] sm:$0xff] }
 0x6b2   : > { %10850 = vmatmul.mubr.msk.f32.gmra.mrb[36].mxu1 %vm311_vm1, %v16277_v8  ;;  %v16282_v8 = vld [vmem:[#allocation58_spill] sm:$0xff] }
 0x6b3   : > { %10852 = vmatprep.mubr.msk.f32.mxu1 %vm311_vm1, %v16278_v20 }
 0x6b6   : > { %10853 = vmatmul.mubr.msk.f32.gmra.mrb[38].mxu1 %vm311_vm1, %v16279_v35  ;;  %v6654_v35 = vrot.slane %v15161_v40, 7 }
 0x6b7   : > { %10855 = vmatprep.mubr.msk.f32.mxu1 %vm311_vm1, %v16204_v32  ;;  %v16283_v32 = vrot.slane %v14790_v30, 7 }
 0x6b9   : > { %v6651_v20 = vsel %vm902_vm2, %v16283_v32, %v6650_v37  ;;  %v16287_v32 = vld [vmem:[#allocation63_spill] sm:$0xff] }
 0x6ba   : > { %10856 = vmatmul.mubr.msk.f32.gmra.mrb[40].mxu1 %vm311_vm1, %v16280_v2  ;;  %v6653_v2 = vsel %vm902_vm2, %v6650_v37, %v6652_v36  ;;  %v16286_v37 = vld [vmem:[#allocation62_spill] sm:$0xff] }
 0x6bb   : > { %10858 = vmatprep.mubr.msk.f32.mxu1 %vm311_vm1, %v16281_v11  ;;  %v6655_v11 = vsel %vm902_vm2, %v6652_v36, %v6654_v35  ;;  %v16288_v36 = vld [vmem:[#allocation64_spill] sm:$0xff]  ;;  %v16291_v35 = vld [vmem:[#allocation67_spill] sm:$0xff] }
 0x6be   : > { %10859 = vmatmul.mubr.msk.f32.gmra.mrb[42].mxu1 %vm311_vm1, %v16282_v8  ;;  %v16285_v8 = vld [vmem:[#allocation60_spill] sm:$0xff] }
 0x6bf   : > { %10861 = vmatprep.mubr.msk.f32.mxu1 %vm311_vm1, %v14810_v7  ;;  %v16284_v7 = vld [vmem:[#allocation59_spill] sm:$0xff] }
 0x6c2   : > { %10862 = vmatmul.mubr.msk.f32.gmra.mrb[44].mxu1 %vm311_vm1, %v6651_v20  ;;  %v16289_v20 = vld [vmem:[#allocation65_spill] sm:$0xff] }
 0x6c3   : > { %10864 = vmatprep.mubr.msk.f32.mxu1 %vm311_vm1, %v6653_v2  ;;  %v11852_v2 = vld [vmem:[#allocation3 + $0xc0] sm:$0xff] }
 0x6c6   : > { %10865 = vmatmul.mubr.msk.f32.gmra.mrb[46].mxu1 %vm311_vm1, %v6655_v11  ;;  %v11853_v11 = vld [vmem:[#allocation3 + $0xc8] sm:$0xff] }
 0x6c7   : > { %10869 = vmatprep.mubr.msk.f32.mxu1 %vm311_vm1, %v14826_v31  ;;  %v16290_v31 = vld [vmem:[#allocation66_spill] sm:$0xff] }
 0x6ca   : > { %10870 = vmatmul.mubr.msk.f32.vlgmr.msra.gmra.mrb[0].mxu1 %vm311_vm1, %v16284_v7  ;;  %v11854_v7 = vld [vmem:[#allocation3 + $0xd0] sm:$0xff] }
 0x6cb   : > { %10942 = vmatpush3.msk.msra.mxu1 %vm608_vm0, %v8745_v28  ;;  %10872 = vmatprep.mubr.msk.f32.mxu1 %vm311_vm1, %v16285_v8  ;;  %v16292_v28 = vld [vmem:[#allocation68_spill] sm:$0xff] }
 0x6cc   : > { %v11860_v8 = vld [vmem:[#allocation3 + $0x100] sm:$0xff] }
 0x6ce   : > { %10873 = vmatmul.mubr.msk.f32.gmra.mrb[2].mxu1 %vm311_vm1, %v16286_v37  ;;  %v11861_v37 = vld [vmem:[#allocation3 + $0x108] sm:$0xff] }
 0x6cf   : > { %10875 = vmatprep.mubr.msk.f32.mxu1 %vm311_vm1, %v16287_v32  ;;  %v11862_v32 = vld [vmem:[#allocation3 + $0x110] sm:$0xff] }
 0x6d2   : > { %10876 = vmatmul.mubr.msk.f32.gmra.mrb[4].mxu1 %vm311_vm1, %v16288_v36  ;;  %v11863_v36 = vld [vmem:[#allocation3 + $0x118] sm:$0xff] }
 0x6d3   : > { %10878 = vmatprep.mubr.msk.f32.mxu1 %vm311_vm1, %v16289_v20  ;;  %v11864_v20 = vld [vmem:[#allocation3 + $0x120] sm:$0xff] }
 0x6d6   : > { %10879 = vmatmul.mubr.msk.f32.gmra.mrb[6].mxu1 %vm311_vm1, %v16290_v31  ;;  %v11865_v31 = vld [vmem:[#allocation3 + $0x128] sm:$0xff] }
 0x6d7   : > { %10881 = vmatprep.mubr.msk.f32.mxu1 %vm311_vm1, %v16291_v35  ;;  %v11866_v35 = vld [vmem:[#allocation3 + $0x130] sm:$0xff] }
 0x6da   : > { %10882 = vmatmul.mubr.msk.f32.gmra.mrb[8].mxu1 %vm311_vm1, %v16292_v28  ;;  %v11867_v28 = vld [vmem:[#allocation3 + $0x138] sm:$0xff] }
 0x6db   : > { %10884 = vmatprep.mubr.msk.f32.mxu1 %vm311_vm1, %v14866_v55  ;;  %v11855_v55 = vld [vmem:[#allocation3 + $0xd8] sm:$0xff] }
 0x6de   : > { %10885 = vmatmul.mubr.msk.f32.gmra.mrb[10].mxu1 %vm311_vm1, %v14870_v33  ;;  %v11856_v33 = vld [vmem:[#allocation3 + $0xe0] sm:$0xff] }
 0x6df   : > { %10887 = vmatprep.mubr.msk.f32.mxu1 %vm311_vm1, %v14874_v26  ;;  %v11857_v26 = vld [vmem:[#allocation3 + $0xe8] sm:$0xff] }
 0x6e2   : > { %10888 = vmatmul.mubr.msk.f32.gmra.mrb[12].mxu1 %vm311_vm1, %v14878_v63  ;;  %v11858_v63 = vld [vmem:[#allocation3 + $0xf0] sm:$0xff] }
 0x6e3   : > { %10890 = vmatprep.mubr.msk.f32.mxu1 %vm311_vm1, %v14882_v34  ;;  %v11859_v34 = vld [vmem:[#allocation3 + $0xf8] sm:$0xff] }
 0x6e6   : > { %10891 = vmatmul.mubr.msk.f32.gmra.mrb[14].mxu1 %vm311_vm1, %v11852_v2  ;;  %v11868_v2 = vld [vmem:[#allocation3 + $0x140] sm:$0xff] }
 0x6e7   : > { %10893 = vmatprep.mubr.msk.f32.mxu1 %vm311_vm1, %v11853_v11  ;;  %v11869_v11 = vld [vmem:[#allocation3 + $0x148] sm:$0xff] }
 0x6ea   : > { %10894 = vmatmul.mubr.msk.f32.gmra.mrb[16].mxu1 %vm311_vm1, %v11854_v7  ;;  %v11870_v7 = vld [vmem:[#allocation3 + $0x150] sm:$0xff] }
 0x6eb   : > { %10896 = vmatprep.mubr.msk.f32.mxu1 %vm311_vm1, %v11855_v55  ;;  %v11871_v55 = vld [vmem:[#allocation3 + $0x158] sm:$0xff] }
 0x6ee   : > { %10897 = vmatmul.mubr.msk.f32.gmra.mrb[18].mxu1 %vm311_vm1, %v11856_v33  ;;  %v11872_v33 = vld [vmem:[#allocation3 + $0x160] sm:$0xff] }
 0x6ef   : > { %10899 = vmatprep.mubr.msk.f32.mxu1 %vm311_vm1, %v11857_v26  ;;  %v11873_v26 = vld [vmem:[#allocation3 + $0x168] sm:$0xff] }
 0x6f2   : > { %10900 = vmatmul.mubr.msk.f32.gmra.mrb[20].mxu1 %vm311_vm1, %v11858_v63  ;;  %v11874_v63 = vld [vmem:[#allocation3 + $0x170] sm:$0xff] }
 0x6f3   : > { %10902 = vmatprep.mubr.msk.f32.mxu1 %vm311_vm1, %v11859_v34  ;;  %v11875_v34 = vld [vmem:[#allocation3 + $0x178] sm:$0xff] }
 0x6f6   : > { %10903 = vmatmul.mubr.msk.f32.gmra.mrb[22].mxu1 %vm311_vm1, %v11860_v8  ;;  %v11876_v8 = vld [vmem:[#allocation3 + $0x180] sm:$0xff] }
 0x6f7   : > { %10905 = vmatprep.mubr.msk.f32.mxu1 %vm311_vm1, %v11861_v37  ;;  %v11877_v37 = vld [vmem:[#allocation3 + $0x188] sm:$0xff] }
 0x6fa   : > { %10906 = vmatmul.mubr.msk.f32.gmra.mrb[24].mxu1 %vm311_vm1, %v11862_v32  ;;  %v11878_v32 = vld [vmem:[#allocation3 + $0x190] sm:$0xff] }
 0x6fb   : > { %10908 = vmatprep.mubr.msk.f32.mxu1 %vm311_vm1, %v11863_v36 }
 0x6fe   : > { %10909 = vmatmul.mubr.msk.f32.gmra.mrb[26].mxu1 %vm311_vm1, %v11864_v20 }
 0x6ff   : > { %10911 = vmatprep.mubr.msk.f32.mxu1 %vm311_vm1, %v11865_v31  ;;  %v16302_v31 = vld [vmem:[#allocation8_spill] sm:$0xff] }
 0x702   : > { %10912 = vmatmul.mubr.msk.f32.gmra.mrb[28].mxu1 %vm311_vm1, %v11866_v35 }
 0x703   : > { %10914 = vmatprep.mubr.msk.f32.mxu1 %vm311_vm1, %v11867_v28 }
 0x706   : > { %10915 = vmatmul.mubr.msk.f32.gmra.mrb[30].mxu1 %vm311_vm1, %v11868_v2 }
 0x707   : > { %10917 = vmatprep.mubr.msk.f32.mxu1 %vm311_vm1, %v11869_v11 }
 0x70a   : > { %10918 = vmatmul.mubr.msk.f32.gmra.mrb[32].mxu1 %vm311_vm1, %v11870_v7 }
 0x70b   : > { %10920 = vmatprep.mubr.msk.f32.mxu1 %vm311_vm1, %v11871_v55  ;;  %v16303_v55 = vld [vmem:[#allocation10_spill] sm:$0xff] }
 0x70e   : > { %10921 = vmatmul.mubr.msk.f32.gmra.mrb[34].mxu1 %vm311_vm1, %v11872_v33 }
 0x70f   : > { %10923 = vmatprep.mubr.msk.f32.mxu1 %vm311_vm1, %v11873_v26 }
 0x712   : > { %10924 = vmatmul.mubr.msk.f32.gmra.mrb[36].mxu1 %vm311_vm1, %v11874_v63 }
 0x713   : > { %10926 = vmatprep.mubr.msk.f32.mxu1 %vm311_vm1, %v11875_v34 }
 0x716   : > { %10927 = vmatmul.mubr.msk.f32.gmra.mrb[38].mxu1 %vm311_vm1, %v11876_v8 }
 0x717   : > { %10929 = vmatprep.mubr.msk.f32.mxu1 %vm311_vm1, %v11877_v37 }
 0x71a   : > { %10930 = vmatmul.mubr.msk.f32.gmra.mrb[40].mxu1 %vm311_vm1, %v11878_v32 }
 0x71b   : > { %10932 = vmatprep.mubr.msk.f32.mxu1 %vm311_vm1, %v14667_v43 }
 0x71e   : > { %10933 = vmatmul.mubr.msk.f32.gmra.mrb[42].mxu1 %vm311_vm1, %v14784_v1  ;;  %v16297_v1 = vld [vmem:[#allocation5_spill] sm:$0xff] }
 0x71f   : > { %10935 = vmatprep.mubr.msk.f32.mxu1 %vm311_vm1, %v14790_v30 }
 0x722   : > { %10936 = vmatmul.mubr.msk.f32.gmra.mrb[44].mxu1 %vm311_vm1, %v15038_v38 }
 0x723   : > { %10938 = vmatprep.mubr.msk.f32.mxu1 %vm311_vm1, %v15153_v0 }
 0x726   : > { %10939 = vmatmul.mubr.msk.f32.gmra.mrb[46].mxu1 %vm311_vm1, %v15161_v40 }
 0x727   : > { %10943 = vmatprep.mubr.msk.f32.mxu1 %vm311_vm1, %v14436_v21  ;;  %v16293_v21 = vld [vmem:[#allocation56_spill] sm:$0xff] }
 0x72a   : > { %10944 = vmatmul.mubr.msk.f32.vlgmr.msra.gmra.mrb[0].mxu1 %vm311_vm1, %v14442_v23  ;;  %v7321_v23 = vrot.slane %v15153_v0, 1  ;;  %v16301_v0 = vld [vmem:[#allocation9_spill] sm:$0xff] }
 0x72b   : > { %10946 = vmatprep.mubr.msk.f32.mxu1 %vm311_vm1, %v14448_v9  ;;  %v7323_v9 = vrot.slane %v15161_v40, 1 }
 0x72e   : > { %10947 = vmatmul.mubr.msk.f32.gmra.mrb[2].mxu1 %vm311_vm1, %v14454_v4  ;;  %v4189_v4 = vld [vmem:[#allocation3 + $0x1c8] sm:$0xff] }
 0x72f   : > { %10949 = vmatprep.mubr.msk.f32.mxu1 %vm311_vm1, %v14460_v14  ;;  %v16294_v14 = vld [vmem:[#allocation69_spill] sm:$0xff] }
 0x732   : > { %10950 = vmatmul.mubr.msk.f32.gmra.mrb[4].mxu1 %vm311_vm1, %v14466_v42  ;;  %v16295_v42 = vld [vmem:[#allocation70_spill] sm:$0xff] }
 0x733   : > { %10952 = vmatprep.mubr.msk.f32.mxu1 %vm311_vm1, %v14472_v44  ;;  %v16296_v44 = vrot.slane %v15038_v38, 1 }
 0x736   : > { %10953 = vmatmul.mubr.msk.f32.gmra.mrb[6].mxu1 %vm311_vm1, %v14478_v48  ;;  %v7322_v48 = vsel %vm1391_vm3, %v16296_v44, %v7321_v23 }
 0x737   : > { %10955 = vmatprep.mubr.msk.f32.mxu1 %vm311_vm1, %v14484_v53  ;;  %v7325_v53 = vrot.slane %v4189_v4, 1 }
 0x73a   : > { %10956 = vmatmul.mubr.msk.f32.gmra.mrb[8].mxu1 %vm311_vm1, %v14490_v59  ;;  %v7324_v59 = vsel %vm1391_vm3, %v7321_v23, %v7323_v9  ;;  %v16304_v23 = vld [vmem:[#allocation11_spill] sm:$0xff] }
 0x73b   : > { %10958 = vmatprep.mubr.msk.f32.mxu1 %vm311_vm1, %v14496_v62  ;;  %v7326_v62 = vsel %vm1391_vm3, %v7323_v9, %v7325_v53  ;;  %v16305_v53 = vld [vmem:[#allocation13_spill] sm:$0xff] }
 0x73e   : > { %10959 = vmatmul.mubr.msk.f32.gmra.mrb[10].mxu1 %vm311_vm1, %v14502_v50  ;;  %v15349_v50 = vld [vmem:[%s15531_s5] ss:$0 sm:$0xff] }
 0x73f   : > { %10961 = vmatprep.mubr.msk.f32.mxu1 %vm311_vm1, %v14508_v13 }
 0x742   : > { %10962 = vmatmul.mubr.msk.f32.gmra.mrb[12].mxu1 %vm311_vm1, %v14514_v12  ;;  %v15354_v12 = vld [vmem:[%s15532_s6] ss:$0 sm:$0xff] }
 0x743   : > { %10964 = vmatprep.mubr.msk.f32.mxu1 %vm311_vm1, %v14520_v6 }
 0x746   : > { %10965 = vmatmul.mubr.msk.f32.gmra.mrb[14].mxu1 %vm311_vm1, %v16217_v29 }
 0x747   : > { %10967 = vmatprep.mubr.msk.f32.mxu1 %vm311_vm1, %v16218_v46 }
 0x74a   : > { %10968 = vmatmul.mubr.msk.f32.gmra.mrb[16].mxu1 %vm311_vm1, %v16219_v51 }
 0x74b   : > { %10970 = vmatprep.mubr.msk.f32.mxu1 %vm311_vm1, %v16220_v56  ;;  %v16298_v56 = vld [vmem:[#allocation4_spill] sm:$0xff] }
 0x74e   : > { %10971 = vmatmul.mubr.msk.f32.gmra.mrb[18].mxu1 %vm311_vm1, %v16221_v60 }
 0x74f   : > { %10973 = vmatprep.mubr.msk.f32.mxu1 %vm311_vm1, %v16222_v18 }
 0x752   : > { %10974 = vmatmul.mubr.msk.f32.gmra.mrb[20].mxu1 %vm311_vm1, %v16223_v15 }
 0x753   : > { %10976 = vmatprep.mubr.msk.f32.mxu1 %vm311_vm1, %v16224_v3 }
 0x756   : > { %10977 = vmatmul.mubr.msk.f32.gmra.mrb[22].mxu1 %vm311_vm1, %v16225_v25 }
 0x757   : > { %10979 = vmatprep.mubr.msk.f32.mxu1 %vm311_vm1, %v16226_v27  ;;  %v16299_v27 = vld [vmem:[#allocation6_spill] sm:$0xff] }
 0x75a   : > { %10980 = vmatmul.mubr.msk.f32.gmra.mrb[24].mxu1 %vm311_vm1, %v16227_v52 }
 0x75b   : > { %10982 = vmatprep.mubr.msk.f32.mxu1 %vm311_vm1, %v16228_v49 }
 0x75e   : > { %10983 = vmatmul.mubr.msk.f32.gmra.mrb[26].mxu1 %vm311_vm1, %v16229_v22 }
 0x75f   : > { %10985 = vmatprep.mubr.msk.f32.mxu1 %vm311_vm1, %v16230_v19 }
 0x762   : > { %10986 = vmatmul.mubr.msk.f32.gmra.mrb[28].mxu1 %vm311_vm1, %v16231_v10 }
 0x763   : > { %10988 = vmatprep.mubr.msk.f32.mxu1 %vm311_vm1, %v16232_v45 }
 0x766   : > { %10989 = vmatmul.mubr.msk.f32.gmra.mrb[30].mxu1 %vm311_vm1, %v16233_v57 }
 0x767   : > { %10991 = vmatprep.mubr.msk.f32.mxu1 %vm311_vm1, %v16234_v17 }
 0x76a   : > { %10992 = vmatmul.mubr.msk.f32.gmra.mrb[32].mxu1 %vm311_vm1, %v16235_v41  ;;  %v16300_v41 = vld [vmem:[#allocation7_spill] sm:$0xff] }
 0x76b   : > { %10994 = vmatprep.mubr.msk.f32.mxu1 %vm311_vm1, %v16236_v47 }
 0x76e   : > { %10995 = vmatmul.mubr.msk.f32.gmra.mrb[34].mxu1 %vm311_vm1, %v16237_v61 }
 0x76f   : > { %10997 = vmatprep.mubr.msk.f32.mxu1 %vm311_vm1, %v16238_v5 }
 0x772   : > { %10998 = vmatmul.mubr.msk.f32.gmra.mrb[36].mxu1 %vm311_vm1, %v16239_v16 }
 0x773   : > { %11000 = vmatprep.mubr.msk.f32.mxu1 %vm311_vm1, %v14664_v54 }
 0x776   : > { %11001 = vmatmul.mubr.msk.f32.gmra.mrb[38].mxu1 %vm311_vm1, %v14672_v39 }
 0x777   : > { %11003 = vmatprep.mubr.msk.f32.mxu1 %vm311_vm1, %v14678_v24 }
 0x77a   : > { %11004 = vmatmul.mubr.msk.f32.gmra.mrb[40].mxu1 %vm311_vm1, %v16293_v21 }
 0x77b   : > { %11006 = vmatprep.mubr.msk.f32.mxu1 %vm311_vm1, %v15050_v58 }
 0x77e   : > { %11007 = vmatmul.mubr.msk.f32.gmra.mrb[42].mxu1 %vm311_vm1, %v16294_v14 }
 0x77f   : > { %11009 = vmatprep.mubr.msk.f32.mxu1 %vm311_vm1, %v16295_v42 }
 0x782   : > { %11010 = vmatmul.mubr.msk.f32.gmra.mrb[44].mxu1 %vm311_vm1, %v7322_v48 }
 0x783   : > { %11012 = vmatprep.mubr.msk.f32.mxu1 %vm311_vm1, %v7324_v59 }
 0x786   : > { %11013 = vmatmul.mubr.msk.f32.gmra.mrb[46].mxu1 %vm311_vm1, %v7326_v62 }
 0x7fd   : > { %v10945_v13 = vpop.f32.mrb[0].mxu1 }
 0x7fe   : > { %v7665_v6 = vmul.f32 %v10945_v13, %v15349_v50  ;;  %v7402_v39 = vpop.f32.mrb[1].mxu1 }
 0x7ff   : > { %v7664_v24 = vmul.f32 %v15349_v50, %v7402_v39 }
 0x800   : > { %v7704_v54 = vadd.f32 %v15354_v12, %v7665_v6  ;;  %v16306_v6 = vld [vmem:[#allocation12_spill] sm:$0xff] }
 0x801   : > { %v7703_v43 = vadd.f32 %v15354_v12, %v7664_v24  ;;  %v10948_v30 = vpop.f32.mrb[2].mxu1 }
 0x802   : > { %v7736_v29 = vadd.f32 %v7704_v54, %v16297_v1  ;;  %v7666_v46 = vmul.f32 %v10948_v30, %v15349_v50  ;;  %v7412_v51 = vpop.f32.mrb[3].mxu1  ;;  %v16307_v1 = vld [vmem:[#allocation14_spill] sm:$0xff] }
 0x803   : > { %v7735_v60 = vadd.f32 %v7703_v43, %v16298_v56 }
 0x804   : > { %v7768_v18 = vmax.f32 %v7736_v29, 0.0  ;;  %v7705_v15 = vadd.f32 %v15354_v12, %v7666_v46 }
 0x805   : > { %v7767_v3 = vmax.f32 %v7735_v60, 0.0  ;;  %v10951_v25 = vpop.f32.mrb[4].mxu1 }
 0x806   : > { %7800 = vst.msk [vmem:[%s15367_s14 + $0x8] sm:$0xff] %vm311_vm1, %v7768_v18  ;;  %v7737_v52 = vadd.f32 %v7705_v15, %v16299_v27  ;;  %v7421_v49 = vpop.f32.mrb[5].mxu1  ;;  %v16308_v25 = vld [vmem:[#allocation15_spill] sm:$0xff] }
 0x807   : > { %7799 = vst.msk [vmem:[%s15367_s14] sm:$0xff] %vm311_vm1, %v7767_v3  ;;  %v7667_v22 = vmul.f32 %v15349_v50, %v7421_v49 }
 0x808   : > { %v7769_v19 = vmax.f32 %v7737_v52, 0.0 }
 0x809   : > { %v7706_v10 = vadd.f32 %v15354_v12, %v7667_v22  ;;  %v10954_v45 = vpop.f32.mrb[6].mxu1 }
 0x80a   : > { %7801 = vst.msk [vmem:[%s15367_s14 + $0x10] sm:$0xff] %vm311_vm1, %v7769_v19  ;;  %v7669_v57 = vmul.f32 %v10954_v45, %v15349_v50  ;;  %v7430_v17 = vpop.f32.mrb[7].mxu1  ;;  %v16309_v45 = vld [vmem:[#allocation17_spill] sm:$0xff] }
 0x80b   : > { %v7738_v47 = vadd.f32 %v7706_v10, %v16300_v41  ;;  %v7668_v61 = vmul.f32 %v15349_v50, %v7430_v17 }
 0x80c   : > { %v7708_v5 = vadd.f32 %v15354_v12, %v7669_v57 }
 0x80d   : > { %v7770_v16 = vmax.f32 %v7738_v47, 0.0  ;;  %v7707_v38 = vadd.f32 %v15354_v12, %v7668_v61  ;;  %v10957_v58 = vpop.f32.mrb[8].mxu1  ;;  %v16310_v47 = vld [vmem:[#allocation16_spill] sm:$0xff] }
 0x80e   : > { %v7740_v40 = vadd.f32 %v7708_v5, %v16301_v0  ;;  %v7670_v36 = vmul.f32 %v10957_v58, %v15349_v50  ;;  %v7440_v20 = vpop.f32.mrb[9].mxu1  ;;  %v16311_v0 = vld [vmem:[#allocation18_spill] sm:$0xff] }
 0x80f   : > { %7802 = vst.msk [vmem:[%s15367_s14 + $0x18] sm:$0xff] %vm311_vm1, %v7770_v16  ;;  %v7739_v35 = vadd.f32 %v7707_v38, %v16302_v31 }
 0x810   : > { %v7772_v28 = vmax.f32 %v7740_v40, 0.0  ;;  %v7709_v2 = vadd.f32 %v15354_v12, %v7670_v36 }
 0x811   : > { %v7771_v11 = vmax.f32 %v7739_v35, 0.0  ;;  %v10960_v7 = vpop.f32.mrb[10].mxu1 }
 0x812   : > { %7804 = vst.msk [vmem:[%s15367_s14 + $0x28] sm:$0xff] %vm311_vm1, %v7772_v28  ;;  %v7741_v33 = vadd.f32 %v7709_v2, %v16303_v55  ;;  %v7449_v26 = vpop.f32.mrb[11].mxu1  ;;  %v16312_v7 = vld [vmem:[#allocation19_spill] sm:$0xff] }
 0x813   : > { %7803 = vst.msk [vmem:[%s15367_s14 + $0x20] sm:$0xff] %vm311_vm1, %v7771_v11  ;;  %v7671_v63 = vmul.f32 %v15349_v50, %v7449_v26 }
 0x814   : > { %v7773_v34 = vmax.f32 %v7741_v33, 0.0 }
 0x815   : > { %v7710_v8 = vadd.f32 %v15354_v12, %v7671_v63  ;;  %v10963_v37 = vpop.f32.mrb[12].mxu1 }
 0x816   : > { %7805 = vst.msk [vmem:[%s15367_s14 + $0x30] sm:$0xff] %vm311_vm1, %v7773_v34  ;;  %v7673_v32 = vmul.f32 %v10963_v37, %v15349_v50  ;;  %v7458_v21 = vpop.f32.mrb[13].mxu1  ;;  %v16313_v37 = vld [vmem:[#allocation21_spill] sm:$0xff] }
 0x817   : > { %v7742_v9 = vadd.f32 %v7710_v8, %v16304_v23  ;;  %v7672_v4 = vmul.f32 %v15349_v50, %v7458_v21 }
 0x818   : > { %v7712_v14 = vadd.f32 %v15354_v12, %v7673_v32 }
 0x819   : > { %v7774_v42 = vmax.f32 %v7742_v9, 0.0  ;;  %v7711_v44 = vadd.f32 %v15354_v12, %v7672_v4  ;;  %v10966_v48 = vpop.f32.mrb[14].mxu1  ;;  %v16314_v9 = vld [vmem:[#allocation20_spill] sm:$0xff] }
 0x81a   : > { %v7744_v59 = vadd.f32 %v7712_v14, %v16305_v53  ;;  %v7674_v62 = vmul.f32 %v10966_v48, %v15349_v50  ;;  %v7468_v13 = vpop.f32.mrb[15].mxu1  ;;  %v16315_v53 = vld [vmem:[#allocation22_spill] sm:$0xff] }
 0x81b   : > { %7806 = vst.msk [vmem:[%s15367_s14 + $0x38] sm:$0xff] %vm311_vm1, %v7774_v42  ;;  %v7743_v39 = vadd.f32 %v7711_v44, %v16306_v6 }
 0x81c   : > { %v7776_v24 = vmax.f32 %v7744_v59, 0.0  ;;  %v7713_v54 = vadd.f32 %v15354_v12, %v7674_v62 }
 0x81d   : > { %v7775_v43 = vmax.f32 %v7743_v39, 0.0  ;;  %v10969_v30 = vpop.f32.mrb[16].mxu1 }
 0x81e   : > { %7808 = vst.msk [vmem:[%s15367_s14 + $0x48] sm:$0xff] %vm311_vm1, %v7776_v24  ;;  %v7745_v29 = vadd.f32 %v7713_v54, %v16307_v1  ;;  %v7477_v46 = vpop.f32.mrb[17].mxu1  ;;  %v16316_v30 = vld [vmem:[#allocation23_spill] sm:$0xff] }
 0x81f   : > { %7807 = vst.msk [vmem:[%s15367_s14 + $0x40] sm:$0xff] %vm311_vm1, %v7775_v43  ;;  %v7675_v51 = vmul.f32 %v15349_v50, %v7477_v46 }
 0x820   : > { %v7777_v56 = vmax.f32 %v7745_v29, 0.0 }
 0x821   : > { %v7714_v60 = vadd.f32 %v15354_v12, %v7675_v51  ;;  %v10972_v18 = vpop.f32.mrb[18].mxu1 }
 0x822   : > { %7809 = vst.msk [vmem:[%s15367_s14 + $0x50] sm:$0xff] %vm311_vm1, %v7777_v56  ;;  %v7677_v15 = vmul.f32 %v10972_v18, %v15349_v50  ;;  %v7486_v3 = vpop.f32.mrb[19].mxu1  ;;  %v16317_v18 = vld [vmem:[#allocation25_spill] sm:$0xff] }
 0x823   : > { %v7746_v27 = vadd.f32 %v7714_v60, %v16308_v25  ;;  %v7676_v52 = vmul.f32 %v15349_v50, %v7486_v3 }
 0x824   : > { %v7716_v49 = vadd.f32 %v15354_v12, %v7677_v15 }
 0x825   : > { %v7778_v22 = vmax.f32 %v7746_v27, 0.0  ;;  %v7715_v19 = vadd.f32 %v15354_v12, %v7676_v52  ;;  %v10975_v10 = vpop.f32.mrb[20].mxu1  ;;  %v16318_v27 = vld [vmem:[#allocation24_spill] sm:$0xff] }
 0x826   : > { %v7748_v57 = vadd.f32 %v7716_v49, %v16309_v45  ;;  %v7678_v17 = vmul.f32 %v10975_v10, %v15349_v50  ;;  %v7496_v41 = vpop.f32.mrb[21].mxu1  ;;  %v16319_v45 = vld [vmem:[#allocation26_spill] sm:$0xff] }
 0x827   : > { %7810 = vst.msk [vmem:[%s15367_s14 + $0x58] sm:$0xff] %vm311_vm1, %v7778_v22  ;;  %v7747_v61 = vadd.f32 %v7715_v19, %v16310_v47 }
 0x828   : > { %v7780_v5 = vmax.f32 %v7748_v57, 0.0  ;;  %v7717_v16 = vadd.f32 %v15354_v12, %v7678_v17 }
 0x829   : > { %v7779_v38 = vmax.f32 %v7747_v61, 0.0  ;;  %v10978_v58 = vpop.f32.mrb[22].mxu1 }
 0x82a   : > { %7812 = vst.msk [vmem:[%s15367_s14 + $0x68] sm:$0xff] %vm311_vm1, %v7780_v5  ;;  %v7749_v40 = vadd.f32 %v7717_v16, %v16311_v0  ;;  %v7505_v36 = vpop.f32.mrb[23].mxu1  ;;  %v16320_v58 = vld [vmem:[#allocation27_spill] sm:$0xff] }
 0x82b   : > { %7811 = vst.msk [vmem:[%s15367_s14 + $0x60] sm:$0xff] %vm311_vm1, %v7779_v38  ;;  %v7679_v20 = vmul.f32 %v15349_v50, %v7505_v36 }
 0x82c   : > { %v7781_v31 = vmax.f32 %v7749_v40, 0.0 }
 0x82d   : > { %v7718_v35 = vadd.f32 %v15354_v12, %v7679_v20  ;;  %v10981_v28 = vpop.f32.mrb[24].mxu1 }
 0x82e   : > { %7813 = vst.msk [vmem:[%s15367_s14 + $0x70] sm:$0xff] %vm311_vm1, %v7781_v31  ;;  %v7681_v2 = vmul.f32 %v10981_v28, %v15349_v50  ;;  %v7514_v11 = vpop.f32.mrb[25].mxu1  ;;  %v16321_v28 = vld [vmem:[#allocation29_spill] sm:$0xff] }
 0x82f   : > { %v7750_v55 = vadd.f32 %v7718_v35, %v16312_v7  ;;  %v7680_v33 = vmul.f32 %v15349_v50, %v7514_v11 }
 0x830   : > { %v7720_v26 = vadd.f32 %v15354_v12, %v7681_v2 }
 0x831   : > { %v7782_v63 = vmax.f32 %v7750_v55, 0.0  ;;  %v7719_v34 = vadd.f32 %v15354_v12, %v7680_v33  ;;  %v10984_v8 = vpop.f32.mrb[26].mxu1  ;;  %v16322_v55 = vld [vmem:[#allocation28_spill] sm:$0xff] }
 0x832   : > { %v7752_v32 = vadd.f32 %v7720_v26, %v16313_v37  ;;  %v7682_v21 = vmul.f32 %v10984_v8, %v15349_v50  ;;  %v7524_v23 = vpop.f32.mrb[27].mxu1  ;;  %v16323_v37 = vld [vmem:[#allocation30_spill] sm:$0xff] }
 0x833   : > { %7814 = vst.msk [vmem:[%s15367_s14 + $0x78] sm:$0xff] %vm311_vm1, %v7782_v63  ;;  %v7751_v4 = vadd.f32 %v7719_v34, %v16314_v9 }
 0x834   : > { %v7784_v14 = vmax.f32 %v7752_v32, 0.0  ;;  %v7721_v42 = vadd.f32 %v15354_v12, %v7682_v21 }
 0x835   : > { %v7783_v44 = vmax.f32 %v7751_v4, 0.0  ;;  %v10987_v48 = vpop.f32.mrb[28].mxu1 }
 0x836   : > { %7816 = vst.msk [vmem:[%s15367_s14 + $0x88] sm:$0xff] %vm311_vm1, %v7784_v14  ;;  %v7753_v59 = vadd.f32 %v7721_v42, %v16315_v53  ;;  %v7533_v62 = vpop.f32.mrb[29].mxu1  ;;  %v16324_v48 = vld [vmem:[#allocation31_spill] sm:$0xff] }
 0x837   : > { %7815 = vst.msk [vmem:[%s15367_s14 + $0x80] sm:$0xff] %vm311_vm1, %v7783_v44  ;;  %v7683_v13 = vmul.f32 %v15349_v50, %v7533_v62 }
 0x838   : > { %v7785_v6 = vmax.f32 %v7753_v59, 0.0 }
 0x839   : > { %v7722_v39 = vadd.f32 %v15354_v12, %v7683_v13  ;;  %v10990_v24 = vpop.f32.mrb[30].mxu1 }
 0x83a   : > { %7817 = vst.msk [vmem:[%s15367_s14 + $0x90] sm:$0xff] %vm311_vm1, %v7785_v6  ;;  %v7685_v54 = vmul.f32 %v10990_v24, %v15349_v50  ;;  %v7542_v43 = vpop.f32.mrb[31].mxu1  ;;  %v16325_v24 = vld [vmem:[#allocation33_spill] sm:$0xff] }
 0x83b   : > { %v7754_v1 = vadd.f32 %v7722_v39, %v16316_v30  ;;  %v7684_v29 = vmul.f32 %v15349_v50, %v7542_v43 }
 0x83c   : > { %v7724_v46 = vadd.f32 %v15354_v12, %v7685_v54 }
 0x83d   : > { %v7786_v51 = vmax.f32 %v7754_v1, 0.0  ;;  %v7723_v56 = vadd.f32 %v15354_v12, %v7684_v29  ;;  %v10993_v60 = vpop.f32.mrb[32].mxu1  ;;  %v16326_v1 = vld [vmem:[#allocation32_spill] sm:$0xff] }
 0x83e   : > { %v7756_v15 = vadd.f32 %v7724_v46, %v16317_v18  ;;  %v7686_v3 = vmul.f32 %v10993_v60, %v15349_v50  ;;  %v7552_v25 = vpop.f32.mrb[33].mxu1  ;;  %v16327_v18 = vld [vmem:[#allocation54_spill] sm:$0xff] }
 0x83f   : > { %7818 = vst.msk [vmem:[%s15367_s14 + $0x98] sm:$0xff] %vm311_vm1, %v7786_v51  ;;  %v7755_v52 = vadd.f32 %v7723_v56, %v16318_v27 }
 0x840   : > { %v7788_v49 = vmax.f32 %v7756_v15, 0.0  ;;  %v7725_v22 = vadd.f32 %v15354_v12, %v7686_v3 }
 0x841   : > { %v7787_v19 = vmax.f32 %v7755_v52, 0.0  ;;  %v10996_v10 = vpop.f32.mrb[34].mxu1 }
 0x842   : > { %7820 = vst.msk [vmem:[%s15367_s14 + $0xa8] sm:$0xff] %vm311_vm1, %v7788_v49  ;;  %v7757_v57 = vadd.f32 %v7725_v22, %v16319_v45  ;;  %v7561_v17 = vpop.f32.mrb[35].mxu1  ;;  %v16328_v49 = vld [vmem:[#allocation100_spill] sm:$0xff] }
 0x843   : > { %7819 = vst.msk [vmem:[%s15367_s14 + $0xa0] sm:$0xff] %vm311_vm1, %v7787_v19  ;;  %v7687_v41 = vmul.f32 %v15349_v50, %v7561_v17 }
 0x844   : > { %v7789_v47 = vmax.f32 %v7757_v57, 0.0 }
 0x845   : > { %v7726_v61 = vadd.f32 %v15354_v12, %v7687_v41  ;;  %v10999_v5 = vpop.f32.mrb[36].mxu1 }
 0x846   : > { %7821 = vst.msk [vmem:[%s15367_s14 + $0xb0] sm:$0xff] %vm311_vm1, %v7789_v47  ;;  %v7689_v16 = vmul.f32 %v10999_v5, %v15349_v50  ;;  %v7570_v38 = vpop.f32.mrb[37].mxu1 }
 0x847   : > { %v7758_v0 = vadd.f32 %v7726_v61, %v16320_v58  ;;  %v7688_v40 = vmul.f32 %v15349_v50, %v7570_v38 }
 0x848   : > { %v7728_v36 = vadd.f32 %v15354_v12, %v7689_v16 }
 0x849   : > { %v7790_v20 = vmax.f32 %v7758_v0, 0.0  ;;  %v7727_v31 = vadd.f32 %v15354_v12, %v7688_v40  ;;  %v11002_v35 = vpop.f32.mrb[38].mxu1 }
 0x84a   : > { %v7760_v2 = vadd.f32 %v7728_v36, %v16321_v28  ;;  %v7690_v11 = vmul.f32 %v11002_v35, %v15349_v50  ;;  %v7580_v7 = vpop.f32.mrb[39].mxu1 }
 0x84b   : > { %7822 = vst.msk [vmem:[%s15367_s14 + $0xb8] sm:$0xff] %vm311_vm1, %v7790_v20  ;;  %v7759_v33 = vadd.f32 %v7727_v31, %v16322_v55 }
 0x84c   : > { %v7792_v26 = vmax.f32 %v7760_v2, 0.0  ;;  %v7729_v63 = vadd.f32 %v15354_v12, %v7690_v11 }
 0x84d   : > { %v7791_v34 = vmax.f32 %v7759_v33, 0.0  ;;  %v11005_v8 = vpop.f32.mrb[40].mxu1 }
 0x84e   : > { %7824 = vst.msk [vmem:[%s15367_s14 + $0xc8] sm:$0xff] %vm311_vm1, %v7792_v26  ;;  %v7761_v32 = vadd.f32 %v7729_v63, %v16323_v37  ;;  %v7589_v21 = vpop.f32.mrb[41].mxu1 }
 0x84f   : > { %7823 = vst.msk [vmem:[%s15367_s14 + $0xc0] sm:$0xff] %vm311_vm1, %v7791_v34  ;;  %v7691_v23 = vmul.f32 %v15349_v50, %v7589_v21 }
 0x850   : > { %v7793_v9 = vmax.f32 %v7761_v32, 0.0 }
 0x851   : > { %v7730_v4 = vadd.f32 %v15354_v12, %v7691_v23  ;;  %v11008_v14 = vpop.f32.mrb[42].mxu1 }
 0x852   : > { %7825 = vst.msk [vmem:[%s15367_s14 + $0xd0] sm:$0xff] %vm311_vm1, %v7793_v9  ;;  %v7693_v42 = vmul.f32 %v11008_v14, %v15349_v50  ;;  %v7598_v44 = vpop.f32.mrb[43].mxu1 }
 0x853   : > { %v7762_v53 = vadd.f32 %v7730_v4, %v16324_v48  ;;  %v7692_v59 = vmul.f32 %v15349_v50, %v7598_v44 }
 0x854   : > { %v7732_v62 = vadd.f32 %v15354_v12, %v7693_v42 }
 0x855   : > { %v7794_v13 = vmax.f32 %v7762_v53, 0.0  ;;  %v7731_v6 = vadd.f32 %v15354_v12, %v7692_v59  ;;  %v11011_v39 = vpop.f32.mrb[44].mxu1 }
 0x856   : > { %v7764_v54 = vadd.f32 %v7732_v62, %v16325_v24  ;;  %v7694_v43 = vmul.f32 %v11011_v39, %v15349_v50  ;;  %v7608_v30 = vpop.f32.mrb[45].mxu1 }
 0x857   : > { %7826 = vst.msk [vmem:[%s15367_s14 + $0xd8] sm:$0xff] %vm311_vm1, %v7794_v13  ;;  %v7763_v29 = vadd.f32 %v7731_v6, %v16326_v1 }
 0x858   : > { %v7796_v46 = vmax.f32 %v7764_v54, 0.0  ;;  %v7733_v51 = vadd.f32 %v15354_v12, %v7694_v43 }
 0x859   : > { %v7795_v56 = vmax.f32 %v7763_v29, 0.0  ;;  %v11014_v60 = vpop.f32.mrb[46].mxu1 }
 0x85a   : > { %7828 = vst.msk [vmem:[%s15367_s14 + $0xe8] sm:$0xff] %vm311_vm1, %v7796_v46  ;;  %v7765_v15 = vadd.f32 %v7733_v51, %v16327_v18  ;;  %v7617_v3 = vpop.f32.mrb[47].mxu1 }
 0x85b   : > { %7827 = vst.msk [vmem:[%s15367_s14 + $0xe0] sm:$0xff] %vm311_vm1, %v7795_v56  ;;  %v7695_v25 = vmul.f32 %v15349_v50, %v7617_v3 }
 0x85c   : > { %v7797_v27 = vmax.f32 %v7765_v15, 0.0 }
 0x85d   : > { %v7734_v52 = vadd.f32 %v15354_v12, %v7695_v25 }
 0x85e   : > { %7829 = vst.msk [vmem:[%s15367_s14 + $0xf0] sm:$0xff] %vm311_vm1, %v7797_v27 }
 0x85f   : > { %v7766_v22 = vadd.f32 %v7734_v52, %v16328_v49 }
 0x861   : > { %v7798_v19 = vmax.f32 %v7766_v22, 0.0 }
 0x863   : > { %7830 = vst.msk [vmem:[%s15367_s14 + $0xf8] sm:$0xff] %vm311_vm1, %v7798_v19 }
 0x864 PF: > { %s17_s24 = sadd.s32 1, %s11885_s24  }
 0x865   : > { %p14_p4 = scmp.ge.s32.totalorder %s17_s24, 4  }
 0x867   :  { %16 = sbr.rel (!%p14_p4) target bundleno = 1 (0x1), region = 96 }

</bundles_post_ra>
